<compile_context>
chip_gen: v7x
topology: tpu7x:2x2x1
jax: 0.10.0
libtpu: 0.0.40
codegen_flags: <defaults>
</compile_context>

<pallas_src>
import functools

import jax
import jax.numpy as jnp
import numpy as np
from jax.experimental import pallas as pl
from jax.experimental.pallas import tpu as pltpu


def gcn_fused_kernel(x_ref, mask_ref, adj_ref,
                     wrp_ref, brp_ref, waf_ref, ba_ref,
                     out_ref, fr_stk_ref, *, num_hop, num_rel):
    """All hops of the GCN layer for one block of `block_b` batch elements.

    Row-stacked layout: row index = b*N + j for batch-in-block b, node j.

    x_ref      : (Bb*N, D)     f32   input node features (stacked)
    mask_ref   : (Bb*N, 1)     f32   node mask (stacked)
    adj_ref    : (Bb, N, R*N)  bf16  flattened adjacency, [:, :, r*N + j]
    wrp_ref    : (D, (R+1)*P)  bf16  [fr_1 | ... | fr_R | fs] weights
    brp_ref    : (1, (R+1)*P)  f32   matching biases
    waf_ref    : (P+D, P)      bf16  fa weight; rows [0:P] x update, [P:] x cur
    ba_ref     : (1, P)        f32   fa bias
    out_ref    : (Bb*N, P)     f32   output; also carries `cur` across hops
    fr_stk_ref : (Bb, R*N, P)  bf16  scratch: restacked relation projections
    """
    bb, n, _ = adj_ref.shape
    bn, _ = x_ref.shape
    p = waf_ref.shape[1]
    rp = num_rel * p

    # cur starts as the input; carried in out_ref (f32) across hops.
    out_ref[...] = x_ref[...]

    # Hop-invariant mask broadcasts (hoisted — JAX does not CSE broadcasts).
    m = mask_ref[...]                                      # (Bb*N, 1) f32
    m_all = jnp.broadcast_to(m, (bn, rp + p))              # (Bb*N, (R+1)*P)
    m_p = jnp.broadcast_to(m, (bn, p))                     # (Bb*N, P)

    for _ in range(num_hop):              # static unroll; num_hop is small
        cur = out_ref[...]                                 # (Bb*N, P) f32
        cur_b = cur.astype(jnp.bfloat16)

        # (a) ALL per-relation projections + the self projection in ONE matmul:
        #     columns [r*P:(r+1)*P] = fr_{r+1}(cur), columns [R*P:] = fs(cur).
        proj = (jnp.dot(cur_b, wrp_ref[...],
                        preferred_element_type=jnp.float32)
                + brp_ref[...]) * m_all                    # (Bb*N, (R+1)*P)

        # Restack relation blocks into the bf16 scratch with static, aligned
        # stores so the aggregation is a single K = R*N matmul per batch elem.
        # Row order r*N + j matches the adjacency column order.
        for b in range(bb):
            for r in range(num_rel):
                fr_stk_ref[b, r * n:(r + 1) * n, :] = (
                    proj[b * n:(b + 1) * n,
                         r * p:(r + 1) * p].astype(jnp.bfloat16))

        # (b) neighbor aggregation over ALL relations (batched MXU matmul).
        agg = jnp.einsum("bik,bkp->bip", adj_ref[...], fr_stk_ref[...],
                         preferred_element_type=jnp.float32)   # (Bb, N, P)

        update = agg.reshape(bn, p) + proj[:, rp:]         # + masked self term
        update_b = update.astype(jnp.bfloat16)

        # (c) gate = sigmoid(fa(cat(update, cur))) * mask as ONE K = P+D matmul.
        gate_lin = (jnp.dot(jnp.concatenate([update_b, cur_b], axis=-1),
                            waf_ref[...],
                            preferred_element_type=jnp.float32)
                    + ba_ref[...])
        gate = jax.nn.sigmoid(gate_lin) * m_p

        out_ref[...] = gate * jnp.tanh(update) + (1.0 - gate) * cur


def flatten_adjacency(adj):
    """(B, R, N, N) -> (B, N, R*N) bf16 with [b, i, r*N + j] = adj[b, r, i, j].

    The adjacency is hop- and typically layer-invariant: compute this ONCE and
    reuse it across hops / layers / calls (the relayout is a full HBM pass).
    0/1 entries are exact in bf16."""
    B, R, N, _ = adj.shape
    return jnp.transpose(adj, (0, 2, 1, 3)).reshape(B, N, R * N).astype(jnp.bfloat16)


@functools.partial(jax.jit, static_argnames=("num_hop", "block_b"))
def gcn_layer_forward(x, input_mask, adj_flat, params, num_hop, block_b=2):
    """Pallas implementation of gcnLayer.forward (all hops in one kernel).

    adj_flat must come from flatten_adjacency(adj) (cache it caller-side)."""
    B, N, D = x.shape
    R = adj_flat.shape[2] // N
    P = params["ws"].shape[1]
    assert D == P, "gcnLayer.forward requires input_dim == proj_dim"
    assert x.dtype == jnp.float32
    assert B % block_b == 0, "batch must be divisible by block_b"

    # Row-stacked (B*N, .) views so each grid step's matmuls see M = block_b*N.
    x2 = x.reshape(B * N, D)
    mask2 = input_mask.reshape(B * N, 1).astype(jnp.float32)

    # Pack [fr_1 | ... | fr_R | fs] -> one projection matmul per hop, and
    # [wa_u ; wa_x] -> one K = P+D gate matmul per hop.
    wr_all = jnp.transpose(params["wr"], (1, 0, 2)).reshape(D, R * P)
    wrp = jnp.concatenate([wr_all, params["ws"]], axis=1).astype(jnp.bfloat16)
    brp = jnp.concatenate([params["br"][:, 0, :].reshape(1, R * P),
                           params["bs"].reshape(1, P)],
                          axis=1).astype(jnp.float32)
    waf = jnp.concatenate([params["wa_u"], params["wa_x"]],
                          axis=0).astype(jnp.bfloat16)
    ba = params["ba"].astype(jnp.float32)

    def rep(a):   # weights: same (whole-array) block for every grid step
        return pl.BlockSpec(a.shape, lambda g, _nd=a.ndim: (0,) * _nd)

    kernel = functools.partial(gcn_fused_kernel, num_hop=num_hop, num_rel=R)

    out2 = pl.pallas_call(
        kernel,
        out_shape=jax.ShapeDtypeStruct((B * N, P), x.dtype),
        grid_spec=pltpu.PrefetchScalarGridSpec(
            num_scalar_prefetch=0,
            grid=(B // block_b,),
            in_specs=[
                pl.BlockSpec((block_b * N, D), lambda g: (g, 0)),        # x
                pl.BlockSpec((block_b * N, 1), lambda g: (g, 0)),        # mask
                pl.BlockSpec((block_b, N, R * N), lambda g: (g, 0, 0)),  # adj
                rep(wrp), rep(brp), rep(waf), rep(ba),
            ],
            out_specs=pl.BlockSpec((block_b * N, P), lambda g: (g, 0)),
            scratch_shapes=[pltpu.VMEM((block_b, R * N, P), jnp.bfloat16)],
        ),
        compiler_params=pltpu.CompilerParams(
            dimension_semantics=("parallel",),
            # Below the 64 MiB/TC physical VMEM on v7x; demo footprint << 1 MiB.
            vmem_limit_bytes=48 * 1024 * 1024),
    )(x2, mask2, adj_flat, wrp, brp, waf, ba)

    return out2.reshape(B, N, P)


def gcn_layer_reference_f32(x, input_mask, adj, params, num_hop):
    """Pure-JAX fp32 reference mirroring the PyTorch code (dropout = identity)."""
    cur = x.astype(jnp.float32)
    adjf = adj.astype(jnp.float32)
    m = input_mask[..., None].astype(jnp.float32)                  # (B, N, 1)
    R = adj.shape[1]
    for _ in range(num_hop):
        frs = jnp.stack(
            [cur @ params["wr"][r] + params["br"][r, 0] for r in range(R)],
            axis=1) * m[:, None]                                   # (B, R, N, P)
        update = (jnp.sum(jnp.matmul(adjf, frs), axis=1)
                  + (cur @ params["ws"] + params["bs"][0]) * m)
        gate = jax.nn.sigmoid(update @ params["wa_u"] + cur @ params["wa_x"]
                              + params["ba"][0]) * m
        cur = gate * jnp.tanh(update) + (1.0 - gate) * cur
    return cur


def gcn_layer_reference_bf16(x, input_mask, adj, params, num_hop):
    """Pure-JAX reference with the kernel's bf16-operand / fp32-accumulate
    numerics and fused-gate structure (tight correctness check)."""
    f32, bf16 = jnp.float32, jnp.bfloat16
    dot = lambda a, b: jnp.dot(a.astype(bf16), b.astype(bf16),
                               preferred_element_type=f32)
    cur = x.astype(f32)
    adjb = adj.astype(bf16)
    m = input_mask[..., None].astype(f32)                          # (B, N, 1)
    R = adj.shape[1]
    wa_full = jnp.concatenate([params["wa_u"], params["wa_x"]], axis=0)
    for _ in range(num_hop):
        frs = jnp.stack(
            [dot(cur, params["wr"][r]) + params["br"][r, 0] for r in range(R)],
            axis=1) * m[:, None]                                   # (B, R, N, P)
        agg = jnp.einsum("brij,brjp->bip", adjb, frs.astype(bf16),
                         preferred_element_type=f32)
        update = agg + (dot(cur, params["ws"]) + params["bs"][0]) * m
        gate = jax.nn.sigmoid(
            dot(jnp.concatenate([update, cur], axis=-1), wa_full)
            + params["ba"][0]) * m
        cur = gate * jnp.tanh(update) + (1.0 - gate) * cur
    return cur


def make_params(key, input_dim, proj_dim, gcn_num_rel, scale=0.02):
    """Deterministic synthetic parameters (PyTorch Linear stores (out,in); we
    store the transposed (in,out) so the kernel computes x @ W)."""
    ks = jax.random.split(key, 6)
    wr = scale * jax.random.normal(ks[0], (gcn_num_rel, input_dim, proj_dim), jnp.float32)
    br = scale * jax.random.normal(ks[1], (gcn_num_rel, 1, proj_dim), jnp.float32)
    ws = scale * jax.random.normal(ks[2], (input_dim, proj_dim), jnp.float32)
    bs = scale * jax.random.normal(ks[3], (1, proj_dim), jnp.float32)
    wa = scale * jax.random.normal(ks[4], (proj_dim + input_dim, proj_dim), jnp.float32)
    ba = scale * jax.random.normal(ks[5], (1, proj_dim), jnp.float32)
    return {
        "wr": wr, "br": br, "ws": ws, "bs": bs,
        "wa_u": wa[:proj_dim],      # multiplies `update`
        "wa_x": wa[proj_dim:],      # multiplies `cur_input`
        "ba": ba,
    }


if __name__ == "__main__":
    # Lane-dense demo shapes: D = P = 128, R*N = 128.  Batch blocked 2 per grid
    # step -> matmul M = 128, grid = 4 steps (>= 2 per TensorCore on v7x).
    B, N, D, P, R, NUM_HOP = 8, 64, 128, 128, 2, 3

    key = jax.random.PRNGKey(0)
    k_x, k_m, k_a, k_p = jax.random.split(key, 4)

    x = jax.random.normal(k_x, (B, N, D), jnp.float32)
    input_mask = (jax.random.uniform(k_m, (B, N)) > 0.2).astype(jnp.float32)
    adj = (jax.random.uniform(k_a, (B, R, N, N)) > 0.8).astype(jnp.float32)
    params = make_params(k_p, D, P, R)

    # Adjacency relayout done once and reused (it is hop/layer-invariant).
    adj_flat = flatten_adjacency(adj)

    out = gcn_layer_forward(x, input_mask, adj_flat, params,
                            num_hop=NUM_HOP, block_b=2)
    out = jax.block_until_ready(out)

    # Tight check: JAX reference with the same bf16-operand / fp32-accumulate
    # numerics and fused-gate structure as the kernel.
    ref_bf16 = gcn_layer_reference_bf16(x, input_mask, adj, params, NUM_HOP)
    np.testing.assert_allclose(np.asarray(out), np.asarray(ref_bf16),
                               rtol=1e-3, atol=1e-3)

    # Looser sanity check against the strict-fp32 PyTorch-mirroring reference
    # (difference is just bf16 MXU operand rounding compounded over 3 hops).
    ref_f32 = gcn_layer_reference_f32(x, input_mask, adj, params, NUM_HOP)
    np.testing.assert_allclose(np.asarray(out), np.asarray(ref_f32),
                               rtol=1e-1, atol=1e-1)

    print("KERNEL_OK")
</pallas_src>

<mosaic_0001>
module attributes {stable_mosaic.version = 11 : i64} {
  func.func @gcn_fused_kernel(%arg0: i32, %arg1: memref<128x128xf32, #tpu.memory_space<vmem>>, %arg2: memref<128x1xf32, #tpu.memory_space<vmem>>, %arg3: memref<2x64x128xbf16, #tpu.memory_space<vmem>>, %arg4: memref<128x384xbf16, #tpu.memory_space<vmem>>, %arg5: memref<1x384xf32, #tpu.memory_space<vmem>>, %arg6: memref<256x128xbf16, #tpu.memory_space<vmem>>, %arg7: memref<1x128xf32, #tpu.memory_space<vmem>>, %arg8: memref<128x128xf32, #tpu.memory_space<vmem>>, %arg9: memref<2x128x128xbf16, #tpu.memory_space<vmem>>) attributes {dimension_semantics = [#tpu.dimension_semantics<parallel>], iteration_bounds = array<i64: 4>, scalar_prefetch = 0 : i64, scratch_operands = 1 : i64, tpu.core_type = #tpu.core_type<tc>, window_params = [{transform_indices = @transform_0, window_bounds = array<i64: 128, 128>}, {transform_indices = @transform_1, window_bounds = array<i64: 128, 1>}, {transform_indices = @transform_2, window_bounds = array<i64: 2, 64, 128>}, {pipeline_mode = #tpu.pipeline_mode<synchronous>, transform_indices = @transform_3, window_bounds = array<i64: 128, 384>}, {pipeline_mode = #tpu.pipeline_mode<synchronous>, transform_indices = @transform_4, window_bounds = array<i64: 1, 384>}, {pipeline_mode = #tpu.pipeline_mode<synchronous>, transform_indices = @transform_5, window_bounds = array<i64: 256, 128>}, {pipeline_mode = #tpu.pipeline_mode<synchronous>, transform_indices = @transform_6, window_bounds = array<i64: 1, 128>}, {transform_indices = @transform_7, window_bounds = array<i64: 128, 128>}]} {
    %c0 = arith.constant 0 : index
    %c0_0 = arith.constant 0 : index
    %0 = vector.load %arg1[%c0, %c0_0] : memref<128x128xf32, #tpu.memory_space<vmem>>, vector<128x128xf32>
    %c0_1 = arith.constant 0 : index
    %c0_2 = arith.constant 0 : index
    %1 = vector.load %arg8[%c0_1, %c0_2] : memref<128x128xf32, #tpu.memory_space<vmem>>, vector<128x128xf32>
    tpu.vector_store %arg8[%c0_1, %c0_2], %0 {strides = array<i32>} : memref<128x128xf32, #tpu.memory_space<vmem>>, vector<128x128xf32>,
    %c0_3 = arith.constant 0 : index
    %c0_4 = arith.constant 0 : index
    %2 = vector.load %arg2[%c0_3, %c0_4] : memref<128x1xf32, #tpu.memory_space<vmem>>, vector<128x1xf32>
    %3 = vector.shape_cast %2 : vector<128x1xf32> to vector<128x1xf32>
    %4 = vector.broadcast %3 : vector<128x1xf32> to vector<128x384xf32>
    %5 = vector.shape_cast %2 : vector<128x1xf32> to vector<128x1xf32>
    %6 = vector.broadcast %5 : vector<128x1xf32> to vector<128x128xf32>
    %c0_5 = arith.constant 0 : index
    %c0_6 = arith.constant 0 : index
    %7 = vector.load %arg8[%c0_5, %c0_6] : memref<128x128xf32, #tpu.memory_space<vmem>>, vector<128x128xf32>
    %8 = arith.truncf %7 : vector<128x128xf32> to vector<128x128xbf16>
    %c0_7 = arith.constant 0 : index
    %c0_8 = arith.constant 0 : index
    %9 = vector.load %arg4[%c0_7, %c0_8] : memref<128x384xbf16, #tpu.memory_space<vmem>>, vector<128x384xbf16>
    %cst = arith.constant dense<0.000000e+00> : vector<128x384xf32>
    %10 = tpu.matmul %8, %9, %cst {dimension_numbers = #tpu.dot_dimension_numbers<[1], [0], [0], [1], [0, 0, 1, 1], [], []>} : vector<128x128xbf16>, vector<128x384xbf16>, vector<128x384xf32> -> vector<128x384xf32>
    %c0_9 = arith.constant 0 : index
    %c0_10 = arith.constant 0 : index
    %11 = vector.load %arg5[%c0_9, %c0_10] : memref<1x384xf32, #tpu.memory_space<vmem>>, vector<1x384xf32>
    %12 = vector.broadcast %11 : vector<1x384xf32> to vector<128x384xf32>
    %13 = arith.addf %10, %12 : vector<128x384xf32>
    %14 = arith.mulf %13, %4 : vector<128x384xf32>
    %15 = vector.extract_strided_slice %14 {offsets = [0, 0], sizes = [64, 128], strides = [1, 1]} : vector<128x384xf32> to vector<64x128xf32>
    %16 = arith.truncf %15 : vector<64x128xf32> to vector<64x128xbf16>
    %c0_11 = arith.constant 0 : index
    %c0_12 = arith.constant 0 : index
    %c0_13 = arith.constant 0 : index
    %17 = vector.load %arg9[%c0_11, %c0_12, %c0_13] : memref<2x128x128xbf16, #tpu.memory_space<vmem>>, vector<1x64x128xbf16>
    %18 = vector.shape_cast %17 : vector<1x64x128xbf16> to vector<64x128xbf16>
    %19 = vector.shape_cast %16 : vector<64x128xbf16> to vector<1x64x128xbf16>
    tpu.vector_store %arg9[%c0_11, %c0_12, %c0_13], %19 {strides = array<i32>} : memref<2x128x128xbf16, #tpu.memory_space<vmem>>, vector<1x64x128xbf16>,
    %20 = vector.extract_strided_slice %14 {offsets = [0, 128], sizes = [64, 128], strides = [1, 1]} : vector<128x384xf32> to vector<64x128xf32>
    %21 = arith.truncf %20 : vector<64x128xf32> to vector<64x128xbf16>
    %c0_14 = arith.constant 0 : index
    %c64 = arith.constant 64 : index
    %c0_15 = arith.constant 0 : index
    %22 = vector.load %arg9[%c0_14, %c64, %c0_15] : memref<2x128x128xbf16, #tpu.memory_space<vmem>>, vector<1x64x128xbf16>
    %23 = vector.shape_cast %22 : vector<1x64x128xbf16> to vector<64x128xbf16>
    %24 = vector.shape_cast %21 : vector<64x128xbf16> to vector<1x64x128xbf16>
    tpu.vector_store %arg9[%c0_14, %c64, %c0_15], %24 {strides = array<i32>} : memref<2x128x128xbf16, #tpu.memory_space<vmem>>, vector<1x64x128xbf16>,
    %25 = vector.extract_strided_slice %14 {offsets = [64, 0], sizes = [64, 128], strides = [1, 1]} : vector<128x384xf32> to vector<64x128xf32>
    %26 = arith.truncf %25 : vector<64x128xf32> to vector<64x128xbf16>
    %c1 = arith.constant 1 : index
    %c0_16 = arith.constant 0 : index
    %c0_17 = arith.constant 0 : index
    %27 = vector.load %arg9[%c1, %c0_16, %c0_17] : memref<2x128x128xbf16, #tpu.memory_space<vmem>>, vector<1x64x128xbf16>
    %28 = vector.shape_cast %27 : vector<1x64x128xbf16> to vector<64x128xbf16>
    %29 = vector.shape_cast %26 : vector<64x128xbf16> to vector<1x64x128xbf16>
    tpu.vector_store %arg9[%c1, %c0_16, %c0_17], %29 {strides = array<i32>} : memref<2x128x128xbf16, #tpu.memory_space<vmem>>, vector<1x64x128xbf16>,
    %30 = vector.extract_strided_slice %14 {offsets = [64, 128], sizes = [64, 128], strides = [1, 1]} : vector<128x384xf32> to vector<64x128xf32>
    %31 = arith.truncf %30 : vector<64x128xf32> to vector<64x128xbf16>
    %c1_18 = arith.constant 1 : index
    %c64_19 = arith.constant 64 : index
    %c0_20 = arith.constant 0 : index
    %32 = vector.load %arg9[%c1_18, %c64_19, %c0_20] : memref<2x128x128xbf16, #tpu.memory_space<vmem>>, vector<1x64x128xbf16>
    %33 = vector.shape_cast %32 : vector<1x64x128xbf16> to vector<64x128xbf16>
    %34 = vector.shape_cast %31 : vector<64x128xbf16> to vector<1x64x128xbf16>
    tpu.vector_store %arg9[%c1_18, %c64_19, %c0_20], %34 {strides = array<i32>} : memref<2x128x128xbf16, #tpu.memory_space<vmem>>, vector<1x64x128xbf16>,
    %c0_21 = arith.constant 0 : index
    %c0_22 = arith.constant 0 : index
    %c0_23 = arith.constant 0 : index
    %35 = vector.load %arg3[%c0_21, %c0_22, %c0_23] : memref<2x64x128xbf16, #tpu.memory_space<vmem>>, vector<2x64x128xbf16>
    %c0_24 = arith.constant 0 : index
    %c0_25 = arith.constant 0 : index
    %c0_26 = arith.constant 0 : index
    %36 = vector.load %arg9[%c0_24, %c0_25, %c0_26] : memref<2x128x128xbf16, #tpu.memory_space<vmem>>, vector<2x128x128xbf16>
    "tpu.trace_start"() <{level = 10 : i32, message = "bik,bkp->bip"}> : () -> ()
    %cst_27 = arith.constant dense<0.000000e+00> : vector<2x64x128xf32>
    %37 = tpu.matmul %35, %36, %cst_27 {dimension_numbers = #tpu.dot_dimension_numbers<[2], [1], [1], [2], [0, 0, 0, 1, 1, 2], [0], [0]>} : vector<2x64x128xbf16>, vector<2x128x128xbf16>, vector<2x64x128xf32> -> vector<2x64x128xf32>
    "tpu.trace_stop"() : () -> ()
    %38 = vector.shape_cast %37 : vector<2x64x128xf32> to vector<128x128xf32>
    %39 = vector.extract_strided_slice %14 {offsets = [0, 256], sizes = [128, 128], strides = [1, 1]} : vector<128x384xf32> to vector<128x128xf32>
    %40 = arith.addf %38, %39 : vector<128x128xf32>
    %41 = arith.truncf %40 : vector<128x128xf32> to vector<128x128xbf16>
    %42 = tpu.concatenate %41, %8 in 1 : vector<128x128xbf16>, vector<128x128xbf16> -> vector<128x256xbf16>
    %c0_28 = arith.constant 0 : index
    %c0_29 = arith.constant 0 : index
    %43 = vector.load %arg6[%c0_28, %c0_29] : memref<256x128xbf16, #tpu.memory_space<vmem>>, vector<256x128xbf16>
    %cst_30 = arith.constant dense<0.000000e+00> : vector<128x128xf32>
    %44 = tpu.matmul %42, %43, %cst_30 {dimension_numbers = #tpu.dot_dimension_numbers<[1], [0], [0], [1], [0, 0, 1, 1], [], []>} : vector<128x256xbf16>, vector<256x128xbf16>, vector<128x128xf32> -> vector<128x128xf32>
    %c0_31 = arith.constant 0 : index
    %c0_32 = arith.constant 0 : index
    %45 = vector.load %arg7[%c0_31, %c0_32] : memref<1x128xf32, #tpu.memory_space<vmem>>, vector<1x128xf32>
    %46 = vector.broadcast %45 : vector<1x128xf32> to vector<128x128xf32>
    %47 = arith.addf %44, %46 : vector<128x128xf32>
    %48 = arith.negf %47 : vector<128x128xf32>
    %49 = math.exp %48 : vector<128x128xf32>
    %cst_33 = arith.constant 1.000000e+00 : f32
    %50 = vector.broadcast %cst_33 : f32 to vector<128x128xf32>
    %51 = arith.addf %50, %49 : vector<128x128xf32>
    %52 = arith.divf %50, %51 : vector<128x128xf32>
    %53 = arith.mulf %52, %6 : vector<128x128xf32>
    %54 = math.tanh %40 : vector<128x128xf32>
    %55 = arith.mulf %53, %54 : vector<128x128xf32>
    %cst_34 = arith.constant 1.000000e+00 : f32
    %56 = vector.broadcast %cst_34 : f32 to vector<128x128xf32>
    %57 = arith.subf %56, %53 : vector<128x128xf32>
    %58 = arith.mulf %57, %7 : vector<128x128xf32>
    %59 = arith.addf %55, %58 : vector<128x128xf32>
    %c0_35 = arith.constant 0 : index
    %c0_36 = arith.constant 0 : index
    %60 = vector.load %arg8[%c0_35, %c0_36] : memref<128x128xf32, #tpu.memory_space<vmem>>, vector<128x128xf32>
    tpu.vector_store %arg8[%c0_35, %c0_36], %59 {strides = array<i32>} : memref<128x128xf32, #tpu.memory_space<vmem>>, vector<128x128xf32>,
    %c0_37 = arith.constant 0 : index
    %c0_38 = arith.constant 0 : index
    %61 = vector.load %arg8[%c0_37, %c0_38] : memref<128x128xf32, #tpu.memory_space<vmem>>, vector<128x128xf32>
    %62 = arith.truncf %61 : vector<128x128xf32> to vector<128x128xbf16>
    %c0_39 = arith.constant 0 : index
    %c0_40 = arith.constant 0 : index
    %63 = vector.load %arg4[%c0_39, %c0_40] : memref<128x384xbf16, #tpu.memory_space<vmem>>, vector<128x384xbf16>
    %cst_41 = arith.constant dense<0.000000e+00> : vector<128x384xf32>
    %64 = tpu.matmul %62, %63, %cst_41 {dimension_numbers = #tpu.dot_dimension_numbers<[1], [0], [0], [1], [0, 0, 1, 1], [], []>} : vector<128x128xbf16>, vector<128x384xbf16>, vector<128x384xf32> -> vector<128x384xf32>
    %c0_42 = arith.constant 0 : index
    %c0_43 = arith.constant 0 : index
    %65 = vector.load %arg5[%c0_42, %c0_43] : memref<1x384xf32, #tpu.memory_space<vmem>>, vector<1x384xf32>
    %66 = vector.broadcast %65 : vector<1x384xf32> to vector<128x384xf32>
    %67 = arith.addf %64, %66 : vector<128x384xf32>
    %68 = arith.mulf %67, %4 : vector<128x384xf32>
    %69 = vector.extract_strided_slice %68 {offsets = [0, 0], sizes = [64, 128], strides = [1, 1]} : vector<128x384xf32> to vector<64x128xf32>
    %70 = arith.truncf %69 : vector<64x128xf32> to vector<64x128xbf16>
    %c0_44 = arith.constant 0 : index
    %c0_45 = arith.constant 0 : index
    %c0_46 = arith.constant 0 : index
    %71 = vector.load %arg9[%c0_44, %c0_45, %c0_46] : memref<2x128x128xbf16, #tpu.memory_space<vmem>>, vector<1x64x128xbf16>
    %72 = vector.shape_cast %71 : vector<1x64x128xbf16> to vector<64x128xbf16>
    %73 = vector.shape_cast %70 : vector<64x128xbf16> to vector<1x64x128xbf16>
    tpu.vector_store %arg9[%c0_44, %c0_45, %c0_46], %73 {strides = array<i32>} : memref<2x128x128xbf16, #tpu.memory_space<vmem>>, vector<1x64x128xbf16>,
    %74 = vector.extract_strided_slice %68 {offsets = [0, 128], sizes = [64, 128], strides = [1, 1]} : vector<128x384xf32> to vector<64x128xf32>
    %75 = arith.truncf %74 : vector<64x128xf32> to vector<64x128xbf16>
    %c0_47 = arith.constant 0 : index
    %c64_48 = arith.constant 64 : index
    %c0_49 = arith.constant 0 : index
    %76 = vector.load %arg9[%c0_47, %c64_48, %c0_49] : memref<2x128x128xbf16, #tpu.memory_space<vmem>>, vector<1x64x128xbf16>
    %77 = vector.shape_cast %76 : vector<1x64x128xbf16> to vector<64x128xbf16>
    %78 = vector.shape_cast %75 : vector<64x128xbf16> to vector<1x64x128xbf16>
    tpu.vector_store %arg9[%c0_47, %c64_48, %c0_49], %78 {strides = array<i32>} : memref<2x128x128xbf16, #tpu.memory_space<vmem>>, vector<1x64x128xbf16>,
    %79 = vector.extract_strided_slice %68 {offsets = [64, 0], sizes = [64, 128], strides = [1, 1]} : vector<128x384xf32> to vector<64x128xf32>
    %80 = arith.truncf %79 : vector<64x128xf32> to vector<64x128xbf16>
    %c1_50 = arith.constant 1 : index
    %c0_51 = arith.constant 0 : index
    %c0_52 = arith.constant 0 : index
    %81 = vector.load %arg9[%c1_50, %c0_51, %c0_52] : memref<2x128x128xbf16, #tpu.memory_space<vmem>>, vector<1x64x128xbf16>
    %82 = vector.shape_cast %81 : vector<1x64x128xbf16> to vector<64x128xbf16>
    %83 = vector.shape_cast %80 : vector<64x128xbf16> to vector<1x64x128xbf16>
    tpu.vector_store %arg9[%c1_50, %c0_51, %c0_52], %83 {strides = array<i32>} : memref<2x128x128xbf16, #tpu.memory_space<vmem>>, vector<1x64x128xbf16>,
    %84 = vector.extract_strided_slice %68 {offsets = [64, 128], sizes = [64, 128], strides = [1, 1]} : vector<128x384xf32> to vector<64x128xf32>
    %85 = arith.truncf %84 : vector<64x128xf32> to vector<64x128xbf16>
    %c1_53 = arith.constant 1 : index
    %c64_54 = arith.constant 64 : index
    %c0_55 = arith.constant 0 : index
    %86 = vector.load %arg9[%c1_53, %c64_54, %c0_55] : memref<2x128x128xbf16, #tpu.memory_space<vmem>>, vector<1x64x128xbf16>
    %87 = vector.shape_cast %86 : vector<1x64x128xbf16> to vector<64x128xbf16>
    %88 = vector.shape_cast %85 : vector<64x128xbf16> to vector<1x64x128xbf16>
    tpu.vector_store %arg9[%c1_53, %c64_54, %c0_55], %88 {strides = array<i32>} : memref<2x128x128xbf16, #tpu.memory_space<vmem>>, vector<1x64x128xbf16>,
    %c0_56 = arith.constant 0 : index
    %c0_57 = arith.constant 0 : index
    %c0_58 = arith.constant 0 : index
    %89 = vector.load %arg3[%c0_56, %c0_57, %c0_58] : memref<2x64x128xbf16, #tpu.memory_space<vmem>>, vector<2x64x128xbf16>
    %c0_59 = arith.constant 0 : index
    %c0_60 = arith.constant 0 : index
    %c0_61 = arith.constant 0 : index
    %90 = vector.load %arg9[%c0_59, %c0_60, %c0_61] : memref<2x128x128xbf16, #tpu.memory_space<vmem>>, vector<2x128x128xbf16>
    "tpu.trace_start"() <{level = 10 : i32, message = "bik,bkp->bip"}> : () -> ()
    %cst_62 = arith.constant dense<0.000000e+00> : vector<2x64x128xf32>
    %91 = tpu.matmul %89, %90, %cst_62 {dimension_numbers = #tpu.dot_dimension_numbers<[2], [1], [1], [2], [0, 0, 0, 1, 1, 2], [0], [0]>} : vector<2x64x128xbf16>, vector<2x128x128xbf16>, vector<2x64x128xf32> -> vector<2x64x128xf32>
    "tpu.trace_stop"() : () -> ()
    %92 = vector.shape_cast %91 : vector<2x64x128xf32> to vector<128x128xf32>
    %93 = vector.extract_strided_slice %68 {offsets = [0, 256], sizes = [128, 128], strides = [1, 1]} : vector<128x384xf32> to vector<128x128xf32>
    %94 = arith.addf %92, %93 : vector<128x128xf32>
    %95 = arith.truncf %94 : vector<128x128xf32> to vector<128x128xbf16>
    %96 = tpu.concatenate %95, %62 in 1 : vector<128x128xbf16>, vector<128x128xbf16> -> vector<128x256xbf16>
    %c0_63 = arith.constant 0 : index
    %c0_64 = arith.constant 0 : index
    %97 = vector.load %arg6[%c0_63, %c0_64] : memref<256x128xbf16, #tpu.memory_space<vmem>>, vector<256x128xbf16>
    %cst_65 = arith.constant dense<0.000000e+00> : vector<128x128xf32>
    %98 = tpu.matmul %96, %97, %cst_65 {dimension_numbers = #tpu.dot_dimension_numbers<[1], [0], [0], [1], [0, 0, 1, 1], [], []>} : vector<128x256xbf16>, vector<256x128xbf16>, vector<128x128xf32> -> vector<128x128xf32>
    %c0_66 = arith.constant 0 : index
    %c0_67 = arith.constant 0 : index
    %99 = vector.load %arg7[%c0_66, %c0_67] : memref<1x128xf32, #tpu.memory_space<vmem>>, vector<1x128xf32>
    %100 = vector.broadcast %99 : vector<1x128xf32> to vector<128x128xf32>
    %101 = arith.addf %98, %100 : vector<128x128xf32>
    %102 = arith.negf %101 : vector<128x128xf32>
    %103 = math.exp %102 : vector<128x128xf32>
    %cst_68 = arith.constant 1.000000e+00 : f32
    %104 = vector.broadcast %cst_68 : f32 to vector<128x128xf32>
    %105 = arith.addf %104, %103 : vector<128x128xf32>
    %106 = arith.divf %104, %105 : vector<128x128xf32>
    %107 = arith.mulf %106, %6 : vector<128x128xf32>
    %108 = math.tanh %94 : vector<128x128xf32>
    %109 = arith.mulf %107, %108 : vector<128x128xf32>
    %cst_69 = arith.constant 1.000000e+00 : f32
    %110 = vector.broadcast %cst_69 : f32 to vector<128x128xf32>
    %111 = arith.subf %110, %107 : vector<128x128xf32>
    %112 = arith.mulf %111, %61 : vector<128x128xf32>
    %113 = arith.addf %109, %112 : vector<128x128xf32>
    %c0_70 = arith.constant 0 : index
    %c0_71 = arith.constant 0 : index
    %114 = vector.load %arg8[%c0_70, %c0_71] : memref<128x128xf32, #tpu.memory_space<vmem>>, vector<128x128xf32>
    tpu.vector_store %arg8[%c0_70, %c0_71], %113 {strides = array<i32>} : memref<128x128xf32, #tpu.memory_space<vmem>>, vector<128x128xf32>,
    %c0_72 = arith.constant 0 : index
    %c0_73 = arith.constant 0 : index
    %115 = vector.load %arg8[%c0_72, %c0_73] : memref<128x128xf32, #tpu.memory_space<vmem>>, vector<128x128xf32>
    %116 = arith.truncf %115 : vector<128x128xf32> to vector<128x128xbf16>
    %c0_74 = arith.constant 0 : index
    %c0_75 = arith.constant 0 : index
    %117 = vector.load %arg4[%c0_74, %c0_75] : memref<128x384xbf16, #tpu.memory_space<vmem>>, vector<128x384xbf16>
    %cst_76 = arith.constant dense<0.000000e+00> : vector<128x384xf32>
    %118 = tpu.matmul %116, %117, %cst_76 {dimension_numbers = #tpu.dot_dimension_numbers<[1], [0], [0], [1], [0, 0, 1, 1], [], []>} : vector<128x128xbf16>, vector<128x384xbf16>, vector<128x384xf32> -> vector<128x384xf32>
    %c0_77 = arith.constant 0 : index
    %c0_78 = arith.constant 0 : index
    %119 = vector.load %arg5[%c0_77, %c0_78] : memref<1x384xf32, #tpu.memory_space<vmem>>, vector<1x384xf32>
    %120 = vector.broadcast %119 : vector<1x384xf32> to vector<128x384xf32>
    %121 = arith.addf %118, %120 : vector<128x384xf32>
    %122 = arith.mulf %121, %4 : vector<128x384xf32>
    %123 = vector.extract_strided_slice %122 {offsets = [0, 0], sizes = [64, 128], strides = [1, 1]} : vector<128x384xf32> to vector<64x128xf32>
    %124 = arith.truncf %123 : vector<64x128xf32> to vector<64x128xbf16>
    %c0_79 = arith.constant 0 : index
    %c0_80 = arith.constant 0 : index
    %c0_81 = arith.constant 0 : index
    %125 = vector.load %arg9[%c0_79, %c0_80, %c0_81] : memref<2x128x128xbf16, #tpu.memory_space<vmem>>, vector<1x64x128xbf16>
    %126 = vector.shape_cast %125 : vector<1x64x128xbf16> to vector<64x128xbf16>
    %127 = vector.shape_cast %124 : vector<64x128xbf16> to vector<1x64x128xbf16>
    tpu.vector_store %arg9[%c0_79, %c0_80, %c0_81], %127 {strides = array<i32>} : memref<2x128x128xbf16, #tpu.memory_space<vmem>>, vector<1x64x128xbf16>,
    %128 = vector.extract_strided_slice %122 {offsets = [0, 128], sizes = [64, 128], strides = [1, 1]} : vector<128x384xf32> to vector<64x128xf32>
    %129 = arith.truncf %128 : vector<64x128xf32> to vector<64x128xbf16>
    %c0_82 = arith.constant 0 : index
    %c64_83 = arith.constant 64 : index
    %c0_84 = arith.constant 0 : index
    %130 = vector.load %arg9[%c0_82, %c64_83, %c0_84] : memref<2x128x128xbf16, #tpu.memory_space<vmem>>, vector<1x64x128xbf16>
    %131 = vector.shape_cast %130 : vector<1x64x128xbf16> to vector<64x128xbf16>
    %132 = vector.shape_cast %129 : vector<64x128xbf16> to vector<1x64x128xbf16>
    tpu.vector_store %arg9[%c0_82, %c64_83, %c0_84], %132 {strides = array<i32>} : memref<2x128x128xbf16, #tpu.memory_space<vmem>>, vector<1x64x128xbf16>,
    %133 = vector.extract_strided_slice %122 {offsets = [64, 0], sizes = [64, 128], strides = [1, 1]} : vector<128x384xf32> to vector<64x128xf32>
    %134 = arith.truncf %133 : vector<64x128xf32> to vector<64x128xbf16>
    %c1_85 = arith.constant 1 : index
    %c0_86 = arith.constant 0 : index
    %c0_87 = arith.constant 0 : index
    %135 = vector.load %arg9[%c1_85, %c0_86, %c0_87] : memref<2x128x128xbf16, #tpu.memory_space<vmem>>, vector<1x64x128xbf16>
    %136 = vector.shape_cast %135 : vector<1x64x128xbf16> to vector<64x128xbf16>
    %137 = vector.shape_cast %134 : vector<64x128xbf16> to vector<1x64x128xbf16>
    tpu.vector_store %arg9[%c1_85, %c0_86, %c0_87], %137 {strides = array<i32>} : memref<2x128x128xbf16, #tpu.memory_space<vmem>>, vector<1x64x128xbf16>,
    %138 = vector.extract_strided_slice %122 {offsets = [64, 128], sizes = [64, 128], strides = [1, 1]} : vector<128x384xf32> to vector<64x128xf32>
    %139 = arith.truncf %138 : vector<64x128xf32> to vector<64x128xbf16>
    %c1_88 = arith.constant 1 : index
    %c64_89 = arith.constant 64 : index
    %c0_90 = arith.constant 0 : index
    %140 = vector.load %arg9[%c1_88, %c64_89, %c0_90] : memref<2x128x128xbf16, #tpu.memory_space<vmem>>, vector<1x64x128xbf16>
    %141 = vector.shape_cast %140 : vector<1x64x128xbf16> to vector<64x128xbf16>
    %142 = vector.shape_cast %139 : vector<64x128xbf16> to vector<1x64x128xbf16>
    tpu.vector_store %arg9[%c1_88, %c64_89, %c0_90], %142 {strides = array<i32>} : memref<2x128x128xbf16, #tpu.memory_space<vmem>>, vector<1x64x128xbf16>,
    %c0_91 = arith.constant 0 : index
    %c0_92 = arith.constant 0 : index
    %c0_93 = arith.constant 0 : index
    %143 = vector.load %arg3[%c0_91, %c0_92, %c0_93] : memref<2x64x128xbf16, #tpu.memory_space<vmem>>, vector<2x64x128xbf16>
    %c0_94 = arith.constant 0 : index
    %c0_95 = arith.constant 0 : index
    %c0_96 = arith.constant 0 : index
    %144 = vector.load %arg9[%c0_94, %c0_95, %c0_96] : memref<2x128x128xbf16, #tpu.memory_space<vmem>>, vector<2x128x128xbf16>
    "tpu.trace_start"() <{level = 10 : i32, message = "bik,bkp->bip"}> : () -> ()
    %cst_97 = arith.constant dense<0.000000e+00> : vector<2x64x128xf32>
    %145 = tpu.matmul %143, %144, %cst_97 {dimension_numbers = #tpu.dot_dimension_numbers<[2], [1], [1], [2], [0, 0, 0, 1, 1, 2], [0], [0]>} : vector<2x64x128xbf16>, vector<2x128x128xbf16>, vector<2x64x128xf32> -> vector<2x64x128xf32>
    "tpu.trace_stop"() : () -> ()
    %146 = vector.shape_cast %145 : vector<2x64x128xf32> to vector<128x128xf32>
    %147 = vector.extract_strided_slice %122 {offsets = [0, 256], sizes = [128, 128], strides = [1, 1]} : vector<128x384xf32> to vector<128x128xf32>
    %148 = arith.addf %146, %147 : vector<128x128xf32>
    %149 = arith.truncf %148 : vector<128x128xf32> to vector<128x128xbf16>
    %150 = tpu.concatenate %149, %116 in 1 : vector<128x128xbf16>, vector<128x128xbf16> -> vector<128x256xbf16>
    %c0_98 = arith.constant 0 : index
    %c0_99 = arith.constant 0 : index
    %151 = vector.load %arg6[%c0_98, %c0_99] : memref<256x128xbf16, #tpu.memory_space<vmem>>, vector<256x128xbf16>
    %cst_100 = arith.constant dense<0.000000e+00> : vector<128x128xf32>
    %152 = tpu.matmul %150, %151, %cst_100 {dimension_numbers = #tpu.dot_dimension_numbers<[1], [0], [0], [1], [0, 0, 1, 1], [], []>} : vector<128x256xbf16>, vector<256x128xbf16>, vector<128x128xf32> -> vector<128x128xf32>
    %c0_101 = arith.constant 0 : index
    %c0_102 = arith.constant 0 : index
    %153 = vector.load %arg7[%c0_101, %c0_102] : memref<1x128xf32, #tpu.memory_space<vmem>>, vector<1x128xf32>
    %154 = vector.broadcast %153 : vector<1x128xf32> to vector<128x128xf32>
    %155 = arith.addf %152, %154 : vector<128x128xf32>
    %156 = arith.negf %155 : vector<128x128xf32>
    %157 = math.exp %156 : vector<128x128xf32>
    %cst_103 = arith.constant 1.000000e+00 : f32
    %158 = vector.broadcast %cst_103 : f32 to vector<128x128xf32>
    %159 = arith.addf %158, %157 : vector<128x128xf32>
    %160 = arith.divf %158, %159 : vector<128x128xf32>
    %161 = arith.mulf %160, %6 : vector<128x128xf32>
    %162 = math.tanh %148 : vector<128x128xf32>
    %163 = arith.mulf %161, %162 : vector<128x128xf32>
    %cst_104 = arith.constant 1.000000e+00 : f32
    %164 = vector.broadcast %cst_104 : f32 to vector<128x128xf32>
    %165 = arith.subf %164, %161 : vector<128x128xf32>
    %166 = arith.mulf %165, %115 : vector<128x128xf32>
    %167 = arith.addf %163, %166 : vector<128x128xf32>
    %c0_105 = arith.constant 0 : index
    %c0_106 = arith.constant 0 : index
    %168 = vector.load %arg8[%c0_105, %c0_106] : memref<128x128xf32, #tpu.memory_space<vmem>>, vector<128x128xf32>
    tpu.vector_store %arg8[%c0_105, %c0_106], %167 {strides = array<i32>} : memref<128x128xf32, #tpu.memory_space<vmem>>, vector<128x128xf32>,
    return
  }
  func.func @transform_0(%arg0: i32) -> (i32, i32) {
    %c0_i32 = arith.constant 0 : i32
    %c0_i32_0 = arith.constant 0 : i32
    return %arg0, %c0_i32 : i32, i32
  }
  func.func @transform_1(%arg0: i32) -> (i32, i32) {
    %c0_i32 = arith.constant 0 : i32
    %c0_i32_0 = arith.constant 0 : i32
    return %arg0, %c0_i32 : i32, i32
  }
  func.func @transform_2(%arg0: i32) -> (i32, i32, i32) {
    %c0_i32 = arith.constant 0 : i32
    %c0_i32_0 = arith.constant 0 : i32
    %c0_i32_1 = arith.constant 0 : i32
    return %arg0, %c0_i32, %c0_i32_0 : i32, i32, i32
  }
  func.func @transform_3(%arg0: i32) -> (i32, i32) {
    %c0_i32 = arith.constant 0 : i32
    %c0_i32_0 = arith.constant 0 : i32
    %c0_i32_1 = arith.constant 0 : i32
    return %c0_i32, %c0_i32_0 : i32, i32
  }
  func.func @transform_4(%arg0: i32) -> (i32, i32) {
    %c0_i32 = arith.constant 0 : i32
    %c0_i32_0 = arith.constant 0 : i32
    %c0_i32_1 = arith.constant 0 : i32
    return %c0_i32, %c0_i32_0 : i32, i32
  }
  func.func @transform_5(%arg0: i32) -> (i32, i32) {
    %c0_i32 = arith.constant 0 : i32
    %c0_i32_0 = arith.constant 0 : i32
    %c0_i32_1 = arith.constant 0 : i32
    return %c0_i32, %c0_i32_0 : i32, i32
  }
  func.func @transform_6(%arg0: i32) -> (i32, i32) {
    %c0_i32 = arith.constant 0 : i32
    %c0_i32_0 = arith.constant 0 : i32
    %c0_i32_1 = arith.constant 0 : i32
    return %c0_i32, %c0_i32_0 : i32, i32
  }
  func.func @transform_7(%arg0: i32) -> (i32, i32) {
    %c0_i32 = arith.constant 0 : i32
    %c0_i32_0 = arith.constant 0 : i32
    return %arg0, %c0_i32 : i32, i32
  }
}

</mosaic_0001>

<bundles_post_ra>
// kernel: gcn_layer_forward.1
= control target key start
LH: loop header
LB: loop body
LE: loop exit
PB: predicated region body
PF: predicated region fallthrough
CT: control target
= control target key end

     0   :  { %12 = vsyncpa [#allocation4], 0  ;;  %s7135_s0 = inlined_call_operand.vmem [shape: f32[512,128], index: 0, kind: input, shape index: {}]   ;;  %s7136_s1 = inlined_call_operand.vmem [shape: f32[512,1], index: 1, kind: input, shape index: {}]   ;;  %s7137_s2 = inlined_call_operand.vmem [shape: bf16[8,64,128], index: 2, kind: input, shape index: {}]   ;;  %s7138_s3 = inlined_call_operand.vmem [shape: bf16[128,384], index: 3, kind: input, shape index: {}]   ;;  %s7139_s4 = inlined_call_operand.vmem [shape: f32[1,384], index: 4, kind: input, shape index: {}]   ;;  %s7140_s5 = inlined_call_operand.vmem [shape: bf16[256,128], index: 5, kind: input, shape index: {}]   ;;  %s7141_s6 = inlined_call_operand.vmem [shape: f32[1,128], index: 6, kind: input, shape index: {}]   ;;  %s7142_s7 = inlined_call_operand.hbm [shape: f32[512,128], index: 7, kind: output, shape index: {}]  }
   0x1   :  { %14 = vsyncpa [#allocation4 + $0x1], 0  ;;  %s5442_s24 = smov 0   ;;  %s5444_s25 = smov 0  }
   0x2   :  { %s5446_s26 = smov 0   ;;  %s5448_s27 = smov 0  }
   0x3 LB: > { %s5463_s28 = sadd.s32 4294967295, %s5396_s27   ;;  %s4052_s29 = sadd.s32 4294967294, %s5396_s27   ;;  %s5396_s27 = sphi %s5448_s27, %s7235_s27   ;;  %s5392_s26 = sphi %s5446_s26, %s7234_s26   ;;  %s5388_s25 = sphi %s5444_s25, %s7233_s25   ;;  %s5384_s24 = sphi %s5442_s24, %s7232_s24  }
   0x4   : > { %s5467_s30 = sadd.s32 1, %s5396_s27   ;;  %s189_s8 = sadd.s32 1, %s5392_s26 }
   0x5   : > { %s186_s9 = ssub.s32 %s5396_s27, %s5467_s30  ;;  %p199_p0 = scmp.ne.s32.totalorder %s5392_s26, %s5388_s25 }
   0x6   : > { %p187_p1 = scmp.eq.s32.totalorder %s186_s9, 0  ;;  %p200_p2 = scmp.eq.s32.totalorder %s5463_s28, 3 }
   0x7   : > { %p205_p3 = scmp.ne.s32.totalorder %s5388_s25, %s5384_s24  ;;  %p206_p4 = scmp.eq.s32.totalorder %s4052_s29, 3 }
   0x8   : > { %s5478_s10 = scalar_select %p187_p1, %s5392_s26, %s189_s8  }
   0x9   : > { %p5480_p5 = por %p200_p2, %p199_p0  ;;  %p5484_p6 = por %p206_p4, %p205_p3 }
   0xa   : > { %p4055_p7 = scmp.ge.s32.totalorder %s5396_s27, 1  ;;  %p264_p8 = scmp.lt.s32.totalorder %s5396_s27, 5 }
   0xc   : > { %p265_p9 = pnand %p4055_p7, %p264_p8 }
   0xe   : > { %268 = sbr.rel (%p265_p9) target bundleno = 2341 (0x925), region = 48 }
  0x15   : > { %v4862_v0 = vld [vmem:[%s7138_s3 + $0x4] ss:$12 sps:$4 sm:$0xff]   ;;  %v4864_v1 = vld [vmem:[%s7138_s3] ss:$12 sps:$4 sm:$0xff]   ;;  %v7143_v2 = vmov 0   ;;  %s4057_s8 = sshll.u32 %s5463_s28, 4 }
  0x16   : > { %689 = vmatprep.mubr.bf16.mxu0 %v7143_v2  ;;  %4860 = vset.pattern.permute.xlu0 %v7143_v2  ;;  %v4865_v3 = vld [vmem:[%s7138_s3 + $0x1c] ss:$12 sps:$4 sm:$0xff]   ;;  %v4867_v4 = vld [vmem:[%s7138_s3 + $0x18] ss:$12 sps:$4 sm:$0xff]   ;;  %v4868_v5 = vld [vmem:[%s7138_s3 + $0x34] ss:$12 sps:$4 sm:$0xff]  }
  0x17   : > { %657 = vmatprep.subr.bf16.mxu0 %v4862_v0  ;;  %4861 = vset.pattern.permute.xlu1 %v7143_v2  ;;  %v4870_v6 = vld [vmem:[%s7138_s3 + $0x30] ss:$12 sps:$4 sm:$0xff]   ;;  %v4871_v7 = vld [vmem:[%s7138_s3 + $0x4c] ss:$12 sps:$4 sm:$0xff]   ;;  %p308_p10 = scmp.lt.s32.totalorder %s4057_s8, 63  ;;  %s4061_s15 = sshll.u32 %s5463_s28, 1 }
  0x18   : > { %658 = vmatpush1.bf16.msra.mxu0 %v4864_v1  ;;  %v4873_v8 = vld [vmem:[%s7138_s3 + $0x48] ss:$12 sps:$4 sm:$0xff]   ;;  %v4874_v9 = vld [vmem:[%s7138_s3 + $0x64] ss:$12 sps:$4 sm:$0xff]   ;;  %v4876_v10 = vld [vmem:[%s7138_s3 + $0x60] ss:$12 sps:$4 sm:$0xff]  }
  0x19   : > { %659 = vmatprep.subr.bf16.mxu0 %v4865_v3  ;;  %s7237_s8 = smov (!%p308_p10, %s4057_s8), 63  ;;  %v4877_v11 = vld [vmem:[%s7138_s3 + $0x7c] ss:$12 sps:$4 sm:$0xff]   ;;  %v4879_v12 = vld [vmem:[%s7138_s3 + $0x78] ss:$12 sps:$4 sm:$0xff]   ;;  %p320_p11 = scmp.lt.s32.totalorder %s4061_s15, 7 }
  0x1a   : > { %s4058_s29 = sshll.u32 %s7237_s8, 3  ;;  %v4880_v13 = vld [vmem:[%s7138_s3 + $0x94] ss:$12 sps:$4 sm:$0xff]   ;;  %v4882_v14 = vld [vmem:[%s7138_s3 + $0x90] ss:$12 sps:$4 sm:$0xff]   ;;  %s5399_s18 = smov [#allocation3]  }
  0x1b   : > { %s5536_s16 = scalar_lea.vmem %s7136_s1, %s4058_s29  ;;  %v4883_v15 = vld [vmem:[%s7138_s3 + $0xac] ss:$12 sps:$4 sm:$0xff]   ;;  %s5547_s22 = scalar_lea.vmem %s7135_s0, %s4058_s29  ;;  %v4885_v20 = vld [vmem:[%s7138_s3 + $0xa8] ss:$12 sps:$4 sm:$0xff]   ;;  %v4889_v36 = vld [vmem:[%s7138_s3 + $0x50] ss:$12 sps:$4 sm:$0xff]  }
  0x1c   : > { %660 = vmatpush1.bf16.msra.mxu0 %v4867_v4  ;;  %v360_v16 = vld [vmem:[%s5536_s16] sm:$0xff]  ;;  %v362_v17 = vld [vmem:[%s5536_s16 + $0x10] sm:$0xff]  ;;  %v361_v18 = vld [vmem:[%s5536_s16 + $0x8] sm:$0xff]  ;;  %s7239_s15 = smov (!%p320_p11, %s4061_s15), 7  ;;  %v514_v4 = vlaneseq  ;;  %s4265_s29 = sshll.u32 %s5463_s28, 11 }
  0x1d   : > { %661 = vmatprep.subr.bf16.mxu0 %v4868_v5  ;;  %378 = vperm.xlu0 %4860, %v360_v16   ;;  %v363_v19 = vld [vmem:[%s5536_s16 + $0x18] sm:$0xff]  ;;  %v328_v21 = vld [vmem:[%s5547_s22] sm:$0xff]  ;;  %v329_v22 = vld [vmem:[%s5547_s22 + $0x8] sm:$0xff]  ;;  %s4264_s17 = sshll.u32 %s7239_s15, 5  ;;  %s7086_s15 = scalar_lea.hbm %s7142_s7, %s4265_s29 }
  0x1e   : > { %388 = vperm.xlu1 %4861, %v362_v17   ;;  %v4886_v23 = vld [vmem:[%s7138_s3 + $0x8] ss:$12 sps:$4 sm:$0xff]   ;;  %v364_v24 = vld [vmem:[%s5536_s16 + $0x20] sm:$0xff]  ;;  %v5563_v26 = vpack.c.bf16 %v329_v22, %v328_v21  ;;  %v367_v29 = vld [vmem:[%s5536_s16 + $0x38] sm:$0xff]  ;;  %s5651_s19 = scalar_lea.vmem %s7137_s2, %s4264_s17  ;;  %v5655_v5 = vshrl.u32 %v514_v4, 7  ;;  %s5338_s8 = sshll.u32 %s5399_s18, 4  ;;  %s5339_s8 = int_to_ptr.vmem [resolvable:$false] %s5338_s8 }
  0x1f   : > { %v365_v25 = vld [vmem:[%s5536_s16 + $0x28] sm:$0xff]  ;;  %v366_v28 = vld [vmem:[%s5536_s16 + $0x30] sm:$0xff]  ;;  %v331_v31 = vld [vmem:[%s5547_s22 + $0x18] sm:$0xff]  ;;  %s5340_s20 = scalar_lea.vmem %s5339_s8, 4096 }
  0x20   : > { %662 = vmatpush1.bf16.msra.mxu0 %v4870_v6  ;;  %v4887_v27 = vld [vmem:[%s7138_s3 + $0x20] ss:$12 sps:$4 sm:$0xff]   ;;  %v330_v30 = vld [vmem:[%s5547_s22 + $0x10] sm:$0xff]  ;;  %v4888_v32 = vld [vmem:[%s7138_s3 + $0x38] ss:$12 sps:$4 sm:$0xff]   ;;  %v5658_v6 = vsub.s32 0, %v5655_v5 }
  0x21   : > { %663 = vmatprep.subr.bf16.mxu0 %v4871_v7  ;;  %383 = vperm.xlu0 %4860, %v361_v18   ;;  %v368_v33 = vld [vmem:[%s5536_s16 + $0x40] sm:$0xff]  ;;  %v369_v34 = vld [vmem:[%s5536_s16 + $0x48] sm:$0xff]  ;;  %v5579_v35 = vpack.c.bf16 %v331_v31, %v330_v30  ;;  %v370_v37 = vld [vmem:[%s5536_s16 + $0x50] sm:$0xff] }
  0x22   : > { %393 = vperm.xlu1 %4861, %v363_v19   ;;  %v371_v38 = vld [vmem:[%s5536_s16 + $0x58] sm:$0xff]  ;;  %v332_v39 = vld [vmem:[%s5547_s22 + $0x20] sm:$0xff]  ;;  %v333_v40 = vld [vmem:[%s5547_s22 + $0x28] sm:$0xff]  ;;  %7175 = vst [vmem:[#allocation6_spill] sm:$0xff] %v5658_v6 }
  0x23   : > { %v4890_v41 = vld [vmem:[%s7138_s3 + $0x68] ss:$12 sps:$4 sm:$0xff]   ;;  %v372_v42 = vld [vmem:[%s5536_s16 + $0x60] sm:$0xff]  ;;  %v5595_v44 = vpack.c.bf16 %v333_v40, %v332_v39  ;;  %v375_v47 = vld [vmem:[%s5536_s16 + $0x78] sm:$0xff] }
  0x24   : > { %664 = vmatpush1.bf16.msra.mxu0 %v4873_v8  ;;  %v373_v43 = vld [vmem:[%s5536_s16 + $0x68] sm:$0xff]  ;;  %v374_v46 = vld [vmem:[%s5536_s16 + $0x70] sm:$0xff]  ;;  %v335_v49 = vld [vmem:[%s5547_s22 + $0x38] sm:$0xff]  ;;  %v5666_v8 = vsub.s32 1, %v5655_v5 }
  0x25   : > { %665 = vmatprep.subr.bf16.mxu0 %v4874_v9  ;;  %398 = vperm.xlu0 %4860, %v364_v24   ;;  %v4891_v45 = vld [vmem:[%s7138_s3 + $0x80] ss:$12 sps:$4 sm:$0xff]   ;;  %v334_v48 = vld [vmem:[%s5547_s22 + $0x30] sm:$0xff]  ;;  %v4892_v50 = vld [vmem:[%s7138_s3 + $0x98] ss:$12 sps:$4 sm:$0xff]  }
  0x26   : > { %403 = vperm.xlu1 %4861, %v365_v25   ;;  %v5609_v51 = vpack.c.bf16 %v335_v49, %v334_v48  ;;  %v4893_v52 = vld [vmem:[%s7138_s3 + $0xb0] ss:$12 sps:$4 sm:$0xff]   ;;  %v336_v53 = vld [vmem:[%s5547_s22 + $0x40] sm:$0xff]  ;;  %v337_v54 = vld [vmem:[%s5547_s22 + $0x48] sm:$0xff]  ;;  %7176 = vst [vmem:[#allocation7_spill] sm:$0xff] %v5666_v8 }
  0x27   : > { %v5618_v55 = vpack.c.bf16 %v337_v54, %v336_v53  ;;  %v338_v56 = vld [vmem:[%s5547_s22 + $0x50] sm:$0xff]  ;;  %v339_v57 = vld [vmem:[%s5547_s22 + $0x58] sm:$0xff]  ;;  %v340_v59 = vld [vmem:[%s5547_s22 + $0x60] sm:$0xff] }
  0x28   : > { %666 = vmatpush1.bf16.msra.mxu0 %v4876_v10  ;;  %v5624_v58 = vpack.c.bf16 %v339_v57, %v338_v56  ;;  %v341_v60 = vld [vmem:[%s5547_s22 + $0x68] sm:$0xff]  ;;  %v342_v62 = vld [vmem:[%s5547_s22 + $0x70] sm:$0xff]  ;;  %v343_v63 = vld [vmem:[%s5547_s22 + $0x78] sm:$0xff] }
  0x29   : > { %667 = vmatprep.subr.bf16.mxu0 %v4877_v11  ;;  %408 = vperm.xlu0 %4860, %v366_v28   ;;  %v5630_v61 = vpack.c.bf16 %v341_v60, %v340_v59  ;;  %v5636_v0 = vpack.c.bf16 %v343_v63, %v342_v62  ;;  %v4894_v1 = vld [vmem:[%s5651_s19] sm:$0xff]  }
  0x2a   : > { %413 = vperm.xlu1 %4861, %v367_v29   ;;  %4626 = vmatprep.mubr.bf16.mxu1 %v4894_v1  ;;  %v4898_v3 = vld [vmem:[%s5651_s19 + $0x20] sm:$0xff]  }
  0x2b   : > { %v5663_v7 = vld [vmem:[%s7139_s4] sm:$0x7] }
  0x2c   : > { %668 = vmatpush1.bf16.msra.mxu0 %v4879_v12  ;;  %v5670_v9 = vrot.slane %v5663_v7, %v5658_v6  ;;  %v5676_v11 = vrot.slane %v5663_v7, %v5666_v8 }
  0x2d   : > { %669 = vmatprep.subr.bf16.mxu0 %v4880_v13  ;;  %418 = vperm.xlu0 %4860, %v368_v33  }
  0x2e   : > { %423 = vperm.xlu1 %4861, %v369_v34  }
  0x30   : > { %670 = vmatpush1.bf16.msra.mxu0 %v4882_v14 }
  0x31   : > { %671 = vmatprep.subr.bf16.mxu0 %v4883_v15  ;;  %428 = vperm.xlu0 %4860, %v370_v37  }
  0x32   : > { %433 = vperm.xlu1 %4861, %v371_v38  }
  0x34   : > { %672 = vmatpush1.bf16.msra.mxu0 %v4885_v20 }
  0x35   : > { %4578 = vmatprep.subr.bf16.mxu0 %v4886_v23  ;;  %438 = vperm.xlu0 %4860, %v372_v42  }
  0x36   : > { %443 = vperm.xlu1 %4861, %v373_v43  }
  0x37   : > { %690 = vmatmul.mubr.bf16.vlgmr.msra.gmra.mrb[0].mxu0 %v5563_v26 }
  0x38   : > { %699 = vmatprep.mubr.bf16.mxu0 %v7143_v2  ;;  %4579 = vmatpush3.bf16.msra.mxu0 %v4886_v23 }
  0x39   : > { %4580 = vmatprep.subr.bf16.mxu0 %v4887_v27  ;;  %448 = vperm.xlu0 %4860, %v374_v46  }
  0x3a   : > { %453 = vperm.xlu1 %4861, %v375_v47  }
  0x3c   : > { %4581 = vmatpush3.bf16.msra.mxu0 %v4887_v27 }
  0x3d   : > { %4582 = vmatprep.subr.bf16.mxu0 %v4888_v32 }
  0x3f   : > { %700 = vmatmul.mubr.bf16.gmra.mrb[4].mxu0 %v5579_v35 }
  0x40   : > { %709 = vmatprep.mubr.bf16.mxu0 %v7143_v2  ;;  %4583 = vmatpush3.bf16.msra.mxu0 %v4888_v32 }
  0x41   : > { %4584 = vmatprep.subr.bf16.mxu0 %v4889_v36 }
  0x44   : > { %4585 = vmatpush3.bf16.msra.mxu0 %v4889_v36 }
  0x45   : > { %4586 = vmatprep.subr.bf16.mxu0 %v4890_v41 }
  0x47   : > { %710 = vmatmul.mubr.bf16.gmra.mrb[8].mxu0 %v5595_v44 }
  0x48   : > { %719 = vmatprep.mubr.bf16.mxu0 %v7143_v2  ;;  %4587 = vmatpush3.bf16.msra.mxu0 %v4890_v41 }
  0x49   : > { %4588 = vmatprep.subr.bf16.mxu0 %v4891_v45 }
  0x4c   : > { %4589 = vmatpush3.bf16.msra.mxu0 %v4891_v45 }
  0x4d   : > { %4590 = vmatprep.subr.bf16.mxu0 %v4892_v50 }
  0x4f   : > { %720 = vmatmul.mubr.bf16.gmra.mrb[12].mxu0 %v5609_v51 }
  0x50   : > { %729 = vmatprep.mubr.bf16.mxu0 %v7143_v2  ;;  %4591 = vmatpush3.bf16.msra.mxu0 %v4892_v50 }
  0x51   : > { %4592 = vmatprep.subr.bf16.mxu0 %v4893_v52 }
  0x54   : > { %4593 = vmatpush3.bf16.msra.mxu0 %v4893_v52 }
  0x57   : > { %730 = vmatmul.mubr.bf16.gmra.mrb[16].mxu0 %v5618_v55 }
  0x58   : > { %739 = vmatprep.mubr.bf16.mxu0 %v7143_v2 }
  0x5f   : > { %740 = vmatmul.mubr.bf16.gmra.mrb[20].mxu0 %v5624_v58 }
  0x60   : > { %749 = vmatprep.mubr.bf16.mxu0 %v7143_v2 }
  0x67   : > { %750 = vmatmul.mubr.bf16.gmra.mrb[24].mxu0 %v5630_v61 }
  0x68   : > { %759 = vmatprep.mubr.bf16.mxu0 %v7143_v2 }
  0x6f   : > { %760 = vmatmul.mubr.bf16.gmra.mrb[28].mxu0 %v5636_v0 }
  0x70   : > { %4594 = vmatprep.mubr.bf16.mxu0 %v5563_v26 }
  0x77   : > { %4595 = vmatmul.mubr.bf16.vlgmr.msra.gmra.mrb[32].mxu0 %v5579_v35 }
  0x78   : > { %4598 = vmatprep.mubr.bf16.mxu0 %v5595_v44 }
  0x7f   : > { %4599 = vmatmul.mubr.bf16.gmra.mrb[36].mxu0 %v5609_v51 }
  0x80   : > { %4602 = vmatprep.mubr.bf16.mxu0 %v5618_v55 }
  0x87   : > { %4603 = vmatmul.mubr.bf16.gmra.mrb[40].mxu0 %v5624_v58 }
  0x88   : > { %4606 = vmatprep.mubr.bf16.mxu0 %v5630_v61 }
  0x8f   : > { %4607 = vmatmul.mubr.bf16.gmra.mrb[44].mxu0 %v5636_v0 }
  0x90   : > { %4650 = vmatprep.mubr.bf16.mxu0 %v4898_v3 }
  0x9c   : > { %v5672_v10 = vpop.permute.xlu0 %378 }
  0x9d   : > { %v5686_v23 = vpop.permute.xlu1 %388 }
  0xa0   : > { %v5681_v19 = vpop.permute.xlu0 %383 }
  0xa1   : > { %v5695_v37 = vpop.permute.xlu1 %393 }
  0xa4   : > { %v5705_v54 = vpop.permute.xlu0 %398 }
  0xa5   : > { %v5707_v56 = vpop.permute.xlu1 %403 }
 0x10a   : > { %v691_v12 = vpop.f32.mrb[0].mxu0 }
 0x10b   : > { %v692_v13 = vadd.f32 %v691_v12, %v5670_v9  ;;  %v693_v14 = vpop.f32.mrb[1].mxu0 }
 0x10c   : > { %v694_v15 = vadd.f32 %v693_v14, %v5676_v11  ;;  %v695_v16 = vpop.f32.mrb[2].mxu0 }
 0x10d   : > { %v696_v17 = vadd.f32 %v695_v16, %v5670_v9  ;;  %v697_v18 = vpop.f32.mrb[3].mxu0  ;;  %v867_v21 = vmul.f32 %v692_v13, %v5672_v10 }
 0x10e   : > { %v698_v20 = vadd.f32 %v697_v18, %v5676_v11  ;;  %v868_v24 = vmul.f32 %v694_v15, %v5672_v10  ;;  %v5717_v18 = vpop.permute.xlu0 %408 }
 0x10f   : > { %v870_v22 = vmul.f32 %v696_v17, %v5681_v19 }
 0x110   : > { %v871_v25 = vmul.f32 %v698_v20, %v5681_v19  ;;  %v5719_v20 = vpop.permute.xlu1 %413 }
 0x111   : > { %v915_v27 = vpack.c.bf16 %v870_v22, %v867_v21 }
 0x112   : > { %v701_v28 = vpop.f32.mrb[4].mxu0  ;;  %v5690_v29 = vpack.c.bf16 %v871_v25, %v868_v24 }
 0x113   : > { %v702_v30 = vadd.f32 %v701_v28, %v5670_v9  ;;  %v703_v31 = vpop.f32.mrb[5].mxu0  ;;  %4610 = vmatprep.subr.bf16.mxu1 %v915_v27 }
 0x114   : > { %v704_v32 = vadd.f32 %v703_v31, %v5676_v11  ;;  %v705_v33 = vpop.f32.mrb[6].mxu0  ;;  %4611 = vmatpush3.bf16.msra.mxu1 %v915_v27 }
 0x115   : > { %v706_v34 = vadd.f32 %v705_v33, %v5670_v9  ;;  %v707_v36 = vpop.f32.mrb[7].mxu0  ;;  %v873_v39 = vmul.f32 %v702_v30, %v5686_v23 }
 0x116   : > { %v708_v38 = vadd.f32 %v707_v36, %v5676_v11  ;;  %v874_v41 = vmul.f32 %v704_v32, %v5686_v23 }
 0x117   : > { %v876_v40 = vmul.f32 %v706_v34, %v5695_v37 }
 0x118   : > { %v877_v42 = vmul.f32 %v708_v38, %v5695_v37 }
 0x119   : > { %v916_v43 = vpack.c.bf16 %v876_v40, %v873_v39  ;;  %v5730_v40 = vpop.permute.xlu0 %418 }
 0x11a   : > { %v711_v45 = vpop.f32.mrb[8].mxu0  ;;  %v924_v46 = vpack.c.bf16 %v877_v42, %v874_v41  ;;  %v5732_v41 = vpop.permute.xlu1 %423 }
 0x11b   : > { %v712_v47 = vadd.f32 %v711_v45, %v5670_v9  ;;  %v713_v48 = vpop.f32.mrb[9].mxu0  ;;  %4612 = vmatprep.subr.bf16.mxu1 %v916_v43 }
 0x11c   : > { %v714_v49 = vadd.f32 %v713_v48, %v5676_v11  ;;  %v715_v50 = vpop.f32.mrb[10].mxu0  ;;  %4613 = vmatpush3.bf16.msra.mxu1 %v916_v43 }
 0x11d   : > { %v716_v52 = vadd.f32 %v715_v50, %v5670_v9  ;;  %v717_v53 = vpop.f32.mrb[11].mxu0  ;;  %v879_v59 = vmul.f32 %v712_v47, %v5705_v54 }
 0x11e   : > { %v718_v57 = vadd.f32 %v717_v53, %v5676_v11  ;;  %v880_v62 = vmul.f32 %v714_v49, %v5705_v54 }
 0x11f   : > { %v882_v60 = vmul.f32 %v716_v52, %v5707_v56 }
 0x120   : > { %v883_v63 = vmul.f32 %v718_v57, %v5707_v56 }
 0x121   : > { %v917_v1 = vpack.c.bf16 %v882_v60, %v879_v59 }
 0x122   : > { %v721_v3 = vpop.f32.mrb[12].mxu0  ;;  %v925_v4 = vpack.c.bf16 %v883_v63, %v880_v62 }
 0x123   : > { %v722_v12 = vadd.f32 %v721_v3, %v5670_v9  ;;  %v723_v13 = vpop.f32.mrb[13].mxu0  ;;  %4614 = vmatprep.subr.bf16.mxu1 %v917_v1 }
 0x124   : > { %v724_v14 = vadd.f32 %v723_v13, %v5676_v11  ;;  %v725_v15 = vpop.f32.mrb[14].mxu0  ;;  %4615 = vmatpush3.bf16.msra.mxu1 %v917_v1  ;;  %v5745_v1 = vpop.permute.xlu0 %428 }
 0x125   : > { %v726_v16 = vadd.f32 %v725_v15, %v5670_v9  ;;  %v727_v17 = vpop.f32.mrb[15].mxu0  ;;  %v885_v22 = vmul.f32 %v722_v12, %v5717_v18 }
 0x126   : > { %v728_v21 = vadd.f32 %v727_v17, %v5676_v11  ;;  %v886_v25 = vmul.f32 %v724_v14, %v5717_v18 }
 0x127   : > { %v888_v24 = vmul.f32 %v726_v16, %v5719_v20  ;;  %v4902_v16 = vld [vmem:[%s7140_s5 + $0x40] sm:$0xff]  }
 0x128   : > { %v889_v27 = vmul.f32 %v728_v21, %v5719_v20 }
 0x129   : > { %v918_v28 = vpack.c.bf16 %v888_v24, %v885_v22 }
 0x12a   : > { %v731_v30 = vpop.f32.mrb[16].mxu0  ;;  %v926_v31 = vpack.c.bf16 %v889_v27, %v886_v25  ;;  %v4895_v25 = vld [vmem:[%s5651_s19 + $0x8] sm:$0xff]  }
 0x12b   : > { %v732_v32 = vadd.f32 %v731_v30, %v5670_v9  ;;  %v733_v33 = vpop.f32.mrb[17].mxu0  ;;  %4616 = vmatprep.subr.bf16.mxu1 %v918_v28  ;;  %v4903_v30 = vld [vmem:[%s7140_s5] sm:$0xff]  }
 0x12c   : > { %v734_v34 = vadd.f32 %v733_v33, %v5676_v11  ;;  %v735_v36 = vpop.f32.mrb[18].mxu0  ;;  %4617 = vmatpush3.bf16.msra.mxu1 %v918_v28 }
 0x12d   : > { %v736_v38 = vadd.f32 %v735_v36, %v5670_v9  ;;  %v737_v39 = vpop.f32.mrb[19].mxu0  ;;  %4618 = vmatprep.subr.bf16.mxu1 %v5690_v29  ;;  %v891_v43 = vmul.f32 %v732_v32, %v5730_v40  ;;  %v5770_v36 = vpop.permute.xlu0 %438 }
 0x12e   : > { %v738_v42 = vadd.f32 %v737_v39, %v5676_v11  ;;  %v892_v47 = vmul.f32 %v734_v34, %v5730_v40  ;;  %v4904_v34 = vld [vmem:[%s7140_s5 + $0x48] sm:$0xff]  }
 0x12f   : > { %v894_v45 = vmul.f32 %v736_v38, %v5732_v41 }
 0x130   : > { %v895_v48 = vmul.f32 %v738_v42, %v5732_v41  ;;  %4619 = vmatpush3.bf16.msra.mxu1 %v5690_v29  ;;  %v5747_v29 = vpop.permute.xlu1 %433 }
 0x131   : > { %4620 = vmatprep.subr.bf16.mxu1 %v924_v46  ;;  %v931_v49 = vpack.c.bf16 %v894_v45, %v891_v43 }
 0x132   : > { %v741_v50 = vpop.f32.mrb[20].mxu0  ;;  %v5740_v52 = vpack.c.bf16 %v895_v48, %v892_v47  ;;  %v4905_v47 = vld [vmem:[%s7140_s5 + $0x8] sm:$0xff]  }
 0x133   : > { %v742_v53 = vadd.f32 %v741_v50, %v5670_v9  ;;  %v743_v57 = vpop.f32.mrb[21].mxu0  ;;  %4634 = vmatprep.subr.bf16.mxu0 %v931_v49 }
 0x134   : > { %v744_v59 = vadd.f32 %v743_v57, %v5676_v11  ;;  %v745_v60 = vpop.f32.mrb[22].mxu0  ;;  %4621 = vmatpush3.bf16.msra.mxu1 %v924_v46  ;;  %4635 = vmatpush3.bf16.msra.mxu0 %v931_v49  ;;  %v5772_v38 = vpop.permute.xlu1 %443  ;;  %v4906_v49 = vld [vmem:[%s7140_s5 + $0x50] sm:$0xff]  }
 0x135   : > { %v746_v62 = vadd.f32 %v745_v60, %v5670_v9  ;;  %v747_v63 = vpop.f32.mrb[23].mxu0  ;;  %4622 = vmatprep.subr.bf16.mxu1 %v925_v4  ;;  %v897_v12 = vmul.f32 %v742_v53, %v5745_v1  ;;  %v4897_v60 = vld [vmem:[%s5651_s19 + $0x18] sm:$0xff]  }
 0x136   : > { %v748_v3 = vadd.f32 %v747_v63, %v5676_v11  ;;  %v898_v14 = vmul.f32 %v744_v59, %v5745_v1 }
 0x137   : > { %v900_v13 = vmul.f32 %v746_v62, %v5747_v29 }
 0x138   : > { %v901_v46 = vmul.f32 %v748_v3, %v5747_v29  ;;  %4623 = vmatpush3.bf16.msra.mxu1 %v925_v4  ;;  %v4896_v4 = vld [vmem:[%s5651_s19 + $0x10] sm:$0xff]  }
 0x139   : > { %4624 = vmatprep.subr.bf16.mxu1 %v926_v31  ;;  %v932_v15 = vpack.c.bf16 %v900_v13, %v897_v12  ;;  %v4907_v3 = vld [vmem:[%s7140_s5 + $0x10] sm:$0xff]  }
 0x13a   : > { %v751_v17 = vpop.f32.mrb[24].mxu0  ;;  %v5757_v21 = vpack.c.bf16 %v901_v46, %v898_v14  ;;  %v4908_v14 = vld [vmem:[%s7140_s5 + $0x58] sm:$0xff]   ;;  %v5795_v46 = vpop.permute.xlu0 %448 }
 0x13b   : > { %v752_v22 = vadd.f32 %v751_v17, %v5670_v9  ;;  %v753_v24 = vpop.f32.mrb[25].mxu0  ;;  %4636 = vmatprep.subr.bf16.mxu0 %v932_v15 }
 0x13c   : > { %v754_v27 = vadd.f32 %v753_v24, %v5676_v11  ;;  %v755_v28 = vpop.f32.mrb[26].mxu0  ;;  %4625 = vmatpush3.bf16.msra.mxu1 %v926_v31  ;;  %4637 = vmatpush3.bf16.msra.mxu0 %v932_v15  ;;  %v5797_v15 = vpop.permute.xlu1 %453 }
 0x13d   : > { %v756_v32 = vadd.f32 %v755_v28, %v5670_v9  ;;  %v757_v33 = vpop.f32.mrb[27].mxu0  ;;  %4306 = vmatprep.subr.bf16.mxu1 %v4902_v16  ;;  %v903_v39 = vmul.f32 %v752_v22, %v5770_v36 }
 0x13e   : > { %v758_v31 = vadd.f32 %v757_v33, %v5676_v11  ;;  %v904_v43 = vmul.f32 %v754_v27, %v5770_v36  ;;  %v4911_v33 = vld [vmem:[%s7140_s5 + $0x20] sm:$0xff]  }
 0x13f   : > { %v906_v42 = vmul.f32 %v756_v32, %v5772_v38  ;;  %4627 = vmatmul.mubr.bf16.vlgmr.msra.gmra.mrb[0].mxu1 %v4895_v25  ;;  %v4909_v25 = vld [vmem:[%s7140_s5 + $0x18] sm:$0xff]  }
 0x140   : > { %v907_v45 = vmul.f32 %v758_v31, %v5772_v38  ;;  %4630 = vmatprep.mubr.bf16.mxu1 %v4896_v4  ;;  %4307 = vmatpush3.bf16.msra.mxu1 %v4903_v30  ;;  %v4913_v31 = vld [vmem:[%s7140_s5 + $0x28] sm:$0xff]  }
 0x141   : > { %v933_v48 = vpack.c.bf16 %v906_v42, %v903_v39  ;;  %4308 = vmatprep.subr.bf16.mxu1 %v4904_v34 }
 0x142   : > { %v761_v50 = vpop.f32.mrb[28].mxu0  ;;  %v942_v53 = vpack.c.bf16 %v907_v45, %v904_v43 }
 0x143   : > { %v762_v57 = vadd.f32 %v761_v50, %v5670_v9  ;;  %v763_v59 = vpop.f32.mrb[29].mxu0  ;;  %4638 = vmatprep.subr.bf16.mxu0 %v933_v48  ;;  %v4900_v50 = vld [vmem:[%s5651_s19 + $0x30] sm:$0xff]  }
 0x144   : > { %v764_v62 = vadd.f32 %v763_v59, %v5676_v11  ;;  %v765_v63 = vpop.f32.mrb[30].mxu0  ;;  %4639 = vmatpush3.bf16.msra.mxu0 %v933_v48  ;;  %4309 = vmatpush3.bf16.msra.mxu1 %v4905_v47  ;;  %v4899_v48 = vld [vmem:[%s5651_s19 + $0x28] sm:$0xff]  }
 0x145   : > { %v766_v12 = vadd.f32 %v765_v63, %v5670_v9  ;;  %v767_v13 = vpop.f32.mrb[31].mxu0  ;;  %4310 = vmatprep.subr.bf16.mxu1 %v4906_v49  ;;  %v909_v17 = vmul.f32 %v762_v57, %v5795_v46  ;;  %v4914_v63 = vld [vmem:[%s7140_s5 + $0x70] sm:$0xff]  }
 0x146   : > { %v768_v16 = vadd.f32 %v767_v13, %v5676_v11  ;;  %v910_v24 = vmul.f32 %v764_v62, %v5795_v46  ;;  %v4910_v11 = vld [vmem:[%s7140_s5 + $0x60] sm:$0xff]   ;;  %v4917_v13 = vld [vmem:[%s7140_s5 + $0x38] sm:$0xff]  }
 0x147   : > { %v912_v22 = vmul.f32 %v766_v12, %v5797_v15  ;;  %4631 = vmatmul.mubr.bf16.gmra.mrb[4].mxu1 %v4897_v60  ;;  %v4901_v60 = vld [vmem:[%s5651_s19 + $0x38] sm:$0xff]  }
 0x148   : > { %v913_v9 = vmul.f32 %v768_v16, %v5797_v15  ;;  %4311 = vmatpush3.bf16.msra.mxu1 %v4907_v3  ;;  %1349 = vmatprep.mubr.bf16.mxu1 %v5563_v26  ;;  %v4912_v26 = vld [vmem:[%s7140_s5 + $0x68] sm:$0xff]   ;;  %v4915_v3 = vld [vmem:[%s7140_s5 + $0x30] sm:$0xff]   ;;  %v4916_v12 = vld [vmem:[%s7140_s5 + $0x78] sm:$0xff]  }
 0x149   : > { %v934_v27 = vpack.c.bf16 %v912_v22, %v909_v17  ;;  %4312 = vmatprep.subr.bf16.mxu1 %v4908_v14  ;;  %v5857_v14 = vsub.s32 2, %v5655_v5 }
 0x14a   : > { %v4596_v28 = vpop.f32.mrb[32].mxu0  ;;  %v943_v4 = vpack.c.bf16 %v913_v9, %v910_v24 }
 0x14b   : > { %v804_v30 = vpop.f32.mrb[33].mxu0  ;;  %4640 = vmatprep.subr.bf16.mxu0 %v934_v27  ;;  %v5861_v16 = vrot.slane %v5663_v7, %v5857_v14 }
 0x14c   : > { %v4597_v32 = vpop.f32.mrb[34].mxu0  ;;  %4641 = vmatpush3.bf16.msra.mxu0 %v934_v27  ;;  %4313 = vmatpush3.bf16.msra.mxu1 %v4909_v25 }
 0x14d   : > { %v807_v34 = vpop.f32.mrb[35].mxu0  ;;  %4642 = vmatprep.subr.bf16.mxu0 %v5740_v52  ;;  %4314 = vmatprep.subr.bf16.mxu1 %v4910_v11  ;;  %v813_v17 = vadd.f32 %v4596_v28, %v5861_v16  ;;  %v805_v22 = vadd.f32 %v804_v30, %v5861_v16  ;;  %v816_v24 = vadd.f32 %v4597_v32, %v5861_v16 }
 0x14e   : > { %v808_v9 = vadd.f32 %v807_v34, %v5861_v16 }
 0x14f   : > { %v875_v25 = vmul.f32 %v813_v17, %v5686_v23  ;;  %v869_v11 = vmul.f32 %v805_v22, %v5672_v10 }
 0x150   : > { %4643 = vmatpush3.bf16.msra.mxu0 %v5740_v52  ;;  %4315 = vmatpush3.bf16.msra.mxu1 %v4911_v33  ;;  %v878_v33 = vmul.f32 %v816_v24, %v5695_v37  ;;  %v872_v28 = vmul.f32 %v808_v9, %v5681_v19 }
 0x151   : > { %4644 = vmatprep.subr.bf16.mxu0 %v5757_v21  ;;  %4316 = vmatprep.subr.bf16.mxu1 %v4912_v26 }
 0x152   : > { %v4600_v39 = vpop.f32.mrb[36].mxu0 }
 0x153   : > { %v820_v42 = vpop.f32.mrb[37].mxu0  ;;  %v829_v30 = vadd.f32 %v4600_v39, %v5861_v16 }
 0x154   : > { %v4601_v43 = vpop.f32.mrb[38].mxu0  ;;  %4645 = vmatpush3.bf16.msra.mxu0 %v5757_v21  ;;  %4317 = vmatpush3.bf16.msra.mxu1 %v4913_v31  ;;  %v821_v31 = vadd.f32 %v820_v42, %v5861_v16 }
 0x155   : > { %v823_v45 = vpop.f32.mrb[39].mxu0  ;;  %4646 = vmatprep.subr.bf16.mxu0 %v942_v53  ;;  %4318 = vmatprep.subr.bf16.mxu1 %v4914_v63 }
 0x156   : > { %v824_v63 = vadd.f32 %v823_v45, %v5861_v16 }
 0x158   : > { %4647 = vmatpush3.bf16.msra.mxu0 %v942_v53  ;;  %4319 = vmatpush3.bf16.msra.mxu1 %v4915_v3  ;;  %v884_v45 = vmul.f32 %v824_v63, %v5707_v56 }
 0x159   : > { %4648 = vmatprep.subr.bf16.mxu0 %v943_v4  ;;  %4320 = vmatprep.subr.bf16.mxu1 %v4916_v12  ;;  %v887_v12 = vmul.f32 %v829_v30, %v5717_v18 }
 0x15a   : > { %v5824_v52 = vpop.f32.mrb[40].mxu0 }
 0x15b   : > { %v5826_v47 = vpop.f32.mrb[41].mxu0 }
 0x15c   : > { %v5829_v49 = vpop.f32.mrb[42].mxu0  ;;  %4649 = vmatpush3.bf16.msra.mxu0 %v943_v4  ;;  %4321 = vmatpush3.bf16.msra.mxu1 %v4917_v13  ;;  %v881_v13 = vmul.f32 %v821_v31, %v5705_v54 }
 0x15d   : > { %v5832_v57 = vpop.f32.mrb[43].mxu0 }
 0x15f   : > { %4651 = vmatmul.mubr.bf16.vlgmr.msra.gmra.mrb[48].mxu0 %v4899_v48 }
 0x160   : > { %4654 = vmatprep.mubr.bf16.mxu0 %v4900_v50  ;;  %v832_v50 = vadd.f32 %v4601_v43, %v5861_v16 }
 0x162   : > { %v5834_v21 = vpop.f32.mrb[44].mxu0  ;;  %v890_v22 = vmul.f32 %v832_v50, %v5719_v20 }
 0x163   : > { %v5836_v59 = vpop.f32.mrb[45].mxu0 }
 0x164   : > { %v5839_v53 = vpop.f32.mrb[46].mxu0 }
 0x165   : > { %v5841_v62 = vpop.f32.mrb[47].mxu0 }
 0x167   : > { %4655 = vmatmul.mubr.bf16.gmra.mrb[52].mxu0 %v4901_v60 }
 0x168   : > { %1855 = vmatprep.mubr.bf16.mxu0 %v7143_v2 }
 0x212   : > { %v4628_v27 = vpop.f32.mrb[0].mxu1 }
 0x213   : > { %v5869_v4 = vadd.f32 %v4628_v27, %v875_v25  ;;  %v1038_v5 = vpop.f32.mrb[1].mxu1 }
 0x214   : > { %v5872_v7 = vadd.f32 %v1038_v5, %v869_v11  ;;  %v4629_v26 = vpop.f32.mrb[2].mxu1 }
 0x215   : > { %v5876_v32 = vadd.f32 %v4629_v26, %v878_v33  ;;  %v1041_v34 = vpop.f32.mrb[3].mxu1  ;;  %v837_v33 = vadd.f32 %v5826_v47, %v5861_v16  ;;  %v848_v26 = vadd.f32 %v5829_v49, %v5861_v16 }
 0x216   : > { %v5879_v48 = vadd.f32 %v1041_v34, %v872_v28  ;;  %v840_v28 = vadd.f32 %v5832_v57, %v5861_v16  ;;  %v861_v57 = vadd.f32 %v5834_v21, %v5861_v16 }
 0x217   : > { %v1175_v60 = vpack.c.bf16 %v5876_v32, %v5869_v4 }
 0x218   : > { %v1174_v3 = vpack.c.bf16 %v5879_v48, %v5872_v7  ;;  %v896_v49 = vmul.f32 %v840_v28, %v5732_v41  ;;  %v4918_v28 = vld [vmem:[%s7138_s3] ss:$12 sps:$4 sm:$0xff]  }
 0x21a   : > { %v4632_v39 = vpop.f32.mrb[4].mxu1  ;;  %1350 = vmatmul.mubr.bf16.vlgmr.msra.gmra.mrb[8].mxu1 %v1174_v3  ;;  %v853_v3 = vadd.f32 %v5836_v59, %v5861_v16 }
 0x21b   : > { %v5889_v17 = vadd.f32 %v4632_v39, %v887_v12  ;;  %v1054_v42 = vpop.f32.mrb[5].mxu1  ;;  %1357 = vmatprep.mubr.bf16.mxu1 %v5579_v35  ;;  %v845_v35 = vadd.f32 %v5824_v52, %v5861_v16  ;;  %v902_v52 = vmul.f32 %v848_v26, %v5747_v29  ;;  %v864_v39 = vadd.f32 %v5839_v53, %v5861_v16 }
 0x21c   : > { %v5893_v43 = vadd.f32 %v1054_v42, %v881_v13  ;;  %v4633_v24 = vpop.f32.mrb[6].mxu1  ;;  %v856_v13 = vadd.f32 %v5841_v62, %v5861_v16  ;;  %v911_v42 = vmul.f32 %v861_v57, %v5795_v46  ;;  %v905_v59 = vmul.f32 %v853_v3, %v5770_v36  ;;  %v4935_v57 = vld [vmem:[%s7138_s3 + $0x38] ss:$12 sps:$4 sm:$0xff]   ;;  %v4938_v3 = vld [vmem:[%s7138_s3 + $0x7c] ss:$12 sps:$4 sm:$0xff]  }
 0x21d   : > { %v5896_v9 = vadd.f32 %v4633_v24, %v890_v22  ;;  %v1057_v25 = vpop.f32.mrb[7].mxu1  ;;  %v899_v30 = vmul.f32 %v845_v35, %v5745_v1  ;;  %v914_v53 = vmul.f32 %v864_v39, %v5797_v15  ;;  %v4939_v39 = vld [vmem:[%s7138_s3 + $0x50] ss:$12 sps:$4 sm:$0xff]  }
 0x21e   : > { %v5898_v27 = vadd.f32 %v1057_v25, %v884_v45  ;;  %v908_v62 = vmul.f32 %v856_v13, %v5772_v38  ;;  %v4942_v13 = vld [vmem:[%s7138_s3 + $0x94] ss:$12 sps:$4 sm:$0xff]  }
 0x21f   : > { %v1177_v11 = vpack.c.bf16 %v5896_v9, %v5889_v17 }
 0x220   : > { %v1176_v5 = vpack.c.bf16 %v5898_v27, %v5893_v43 }
 0x222   : > { %1358 = vmatmul.mubr.bf16.gmra.mrb[12].mxu1 %v1175_v60 }
 0x223   : > { %1365 = vmatprep.mubr.bf16.mxu1 %v5595_v44  ;;  %v893_v44 = vmul.f32 %v837_v33, %v5730_v40 }
 0x22a   : > { %1366 = vmatmul.mubr.bf16.gmra.mrb[16].mxu1 %v1176_v5 }
 0x22b   : > { %1373 = vmatprep.mubr.bf16.mxu1 %v5609_v51 }
 0x232   : > { %v4652_v34 = vpop.f32.mrb[48].mxu0  ;;  %1374 = vmatmul.mubr.bf16.gmra.mrb[20].mxu1 %v1177_v11 }
 0x233   : > { %v5916_v31 = vadd.f32 %v4652_v34, %v899_v30  ;;  %v1127_v51 = vpop.f32.mrb[49].mxu0  ;;  %1381 = vmatprep.mubr.bf16.mxu1 %v5618_v55  ;;  %v4923_v30 = vld [vmem:[%s7138_s3 + $0x1c] ss:$12 sps:$4 sm:$0xff]  }
 0x234   : > { %v5920_v47 = vadd.f32 %v1127_v51, %v893_v44  ;;  %v4653_v50 = vpop.f32.mrb[50].mxu0  ;;  %v4927_v34 = vld [vmem:[%s7138_s3 + $0x8] ss:$12 sps:$4 sm:$0xff]   ;;  %v4924_v44 = vld [vmem:[%s7138_s3 + $0x30] ss:$12 sps:$4 sm:$0xff]  }
 0x235   : > { %v5925_v60 = vadd.f32 %v4653_v50, %v902_v52  ;;  %v1130_v63 = vpop.f32.mrb[51].mxu0  ;;  %4658 = vmatprep.subr.bf16.mxu1 %v4927_v34  ;;  %v4930_v51 = vld [vmem:[%s7138_s3 + $0x4c] ss:$12 sps:$4 sm:$0xff]   ;;  %v4928_v50 = vld [vmem:[%s7138_s3 + $0x48] ss:$12 sps:$4 sm:$0xff]  }
 0x236   : > { %v5929_v12 = vadd.f32 %v1130_v63, %v896_v49  ;;  %4659 = vmatpush3.bf16.msra.mxu1 %v4927_v34  ;;  %v4931_v52 = vld [vmem:[%s7138_s3 + $0x20] ss:$12 sps:$4 sm:$0xff]   ;;  %v4934_v49 = vld [vmem:[%s7138_s3 + $0x64] ss:$12 sps:$4 sm:$0xff]  }
 0x237   : > { %v1179_v55 = vpack.c.bf16 %v5925_v60, %v5916_v31  ;;  %4660 = vmatprep.subr.bf16.mxu1 %v4931_v52  ;;  %v4932_v63 = vld [vmem:[%s7138_s3 + $0x60] ss:$12 sps:$4 sm:$0xff]  }
 0x238   : > { %v1178_v21 = vpack.c.bf16 %v5929_v12, %v5920_v47 }
 0x23a   : > { %v4656_v22 = vpop.f32.mrb[52].mxu0  ;;  %1382 = vmatmul.mubr.bf16.gmra.mrb[24].mxu1 %v1178_v21  ;;  %v4943_v21 = vld [vmem:[%s7138_s3 + $0x68] ss:$12 sps:$4 sm:$0xff]  }
 0x23b   : > { %v5941_v24 = vadd.f32 %v4656_v22, %v911_v42  ;;  %v1143_v45 = vpop.f32.mrb[53].mxu0  ;;  %1389 = vmatprep.mubr.bf16.mxu1 %v5624_v58  ;;  %v4920_v58 = vld [vmem:[%s7138_s3 + $0x4] ss:$12 sps:$4 sm:$0xff]   ;;  %4661 = vmatpush3.bf16.msra.mxu1 %v4931_v52  ;;  %v4946_v22 = vld [vmem:[%s7138_s3 + $0xac] ss:$12 sps:$4 sm:$0xff]  }
 0x23c   : > { %v5945_v25 = vadd.f32 %v1143_v45, %v905_v59  ;;  %v4657_v11 = vpop.f32.mrb[54].mxu0  ;;  %1823 = vmatprep.subr.bf16.mxu0 %v4920_v58  ;;  %4662 = vmatprep.subr.bf16.mxu1 %v4935_v57  ;;  %v4940_v42 = vld [vmem:[%s7138_s3 + $0x90] ss:$12 sps:$4 sm:$0xff]   ;;  %v4947_v59 = vld [vmem:[%s7138_s3 + $0x80] ss:$12 sps:$4 sm:$0xff]  }
 0x23d   : > { %v5948_v16 = vadd.f32 %v4657_v11, %v914_v53  ;;  %v1146_v5 = vpop.f32.mrb[55].mxu0  ;;  %1824 = vmatpush1.bf16.msra.mxu0 %v4918_v28  ;;  %v4944_v45 = vld [vmem:[%s7138_s3 + $0xa8] ss:$12 sps:$4 sm:$0xff]   ;;  %v4948_v53 = vld [vmem:[%s7138_s3 + $0x98] ss:$12 sps:$4 sm:$0xff]  }
 0x23e   : > { %v5950_v35 = vadd.f32 %v1146_v5, %v908_v62  ;;  %1825 = vmatprep.subr.bf16.mxu0 %v4923_v30  ;;  %v4949_v11 = vld [vmem:[%s7138_s3 + $0xb0] ss:$12 sps:$4 sm:$0xff]   ;;  %v6033_v5 = vld [vmem:[%s7141_s6] ss:$0 sm:$0xff] }
 0x23f   : > { %v1181_v33 = vpack.c.bf16 %v5948_v16, %v5941_v24  ;;  %4663 = vmatpush3.bf16.msra.mxu1 %v4935_v57 }
 0x240   : > { %v1180_v26 = vpack.c.bf16 %v5950_v35, %v5945_v25  ;;  %4664 = vmatprep.subr.bf16.mxu1 %v4939_v39 }
 0x242   : > { %1390 = vmatmul.mubr.bf16.gmra.mrb[28].mxu1 %v1179_v55  ;;  %v4936_v55 = vld [vmem:[%s7138_s3 + $0x78] ss:$12 sps:$4 sm:$0xff]  }
 0x243   : > { %1397 = vmatprep.mubr.bf16.mxu1 %v5630_v61  ;;  %v4921_v61 = vld [vmem:[%s7138_s3 + $0x18] ss:$12 sps:$4 sm:$0xff]   ;;  %4665 = vmatpush3.bf16.msra.mxu1 %v4939_v39 }
 0x244   : > { %1826 = vmatpush1.bf16.msra.mxu0 %v4921_v61  ;;  %4666 = vmatprep.subr.bf16.mxu1 %v4943_v21 }
 0x247   : > { %4667 = vmatpush3.bf16.msra.mxu1 %v4943_v21 }
 0x248   : > { %4668 = vmatprep.subr.bf16.mxu1 %v4947_v59 }
 0x24a   : > { %1398 = vmatmul.mubr.bf16.gmra.mrb[32].mxu1 %v1180_v26 }
 0x24b   : > { %1405 = vmatprep.mubr.bf16.mxu1 %v5636_v0  ;;  %v4926_v0 = vld [vmem:[%s7138_s3 + $0x34] ss:$12 sps:$4 sm:$0xff]   ;;  %4669 = vmatpush3.bf16.msra.mxu1 %v4947_v59 }
 0x24c   : > { %1827 = vmatprep.subr.bf16.mxu0 %v4926_v0  ;;  %4670 = vmatprep.subr.bf16.mxu1 %v4948_v53 }
 0x24d   : > { %1828 = vmatpush1.bf16.msra.mxu0 %v4924_v44 }
 0x24e   : > { %1829 = vmatprep.subr.bf16.mxu0 %v4930_v51 }
 0x24f   : > { %4671 = vmatpush3.bf16.msra.mxu1 %v4948_v53 }
 0x250   : > { %4672 = vmatprep.subr.bf16.mxu1 %v4949_v11 }
 0x251   : > { %1830 = vmatpush1.bf16.msra.mxu0 %v4928_v50 }
 0x252   : > { %1406 = vmatmul.mubr.bf16.gmra.mrb[36].mxu1 %v1181_v33  ;;  %1831 = vmatprep.subr.bf16.mxu0 %v4934_v49 }
 0x253   : > { %4673 = vmatpush3.bf16.msra.mxu1 %v4949_v11 }
 0x255   : > { %1832 = vmatpush1.bf16.msra.mxu0 %v4932_v63 }
 0x256   : > { %1833 = vmatprep.subr.bf16.mxu0 %v4938_v3 }
 0x259   : > { %1834 = vmatpush1.bf16.msra.mxu0 %v4936_v55 }
 0x25a   : > { %1835 = vmatprep.subr.bf16.mxu0 %v4942_v13 }
 0x25d   : > { %1836 = vmatpush1.bf16.msra.mxu0 %v4940_v42 }
 0x25e   : > { %1837 = vmatprep.subr.bf16.mxu0 %v4946_v22 }
 0x261   : > { %1838 = vmatpush1.bf16.msra.mxu0 %v4944_v45 }
 0x2ed   : > { %v4322_v62 = vpop.f32.mrb[8].mxu1 }
 0x2ee   : > { %v4323_v33 = vpop.f32.mrb[9].mxu1 }
 0x2ef   : > { %v4324_v26 = vadd.f32 %v4323_v33, %v4322_v62  ;;  %v4325_v58 = vpop.f32.mrb[10].mxu1 }
 0x2f0   : > { %v4326_v28 = vpop.f32.mrb[11].mxu1 }
 0x2f1   : > { %v1352_v30 = vadd.f32 %v4324_v26, %v6033_v5  ;;  %v4327_v61 = vadd.f32 %v4326_v28, %v4325_v58 }
 0x2f3   : > { %v4113_v0 = vmul.f32 -1.442695, %v1352_v30  ;;  %v1355_v34 = vadd.f32 %v4327_v61, %v6033_v5 }
 0x2f5   : > { %5030 = vpow2.f32 %v4113_v0  ;;  %v4114_v44 = vmul.f32 -1.442695, %v1355_v34  ;;  %v4328_v51 = vpop.f32.mrb[12].mxu1 }
 0x2f6   : > { %v4329_v52 = vpop.f32.mrb[13].mxu1 }
 0x2f7   : > { %5032 = vpow2.f32 %v4114_v44  ;;  %v4330_v50 = vadd.f32 %v4329_v52, %v4328_v51  ;;  %v4331_v49 = vpop.f32.mrb[14].mxu1 }
 0x2f8   : > { %v4332_v57 = vpop.f32.mrb[15].mxu1 }
 0x2f9   : > { %v1360_v63 = vadd.f32 %v4330_v50, %v6033_v5  ;;  %v4333_v3 = vadd.f32 %v4332_v57, %v4331_v49 }
 0x2fb   : > { %v4115_v39 = vmul.f32 -1.442695, %v1360_v63  ;;  %v1363_v55 = vadd.f32 %v4333_v3, %v6033_v5 }
 0x2fd   : > { %5034 = vpow2.f32 %v4115_v39  ;;  %v4116_v13 = vmul.f32 -1.442695, %v1363_v55  ;;  %v4334_v21 = vpop.f32.mrb[16].mxu1 }
 0x2fe   : > { %v4335_v42 = vpop.f32.mrb[17].mxu1 }
 0x2ff   : > { %v5031_v22 = vpop.eup %5030  ;;  %5036 = vpow2.f32 %v4116_v13  ;;  %v4336_v59 = vadd.f32 %v4335_v42, %v4334_v21  ;;  %v4337_v45 = vpop.f32.mrb[18].mxu1 }
 0x300   : > { %v1462_v53 = vadd.f32 1.0, %v5031_v22  ;;  %v4338_v11 = vpop.f32.mrb[19].mxu1 }
 0x301   : > { %v5033_v62 = vpop.eup %5032  ;;  %v1368_v33 = vadd.f32 %v4336_v59, %v6033_v5  ;;  %v4339_v26 = vadd.f32 %v4338_v11, %v4337_v45 }
 0x302   : > { %5038 = vrcp.f32 %v1462_v53  ;;  %v1463_v58 = vadd.f32 1.0, %v5033_v62 }
 0x303   : > { %5040 = vtanh.f32 %v5872_v7  ;;  %v4117_v28 = vmul.f32 -1.442695, %v1368_v33  ;;  %v1371_v30 = vadd.f32 %v4339_v26, %v6033_v5 }
 0x304   : > { %5042 = vrcp.f32 %v1463_v58 }
 0x305   : > { %5044 = vpow2.f32 %v4117_v28  ;;  %v4118_v61 = vmul.f32 -1.442695, %v1371_v30  ;;  %v4340_v0 = vpop.f32.mrb[20].mxu1 }
 0x306   : > { %5046 = vtanh.f32 %v5879_v48  ;;  %v4341_v34 = vpop.f32.mrb[21].mxu1 }
 0x307   : > { %v5035_v44 = vpop.eup %5034  ;;  %5048 = vpow2.f32 %v4118_v61  ;;  %v4342_v51 = vadd.f32 %v4341_v34, %v4340_v0  ;;  %v4343_v52 = vpop.f32.mrb[22].mxu1  ;;  %v5318_v0 = vld [vmem:[%s5547_s22] sm:$0xff] }
 0x308   : > { %v1464_v50 = vadd.f32 1.0, %v5035_v44  ;;  %v4344_v49 = vpop.f32.mrb[23].mxu1 }
 0x309   : > { %v5037_v57 = vpop.eup %5036  ;;  %v1376_v63 = vadd.f32 %v4342_v51, %v6033_v5  ;;  %v4345_v7 = vadd.f32 %v4344_v49, %v4343_v52 }
 0x30a   : > { %5050 = vrcp.f32 %v1464_v50  ;;  %v1465_v3 = vadd.f32 1.0, %v5037_v57  ;;  %v5319_v57 = vld [vmem:[%s5547_s22 + $0x8] sm:$0xff] }
 0x30b   : > { %5052 = vtanh.f32 %v5869_v4  ;;  %v4119_v39 = vmul.f32 -1.442695, %v1376_v63  ;;  %v1379_v55 = vadd.f32 %v4345_v7, %v6033_v5 }
 0x30c   : > { %v5039_v13 = vpop.eup %5038  ;;  %5054 = vrcp.f32 %v1465_v3 }
 0x30d   : > { %v5041_v48 = vpop.eup %5040  ;;  %v1510_v21 = vmul.f32 %v5039_v13, %v5672_v10  ;;  %5056 = vpow2.f32 %v4119_v39  ;;  %v4120_v42 = vmul.f32 -1.442695, %v1379_v55  ;;  %v4346_v22 = vpop.f32.mrb[24].mxu1 }
 0x30e   : > { %v5043_v59 = vpop.eup %5042  ;;  %5058 = vtanh.f32 %v5876_v32  ;;  %v4347_v45 = vpop.f32.mrb[25].mxu1 }
 0x30f   : > { %v5045_v53 = vpop.eup %5044  ;;  %v1542_v11 = vmul.f32 %v5041_v48, %v1510_v21  ;;  %v1558_v62 = vsub.f32 1.0, %v1510_v21  ;;  %v1511_v4 = vmul.f32 %v5043_v59, %v5681_v19  ;;  %5060 = vpow2.f32 %v4120_v42  ;;  %v4349_v33 = vpop.f32.mrb[26].mxu1 }
 0x310   : > { %v5047_v26 = vpop.eup %5046  ;;  %v1466_v58 = vadd.f32 1.0, %v5045_v53  ;;  %v4348_v28 = vadd.f32 %v4347_v45, %v4346_v22  ;;  %v4350_v30 = vpop.f32.mrb[27].mxu1 }
 0x311   : > { %v5049_v61 = vpop.eup %5048  ;;  %v1574_v34 = vmul.f32 %v5318_v0, %v1558_v62  ;;  %v1543_v44 = vmul.f32 %v5047_v26, %v1511_v4  ;;  %v1559_v51 = vsub.f32 1.0, %v1511_v4  ;;  %v4351_v52 = vadd.f32 %v4350_v30, %v4349_v33  ;;  %v5320_v30 = vld [vmem:[%s5547_s22 + $0x10] sm:$0xff] }
 0x312   : > { %5062 = vrcp.f32 %v1466_v58  ;;  %v1467_v32 = vadd.f32 1.0, %v5049_v61  ;;  %v1384_v50 = vadd.f32 %v4348_v28, %v6033_v5 }
 0x313   : > { %5064 = vtanh.f32 %v5893_v43  ;;  %v6052_v49 = vadd.f32 %v1574_v34, %v1542_v11  ;;  %v1575_v63 = vmul.f32 %v5319_v57, %v1559_v51  ;;  %v1387_v7 = vadd.f32 %v4351_v52, %v6033_v5 }
 0x314   : > { %v5051_v3 = vpop.eup %5050  ;;  %5066 = vrcp.f32 %v1467_v32  ;;  %v4121_v39 = vmul.f32 -1.442695, %v1384_v50  ;;  %v5321_v50 = vld [vmem:[%s5547_s22 + $0x18] sm:$0xff] }
 0x315   : > { %v5053_v55 = vpop.eup %5052  ;;  %5068 = vtanh.f32 %v5898_v27  ;;  %v6057_v13 = vadd.f32 %v1575_v63, %v1543_v44  ;;  %v1512_v48 = vmul.f32 %v5051_v3, %v5686_v23  ;;  %v4122_v21 = vmul.f32 -1.442695, %v1387_v7  ;;  %v4352_v42 = vpop.f32.mrb[28].mxu1 }
 0x316   : > { %v5055_v43 = vpop.eup %5054  ;;  %5070 = vpow2.f32 %v4121_v39  ;;  %v4353_v22 = vpop.f32.mrb[29].mxu1 }
 0x317   : > { %v5057_v59 = vpop.eup %5056  ;;  %v1544_v45 = vmul.f32 %v5053_v55, %v1512_v48  ;;  %v1560_v53 = vsub.f32 1.0, %v1512_v48  ;;  %v1513_v11 = vmul.f32 %v5055_v43, %v5695_v37  ;;  %5072 = vpow2.f32 %v4122_v21  ;;  %v4355_v62 = vpop.f32.mrb[30].mxu1 }
 0x318   : > { %v5059_v4 = vpop.eup %5058  ;;  %v1468_v33 = vadd.f32 1.0, %v5057_v59  ;;  %v4354_v27 = vadd.f32 %v4353_v22, %v4352_v42  ;;  %v4356_v26 = vpop.f32.mrb[31].mxu1  ;;  %v6063_v58 = vpack.c.bf16 %v6057_v13, %v6052_v49 }
 0x319   : > { %v5061_v28 = vpop.eup %5060  ;;  %v1576_v61 = vmul.f32 %v5320_v30, %v1560_v53  ;;  %v1545_v0 = vmul.f32 %v5059_v4, %v1513_v11  ;;  %v1561_v34 = vsub.f32 1.0, %v1513_v11  ;;  %v4357_v44 = vadd.f32 %v4356_v26, %v4355_v62  ;;  %v5322_v26 = vld [vmem:[%s5547_s22 + $0x20] sm:$0xff] }
 0x31a   : > { %5074 = vrcp.f32 %v1468_v33  ;;  %v1469_v51 = vadd.f32 1.0, %v5061_v28  ;;  %v1392_v52 = vadd.f32 %v4354_v27, %v6033_v5  ;;  %1856 = vmatmul.mubr.bf16.vlgmr.msra.gmra.mrb[56].mxu0 %v6063_v58  ;;  %4674 = vmatprep.mubr.bf16.mxu1 %v6063_v58 }
 0x31b   : > { %5076 = vtanh.f32 %v5889_v17  ;;  %v6070_v32 = vadd.f32 %v1576_v61, %v1544_v45  ;;  %v1577_v57 = vmul.f32 %v5321_v50, %v1561_v34  ;;  %v1395_v63 = vadd.f32 %v4357_v44, %v6033_v5  ;;  %1865 = vmatprep.mubr.bf16.mxu0 %v7143_v2  ;;  %v5323_v50 = vld [vmem:[%s5547_s22 + $0x28] sm:$0xff] }
 0x31c   : > { %v5063_v7 = vpop.eup %5062  ;;  %5078 = vrcp.f32 %v1469_v51  ;;  %v4123_v3 = vmul.f32 -1.442695, %v1392_v52 }
 0x31d   : > { %v5065_v39 = vpop.eup %5064  ;;  %5080 = vtanh.f32 %v5896_v9  ;;  %v6076_v55 = vadd.f32 %v1577_v57, %v1545_v0  ;;  %v1514_v48 = vmul.f32 %v5063_v7, %v5705_v54  ;;  %v4124_v21 = vmul.f32 -1.442695, %v1395_v63  ;;  %v4358_v17 = vpop.f32.mrb[32].mxu1 }
 0x31e   : > { %v5067_v42 = vpop.eup %5066  ;;  %5082 = vpow2.f32 %v4123_v3  ;;  %v4359_v43 = vpop.f32.mrb[33].mxu1 }
 0x31f   : > { %7177 = vst [vmem:[#allocation8_spill] sm:$0xff] %v6076_v55  ;;  %v5069_v22 = vpop.eup %5068  ;;  %v1546_v59 = vmul.f32 %v5065_v39, %v1514_v48  ;;  %v1562_v45 = vsub.f32 1.0, %v1514_v48  ;;  %v1515_v53 = vmul.f32 %v5067_v42, %v5707_v56  ;;  %5084 = vpow2.f32 %v4124_v21  ;;  %v4361_v11 = vpop.f32.mrb[34].mxu1 }
 0x320   : > { %v5071_v62 = vpop.eup %5070  ;;  %v4360_v4 = vadd.f32 %v4359_v43, %v4358_v17  ;;  %v4362_v9 = vpop.f32.mrb[35].mxu1  ;;  %v6082_v33 = vpack.c.bf16 %v6076_v55, %v6070_v32  ;;  %5086 = vtanh.f32 %v5920_v47 }
 0x321   : > { %v5073_v27 = vpop.eup %5072  ;;  %v1578_v28 = vmul.f32 %v5322_v26, %v1562_v45  ;;  %v1547_v30 = vmul.f32 %v5069_v22, %v1515_v53  ;;  %v1563_v61 = vsub.f32 1.0, %v1515_v53  ;;  %v1470_v0 = vadd.f32 1.0, %v5071_v62  ;;  %v5324_v26 = vld [vmem:[%s5547_s22 + $0x30] sm:$0xff] }
 0x322   : > { %v1471_v34 = vadd.f32 1.0, %v5073_v27  ;;  %v1400_v44 = vadd.f32 %v4360_v4, %v6033_v5  ;;  %v4363_v51 = vadd.f32 %v4362_v9, %v4361_v11  ;;  %1866 = vmatmul.mubr.bf16.gmra.mrb[60].mxu0 %v6082_v33  ;;  %4675 = vmatmul.mubr.bf16.vlgmr.msra.gmra.mrb[40].mxu1 %v6082_v33 }
 0x323   : > { %v6089_v52 = vadd.f32 %v1578_v28, %v1546_v59  ;;  %v1579_v57 = vmul.f32 %v5323_v50, %v1563_v61  ;;  %5088 = vrcp.f32 %v1470_v0  ;;  %1875 = vmatprep.mubr.bf16.mxu0 %v7143_v2 }
 0x324   : > { %v5075_v63 = vpop.eup %5074  ;;  %5090 = vrcp.f32 %v1471_v34  ;;  %v4125_v7 = vmul.f32 -1.442695, %v1400_v44  ;;  %v1403_v47 = vadd.f32 %v4363_v51, %v6033_v5 }
 0x325   : > { %7178 = vst [vmem:[#allocation9_spill] sm:$0xff] %v6089_v52  ;;  %v5077_v3 = vpop.eup %5076  ;;  %5092 = vtanh.f32 %v5929_v12  ;;  %v6095_v39 = vadd.f32 %v1579_v57, %v1547_v30  ;;  %v1516_v48 = vmul.f32 %v5075_v63, %v5717_v18  ;;  %v4364_v21 = vpop.f32.mrb[36].mxu1  ;;  %v5325_v57 = vld [vmem:[%s5547_s22 + $0x38] sm:$0xff] }
 0x326   : > { %v5079_v17 = vpop.eup %5078  ;;  %5094 = vpow2.f32 %v4125_v7  ;;  %v4126_v42 = vmul.f32 -1.442695, %v1403_v47  ;;  %v4365_v43 = vpop.f32.mrb[37].mxu1 }
 0x327   : > { %7179 = vst [vmem:[#allocation10_spill] sm:$0xff] %v6095_v39  ;;  %v5081_v22 = vpop.eup %5080  ;;  %v1548_v59 = vmul.f32 %v5077_v3, %v1516_v48  ;;  %v1564_v45 = vsub.f32 1.0, %v1516_v48  ;;  %v1517_v53 = vmul.f32 %v5079_v17, %v5719_v20  ;;  %v4366_v11 = vadd.f32 %v4365_v43, %v4364_v21  ;;  %v4367_v62 = vpop.f32.mrb[38].mxu1 }
 0x328   : > { %v5083_v4 = vpop.eup %5082  ;;  %5096 = vpow2.f32 %v4126_v42  ;;  %v4368_v12 = vpop.f32.mrb[39].mxu1  ;;  %v6101_v9 = vpack.c.bf16 %v6095_v39, %v6089_v52 }
 0x329   : > { %v5085_v27 = vpop.eup %5084  ;;  %v1580_v28 = vmul.f32 %v5324_v26, %v1564_v45  ;;  %v1549_v30 = vmul.f32 %v5081_v22, %v1517_v53  ;;  %v1565_v61 = vsub.f32 1.0, %v1517_v53  ;;  %v1472_v0 = vadd.f32 1.0, %v5083_v4  ;;  %v5327_v26 = vld [vmem:[%s5547_s22 + $0x48] sm:$0xff] }
 0x32a   : > { %5098 = vtanh.f32 %v5916_v31  ;;  %v1473_v34 = vadd.f32 1.0, %v5085_v27  ;;  %v1408_v44 = vadd.f32 %v4366_v11, %v6033_v5  ;;  %v4369_v51 = vadd.f32 %v4368_v12, %v4367_v62  ;;  %1876 = vmatmul.mubr.bf16.gmra.mrb[64].mxu0 %v6101_v9  ;;  %4678 = vmatprep.mubr.bf16.mxu1 %v6101_v9  ;;  %v5087_v7 = vpop.eup %5086  ;;  %v5326_v12 = vld [vmem:[%s5547_s22 + $0x40] sm:$0xff] }
 0x32b   : > { %v6108_v50 = vadd.f32 %v1580_v28, %v1548_v59  ;;  %v1581_v63 = vmul.f32 %v5325_v57, %v1565_v61  ;;  %5100 = vrcp.f32 %v1472_v0  ;;  %1885 = vmatprep.mubr.bf16.mxu0 %v7143_v2 }
 0x32c   : > { %5102 = vrcp.f32 %v1473_v34  ;;  %v4127_v47 = vmul.f32 -1.442695, %v1408_v44  ;;  %v1411_v31 = vadd.f32 %v4369_v51, %v6033_v5 }
 0x32d   : > { %7180 = vst [vmem:[#allocation11_spill] sm:$0xff] %v6108_v50  ;;  %v5089_v3 = vpop.eup %5088  ;;  %5104 = vtanh.f32 %v5925_v60  ;;  %v6114_v48 = vadd.f32 %v1581_v63, %v1549_v30 }
 0x32e   : > { %v5091_v21 = vpop.eup %5090  ;;  %v1518_v17 = vmul.f32 %v5089_v3, %v5730_v40  ;;  %5106 = vpow2.f32 %v4127_v47  ;;  %v4128_v42 = vmul.f32 -1.442695, %v1411_v31 }
 0x32f   : > { %7181 = vst [vmem:[#allocation12_spill] sm:$0xff] %v6114_v48  ;;  %v5093_v43 = vpop.eup %5092  ;;  %v1519_v22 = vmul.f32 %v5091_v21, %v5732_v41  ;;  %v6120_v59 = vpack.c.bf16 %v6114_v48, %v6108_v50 }
 0x330   : > { %v5095_v5 = vpop.eup %5094  ;;  %v1550_v45 = vmul.f32 %v5087_v7, %v1518_v17  ;;  %v1566_v53 = vsub.f32 1.0, %v1518_v17  ;;  %5108 = vpow2.f32 %v4128_v42 }
 0x331   : > { %v1551_v60 = vmul.f32 %v5093_v43, %v1519_v22  ;;  %v1567_v11 = vsub.f32 1.0, %v1519_v22  ;;  %v1474_v62 = vadd.f32 1.0, %v5095_v5  ;;  %4679 = vmatmul.mubr.bf16.gmra.mrb[44].mxu1 %v6120_v59  ;;  %v5328_v22 = vld [vmem:[%s5547_s22 + $0x50] sm:$0xff] }
 0x332   : > { %v5097_v4 = vpop.eup %5096  ;;  %v1582_v27 = vmul.f32 %v5326_v12, %v1566_v53  ;;  %1886 = vmatmul.mubr.bf16.gmra.mrb[68].mxu0 %v6120_v59 }
 0x333   : > { %v1583_v28 = vmul.f32 %v5327_v26, %v1567_v11  ;;  %5110 = vrcp.f32 %v1474_v62  ;;  %v1475_v30 = vadd.f32 1.0, %v5097_v4  ;;  %1895 = vmatprep.mubr.bf16.mxu0 %v7143_v2 }
 0x334   : > { %v5099_v61 = vpop.eup %5098  ;;  %5112 = vtanh.f32 %v5945_v25  ;;  %v6128_v0 = vadd.f32 %v1582_v27, %v1550_v45 }
 0x335   : > { %v5101_v34 = vpop.eup %5100  ;;  %v6130_v44 = vadd.f32 %v1583_v28, %v1551_v60  ;;  %5114 = vrcp.f32 %v1475_v30 }
 0x336   : > { %7182 = vst [vmem:[#allocation13_spill] sm:$0xff] %v6128_v0  ;;  %v5103_v51 = vpop.eup %5102  ;;  %v1520_v57 = vmul.f32 %v5101_v34, %v5745_v1  ;;  %5116 = vtanh.f32 %v5950_v35  ;;  %v5329_v35 = vld [vmem:[%s5547_s22 + $0x58] sm:$0xff]  ;;  %v5330_v34 = vld [vmem:[%s5547_s22 + $0x60] sm:$0xff] }
 0x337   : > { %7183 = vst [vmem:[#allocation14_spill] sm:$0xff] %v6130_v44  ;;  %v5105_v63 = vpop.eup %5104  ;;  %v1521_v7 = vmul.f32 %v5103_v51, %v5747_v29  ;;  %v6137_v47 = vpack.c.bf16 %v6130_v44, %v6128_v0 }
 0x338   : > { %v5107_v25 = vpop.eup %5106  ;;  %v1552_v31 = vmul.f32 %v5099_v61, %v1520_v57  ;;  %v1568_v3 = vsub.f32 1.0, %v1520_v57 }
 0x339   : > { %v1553_v21 = vmul.f32 %v5105_v63, %v1521_v7  ;;  %v1569_v17 = vsub.f32 1.0, %v1521_v7  ;;  %v1476_v42 = vadd.f32 1.0, %v5107_v25  ;;  %4682 = vmatprep.mubr.bf16.mxu1 %v6137_v47  ;;  %v5331_v7 = vld [vmem:[%s5547_s22 + $0x68] sm:$0xff] }
 0x33a   : > { %v5109_v43 = vpop.eup %5108  ;;  %v1584_v5 = vmul.f32 %v5328_v22, %v1568_v3  ;;  %1896 = vmatmul.mubr.bf16.gmra.mrb[72].mxu0 %v6137_v47 }
 0x33b   : > { %v1585_v45 = vmul.f32 %v5329_v35, %v1569_v17  ;;  %5118 = vrcp.f32 %v1476_v42  ;;  %v1477_v53 = vadd.f32 1.0, %v5109_v43  ;;  %1905 = vmatprep.mubr.bf16.mxu0 %v7143_v2 }
 0x33c   : > { %5120 = vtanh.f32 %v5941_v24  ;;  %v6145_v60 = vadd.f32 %v1584_v5, %v1552_v31 }
 0x33d   : > { %v5111_v11 = vpop.eup %5110  ;;  %v6147_v62 = vadd.f32 %v1585_v45, %v1553_v21  ;;  %5122 = vrcp.f32 %v1477_v53  ;;  %v5332_v53 = vld [vmem:[%s5547_s22 + $0x70] sm:$0xff] }
 0x33e   : > { %7184 = vst [vmem:[#allocation15_spill] sm:$0xff] %v6145_v60  ;;  %v5113_v4 = vpop.eup %5112  ;;  %v1522_v12 = vmul.f32 %v5111_v11, %v5770_v36  ;;  %5124 = vtanh.f32 %v5948_v16 }
 0x33f   : > { %7185 = vst [vmem:[#allocation16_spill] sm:$0xff] %v6147_v62  ;;  %v5115_v27 = vpop.eup %5114  ;;  %v6153_v26 = vpack.c.bf16 %v6147_v62, %v6145_v60 }
 0x340   : > { %v1554_v28 = vmul.f32 %v5113_v4, %v1522_v12  ;;  %v1570_v30 = vsub.f32 1.0, %v1522_v12  ;;  %v1523_v24 = vmul.f32 %v5115_v27, %v5772_v38  ;;  %v5117_v61 = vpop.eup %5116 }
 0x341   : > { %4683 = vmatmul.mubr.bf16.gmra.mrb[48].mxu1 %v6153_v26 }
 0x342   : > { %v1586_v51 = vmul.f32 %v5330_v34, %v1570_v30  ;;  %v1555_v57 = vmul.f32 %v5117_v61, %v1523_v24  ;;  %v1571_v63 = vsub.f32 1.0, %v1523_v24  ;;  %1906 = vmatmul.mubr.bf16.gmra.mrb[76].mxu0 %v6153_v26  ;;  %v4950_v34 = vld [vmem:[%s5651_s19] sm:$0xff]  }
 0x343   : > { %1915 = vmatprep.mubr.bf16.mxu0 %v7143_v2 }
 0x344   : > { %v6160_v16 = vadd.f32 %v1586_v51, %v1554_v28  ;;  %v1587_v25 = vmul.f32 %v5331_v7, %v1571_v63  ;;  %v5333_v28 = vld [vmem:[%s5547_s22 + $0x78] sm:$0xff]  ;;  %v4954_v51 = vld [vmem:[%s5651_s19 + $0x20] sm:$0xff]   ;;  %s304_s22 = sand.u32 1, %s5388_s25  }
 0x345   : > { %v5119_v31 = vpop.eup %5118  ;;  %s4056_s23 = sshll.u32 %s304_s22, 7  ;;  %s7094_s17 = scalar_lea.sflag [#allocation4], %s304_s22 }
 0x346   : > { %7186 = vst [vmem:[#allocation17_spill] sm:$0xff] %v6160_v16  ;;  %v5121_v3 = vpop.eup %5120  ;;  %v6163_v21 = vadd.f32 %v1587_v25, %v1555_v57  ;;  %v1524_v17 = vmul.f32 %v5119_v31, %v5795_v46  ;;  %v6191_v57 = vld [vmem:[%s7139_s4] sm:$0x7]  ;;  %s7021_s9 = scalar_lea.vmem [#allocation3], %s4056_s23 }
 0x347   : > { %v5123_v42 = vpop.eup %5122  ;;  %v6195_v63 = vrot.slane %v6191_v57, %v5658_v6  ;;  %v6199_v7 = vrot.slane %v6191_v57, %v5666_v8  ;;  %s3966_s13 = sshll.u32 %s7021_s9, 4  ;;  %s7088_s13 = int_to_ptr.vmem [resolvable:$true] %s3966_s13 }
 0x348   : > { %7187 = vst [vmem:[#allocation18_spill] sm:$0xff] %v6163_v21  ;;  %v1556_v43 = vmul.f32 %v5121_v3, %v1524_v17  ;;  %v1572_v22 = vsub.f32 1.0, %v1524_v17  ;;  %v1525_v5 = vmul.f32 %v5123_v42, %v5797_v15  ;;  %v6169_v35 = vpack.c.bf16 %v6163_v21, %v6160_v16  ;;  %v5125_v45 = vpop.eup %5124  ;;  %s5334_s28 = scalar_lea.vmem %s7088_s13, 2048  ;;  %p5341_p1 = scmp.lt.s32.totalorder %s7088_s13, %s5339_s8 }
 0x349   : > { %p5335_p12 = scmp.ne.s32.totalorder %s7088_s13, %s5334_s28  ;;  %p5342_p2 = scmp.lt.s32.totalorder %s5340_s20, %s5334_s28 }
 0x34a   : > { %v1588_v11 = vmul.f32 %v5332_v53, %v1572_v22  ;;  %v1557_v4 = vmul.f32 %v5125_v45, %v1525_v5  ;;  %v1573_v12 = vsub.f32 1.0, %v1525_v5  ;;  %1916 = vmatmul.mubr.bf16.gmra.mrb[80].mxu0 %v6169_v35  ;;  %4686 = vmatprep.mubr.bf16.mxu1 %v6169_v35 }
 0x34b   : > { %1925 = vmatprep.mubr.bf16.mxu0 %v7143_v2  ;;  %p5336_p13 = pnand %p5335_p12, %p5480_p5  ;;  %p5343_p3 = por %p5342_p2, %p5341_p1 }
 0x34c   : > { %v6175_v27 = vadd.f32 %v1588_v11, %v1556_v43  ;;  %v1589_v30 = vmul.f32 %v5333_v28, %v1573_v12 }
 0x34d   : > { %p5337_p0 = pneg %p5336_p13 }
 0x34e   : > { %7188 = vst [vmem:[#allocation19_spill] sm:$0xff] %v6175_v27  ;;  %v6178_v24 = vadd.f32 %v1589_v30, %v1557_v4 }
 0x34f   : > { %p5344_p4 = pnand %p5343_p3, %p5337_p0 }
 0x350   : > { %7189 = vst [vmem:[#allocation20_spill] sm:$0xff] %v6178_v24  ;;  %v6182_v61 = vpack.c.bf16 %v6178_v24, %v6175_v27 }
 0x352   : > { %1926 = vmatmul.mubr.bf16.gmra.mrb[84].mxu0 %v6182_v61  ;;  %4687 = vmatmul.mubr.bf16.gmra.mrb[52].mxu1 %v6182_v61 }
 0x353   : > { %4706 = vmatprep.mubr.bf16.mxu0 %v4950_v34  ;;  %4730 = vmatprep.mubr.bf16.mxu1 %v4954_v51 }
 0x3ed   : > { %v1857_v25 = vpop.f32.mrb[56].mxu0 }
 0x3ee   : > { %v1858_v31 = vadd.f32 %v1857_v25, %v6195_v63  ;;  %v1859_v3 = vpop.f32.mrb[57].mxu0 }
 0x3ef   : > { %v1860_v17 = vadd.f32 %v1859_v3, %v6199_v7  ;;  %v1861_v42 = vpop.f32.mrb[58].mxu0 }
 0x3f0   : > { %v1862_v43 = vadd.f32 %v1861_v42, %v6195_v63  ;;  %v1863_v22 = vpop.f32.mrb[59].mxu0  ;;  %v2033_v45 = vmul.f32 %v1858_v31, %v5672_v10 }
 0x3f1   : > { %v1864_v5 = vadd.f32 %v1863_v22, %v6199_v7  ;;  %v2034_v11 = vmul.f32 %v1860_v17, %v5672_v10 }
 0x3f2   : > { %v2036_v53 = vmul.f32 %v1862_v43, %v5681_v19 }
 0x3f3   : > { %v2037_v4 = vmul.f32 %v1864_v5, %v5681_v19 }
 0x3f4   : > { %v2081_v12 = vpack.c.bf16 %v2036_v53, %v2033_v45 }
 0x3f5   : > { %v1867_v28 = vpop.f32.mrb[60].mxu0  ;;  %v6209_v30 = vpop.f32.mrb[40].mxu1  ;;  %v6211_v34 = vpack.c.bf16 %v2037_v4, %v2034_v11 }
 0x3f6   : > { %v1868_v51 = vadd.f32 %v1867_v28, %v6195_v63  ;;  %v1869_v25 = vpop.f32.mrb[61].mxu0  ;;  %v6214_v3 = vpop.f32.mrb[41].mxu1  ;;  %4690 = vmatprep.subr.bf16.mxu0 %v2081_v12 }
 0x3f7   : > { %v1870_v31 = vadd.f32 %v1869_v25, %v6199_v7  ;;  %v1871_v42 = vpop.f32.mrb[62].mxu0  ;;  %v6217_v43 = vpop.f32.mrb[42].mxu1  ;;  %4691 = vmatpush3.bf16.msra.mxu0 %v2081_v12 }
 0x3f8   : > { %v1872_v17 = vadd.f32 %v1871_v42, %v6195_v63  ;;  %v1873_v22 = vpop.f32.mrb[63].mxu0  ;;  %v6220_v5 = vpop.f32.mrb[43].mxu1  ;;  %v2039_v53 = vmul.f32 %v1868_v51, %v5686_v23 }
 0x3f9   : > { %v1874_v45 = vadd.f32 %v1873_v22, %v6199_v7  ;;  %v2040_v4 = vmul.f32 %v1870_v31, %v5686_v23 }
 0x3fa   : > { %v2042_v11 = vmul.f32 %v1872_v17, %v5695_v37 }
 0x3fb   : > { %v2043_v28 = vmul.f32 %v1874_v45, %v5695_v37 }
 0x3fc   : > { %v2082_v25 = vpack.c.bf16 %v2042_v11, %v2039_v53 }
 0x3fd   : > { %v1877_v2 = vpop.f32.mrb[64].mxu0  ;;  %v6227_v8 = vpack.c.bf16 %v2043_v28, %v2040_v4 }
 0x3fe   : > { %v1878_v12 = vadd.f32 %v1877_v2, %v6195_v63  ;;  %v1879_v42 = vpop.f32.mrb[65].mxu0  ;;  %4692 = vmatprep.subr.bf16.mxu0 %v2082_v25 }
 0x3ff   : > { %v1880_v6 = vadd.f32 %v1879_v42, %v6199_v7  ;;  %v1881_v24 = vpop.f32.mrb[66].mxu0  ;;  %4693 = vmatpush3.bf16.msra.mxu0 %v2082_v25 }
 0x400   : > { %v1882_v51 = vadd.f32 %v1881_v24, %v6195_v63  ;;  %v1883_v22 = vpop.f32.mrb[67].mxu0  ;;  %v2045_v31 = vmul.f32 %v1878_v12, %v5705_v54 }
 0x401   : > { %v1884_v17 = vadd.f32 %v1883_v22, %v6199_v7  ;;  %v2046_v53 = vmul.f32 %v1880_v6, %v5705_v54 }
 0x402   : > { %v2048_v45 = vmul.f32 %v1882_v51, %v5707_v56 }
 0x403   : > { %v2049_v11 = vmul.f32 %v1884_v17, %v5707_v56 }
 0x404   : > { %v6237_v2 = vpop.f32.mrb[44].mxu1  ;;  %v2083_v4 = vpack.c.bf16 %v2048_v45, %v2045_v31 }
 0x405   : > { %v1887_v28 = vpop.f32.mrb[68].mxu0  ;;  %v6239_v42 = vpop.f32.mrb[45].mxu1  ;;  %v2091_v25 = vpack.c.bf16 %v2049_v11, %v2046_v53 }
 0x406   : > { %v1888_v24 = vadd.f32 %v1887_v28, %v6195_v63  ;;  %v1889_v27 = vpop.f32.mrb[69].mxu0  ;;  %4694 = vmatprep.subr.bf16.mxu0 %v2083_v4  ;;  %v6242_v22 = vpop.f32.mrb[46].mxu1 }
 0x407   : > { %v1890_v12 = vadd.f32 %v1889_v27, %v6199_v7  ;;  %v1891_v51 = vpop.f32.mrb[70].mxu0  ;;  %4695 = vmatpush3.bf16.msra.mxu0 %v2083_v4  ;;  %v6245_v6 = vpop.f32.mrb[47].mxu1 }
 0x408   : > { %v1892_v17 = vadd.f32 %v1891_v51, %v6195_v63  ;;  %v1893_v21 = vpop.f32.mrb[71].mxu0  ;;  %v2051_v45 = vmul.f32 %v1888_v24, %v5717_v18 }
 0x409   : > { %v1894_v31 = vadd.f32 %v1893_v21, %v6199_v7  ;;  %v2052_v11 = vmul.f32 %v1890_v12, %v5717_v18 }
 0x40a   : > { %v2054_v53 = vmul.f32 %v1892_v17, %v5719_v20 }
 0x40b   : > { %v2055_v28 = vmul.f32 %v1894_v31, %v5719_v20 }
 0x40c   : > { %v2084_v16 = vpack.c.bf16 %v2054_v53, %v2051_v45 }
 0x40d   : > { %v1897_v62 = vpop.f32.mrb[72].mxu0  ;;  %v2092_v27 = vpack.c.bf16 %v2055_v28, %v2052_v11 }
 0x40e   : > { %v1898_v4 = vadd.f32 %v1897_v62, %v6195_v63  ;;  %v1899_v60 = vpop.f32.mrb[73].mxu0  ;;  %4696 = vmatprep.subr.bf16.mxu0 %v2084_v16 }
 0x40f   : > { %v1900_v51 = vadd.f32 %v1899_v60, %v6199_v7  ;;  %v1901_v44 = vpop.f32.mrb[74].mxu0  ;;  %4697 = vmatpush3.bf16.msra.mxu0 %v2084_v16 }
 0x410   : > { %v1902_v21 = vadd.f32 %v1901_v44, %v6195_v63  ;;  %v1903_v24 = vpop.f32.mrb[75].mxu0  ;;  %4698 = vmatprep.subr.bf16.mxu0 %v6211_v34  ;;  %v2057_v17 = vmul.f32 %v1898_v4, %v5730_v40 }
 0x411   : > { %v1904_v12 = vadd.f32 %v1903_v24, %v6199_v7  ;;  %v2058_v45 = vmul.f32 %v1900_v51, %v5730_v40 }
 0x412   : > { %v2060_v31 = vmul.f32 %v1902_v21, %v5732_v41 }
 0x413   : > { %v2061_v62 = vmul.f32 %v1904_v12, %v5732_v41  ;;  %4699 = vmatpush3.bf16.msra.mxu0 %v6211_v34 }
 0x414   : > { %4700 = vmatprep.subr.bf16.mxu0 %v6227_v8  ;;  %v6264_v60 = vpop.f32.mrb[48].mxu1  ;;  %v2097_v44 = vpack.c.bf16 %v2060_v31, %v2057_v17 }
 0x415   : > { %v1907_v16 = vpop.f32.mrb[76].mxu0  ;;  %v6266_v53 = vpop.f32.mrb[49].mxu1  ;;  %v6268_v11 = vpack.c.bf16 %v2061_v62, %v2058_v45 }
 0x416   : > { %v1908_v28 = vadd.f32 %v1907_v16, %v6195_v63  ;;  %v1909_v4 = vpop.f32.mrb[77].mxu0  ;;  %4714 = vmatprep.subr.bf16.mxu1 %v2097_v44  ;;  %v6271_v21 = vpop.f32.mrb[50].mxu1 }
 0x417   : > { %v1910_v51 = vadd.f32 %v1909_v4, %v6199_v7  ;;  %v1911_v24 = vpop.f32.mrb[78].mxu0  ;;  %4701 = vmatpush3.bf16.msra.mxu0 %v6227_v8  ;;  %4715 = vmatpush3.bf16.msra.mxu1 %v2097_v44  ;;  %v6275_v34 = vpop.f32.mrb[51].mxu1  ;;  %v4958_v44 = vld [vmem:[%s7140_s5 + $0x40] sm:$0xff]  }
 0x418   : > { %v1912_v12 = vadd.f32 %v1911_v24, %v6195_v63  ;;  %v1913_v17 = vpop.f32.mrb[79].mxu0  ;;  %4702 = vmatprep.subr.bf16.mxu0 %v2091_v25  ;;  %v2063_v45 = vmul.f32 %v1908_v28, %v5745_v1 }
 0x419   : > { %v1914_v31 = vadd.f32 %v1913_v17, %v6199_v7  ;;  %v2064_v16 = vmul.f32 %v1910_v51, %v5745_v1 }
 0x41a   : > { %v2066_v62 = vmul.f32 %v1912_v12, %v5747_v29  ;;  %v4951_v12 = vld [vmem:[%s5651_s19 + $0x8] sm:$0xff]  }
 0x41b   : > { %v2067_v4 = vmul.f32 %v1914_v31, %v5747_v29  ;;  %4703 = vmatpush3.bf16.msra.mxu0 %v2091_v25  ;;  %v4952_v25 = vld [vmem:[%s5651_s19 + $0x10] sm:$0xff]   ;;  %v4959_v31 = vld [vmem:[%s7140_s5] sm:$0xff]  }
 0x41c   : > { %4704 = vmatprep.subr.bf16.mxu0 %v2092_v27  ;;  %v2098_v8 = vpack.c.bf16 %v2066_v62, %v2063_v45 }
 0x41d   : > { %v1917_v24 = vpop.f32.mrb[80].mxu0  ;;  %v6286_v0 = vpack.c.bf16 %v2067_v4, %v2064_v16  ;;  %v4960_v16 = vld [vmem:[%s7140_s5 + $0x48] sm:$0xff]  }
 0x41e   : > { %v1918_v17 = vadd.f32 %v1917_v24, %v6195_v63  ;;  %v1919_v28 = vpop.f32.mrb[81].mxu0  ;;  %4716 = vmatprep.subr.bf16.mxu1 %v2098_v8 }
 0x41f   : > { %v1920_v51 = vadd.f32 %v1919_v28, %v6199_v7  ;;  %v1921_v48 = vpop.f32.mrb[82].mxu0  ;;  %4705 = vmatpush3.bf16.msra.mxu0 %v2092_v27  ;;  %4717 = vmatpush3.bf16.msra.mxu1 %v2098_v8 }
 0x420   : > { %v1922_v45 = vadd.f32 %v1921_v48, %v6195_v63  ;;  %v1923_v62 = vpop.f32.mrb[83].mxu0  ;;  %4410 = vmatprep.subr.bf16.mxu0 %v4958_v44  ;;  %v2069_v24 = vmul.f32 %v1918_v17, %v5770_v36  ;;  %v4961_v48 = vld [vmem:[%s7140_s5 + $0x8] sm:$0xff]   ;;  %v4962_v17 = vld [vmem:[%s7140_s5 + $0x50] sm:$0xff]  }
 0x421   : > { %v1924_v4 = vadd.f32 %v1923_v62, %v6199_v7  ;;  %v2070_v8 = vmul.f32 %v1920_v51, %v5770_v36 }
 0x422   : > { %v2072_v27 = vmul.f32 %v1922_v45, %v5772_v38  ;;  %4707 = vmatmul.mubr.bf16.vlgmr.msra.gmra.mrb[88].mxu0 %v4951_v12 }
 0x423   : > { %v2073_v28 = vmul.f32 %v1924_v4, %v5772_v38  ;;  %4710 = vmatprep.mubr.bf16.mxu0 %v4952_v25  ;;  %4411 = vmatpush3.bf16.msra.mxu0 %v4959_v31  ;;  %v4953_v25 = vld [vmem:[%s5651_s19 + $0x18] sm:$0xff]  }
 0x424   : > { %v2099_v44 = vpack.c.bf16 %v2072_v27, %v2069_v24  ;;  %4412 = vmatprep.subr.bf16.mxu0 %v4960_v16  ;;  %v4963_v16 = vld [vmem:[%s7140_s5 + $0x10] sm:$0xff]  }
 0x425   : > { %v1927_v62 = vpop.f32.mrb[84].mxu0  ;;  %v6310_v45 = vpop.f32.mrb[52].mxu1  ;;  %v2107_v12 = vpack.c.bf16 %v2073_v28, %v2070_v8 }
 0x426   : > { %v1928_v51 = vadd.f32 %v1927_v62, %v6195_v63  ;;  %v1929_v50 = vpop.f32.mrb[85].mxu0  ;;  %v6313_v4 = vpop.f32.mrb[53].mxu1  ;;  %4718 = vmatprep.subr.bf16.mxu1 %v2099_v44  ;;  %v4964_v62 = vld [vmem:[%s7140_s5 + $0x58] sm:$0xff]  }
 0x427   : > { %v1930_v31 = vadd.f32 %v1929_v50, %v6199_v7  ;;  %v1931_v39 = vpop.f32.mrb[86].mxu0  ;;  %v6317_v24 = vpop.f32.mrb[54].mxu1  ;;  %4719 = vmatpush3.bf16.msra.mxu1 %v2099_v44  ;;  %4413 = vmatpush3.bf16.msra.mxu0 %v4961_v48 }
 0x428   : > { %v1932_v27 = vadd.f32 %v1931_v39, %v6195_v63  ;;  %v1933_v8 = vpop.f32.mrb[87].mxu0  ;;  %v6323_v28 = vpop.f32.mrb[55].mxu1  ;;  %4414 = vmatprep.subr.bf16.mxu0 %v4962_v17  ;;  %v2075_v52 = vmul.f32 %v1928_v51, %v5795_v46  ;;  %v4965_v39 = vld [vmem:[%s7140_s5 + $0x18] sm:$0xff]   ;;  %v4955_v51 = vld [vmem:[%s5651_s19 + $0x28] sm:$0xff]  }
 0x429   : > { %v1934_v50 = vadd.f32 %v1933_v8, %v6199_v7  ;;  %v2076_v44 = vmul.f32 %v1930_v31, %v5795_v46  ;;  %v4966_v7 = vld [vmem:[%s7140_s5 + $0x60] sm:$0xff]   ;;  %v7190_v31 = vmov 0   ;;  %v6371_v8 = vrot.slane %v6191_v57, %v5857_v14 }
 0x42a   : > { %v2078_v48 = vmul.f32 %v1932_v27, %v5797_v15  ;;  %4711 = vmatmul.mubr.bf16.gmra.mrb[92].mxu0 %v4953_v25  ;;  %v4956_v25 = vld [vmem:[%s5651_s19 + $0x30] sm:$0xff]   ;;  %v4973_v27 = vld [vmem:[%s7140_s5 + $0x38] sm:$0xff]  }
 0x42b   : > { %v2079_v55 = vmul.f32 %v1934_v50, %v5797_v15  ;;  %2514 = vmatprep.mubr.bf16.mxu0 %v6063_v58  ;;  %4415 = vmatpush3.bf16.msra.mxu0 %v4963_v16  ;;  %v4967_v58 = vld [vmem:[%s7140_s5 + $0x20] sm:$0xff]   ;;  %v4970_v16 = vld [vmem:[%s7140_s5 + $0x70] sm:$0xff]   ;;  %v1971_v50 = vadd.f32 %v6214_v3, %v6371_v8 }
 0x42c   : > { %v2100_v63 = vpack.c.bf16 %v2078_v48, %v2075_v52  ;;  %4416 = vmatprep.subr.bf16.mxu0 %v4964_v62  ;;  %v4968_v52 = vld [vmem:[%s7140_s5 + $0x68] sm:$0xff]   ;;  %v1979_v62 = vadd.f32 %v6209_v30, %v6371_v8  ;;  %v1982_v48 = vadd.f32 %v6217_v43, %v6371_v8  ;;  %v1995_v43 = vadd.f32 %v6237_v2, %v6371_v8 }
 0x42d   : > { %v2108_v17 = vpack.c.bf16 %v2079_v55, %v2076_v44  ;;  %v4969_v55 = vld [vmem:[%s7140_s5 + $0x28] sm:$0xff]   ;;  %v1974_v44 = vadd.f32 %v6220_v5, %v6371_v8 }
 0x42e   : > { %4720 = vmatprep.subr.bf16.mxu1 %v2100_v63 }
 0x42f   : > { %4721 = vmatpush3.bf16.msra.mxu1 %v2100_v63  ;;  %4417 = vmatpush3.bf16.msra.mxu0 %v4965_v39  ;;  %v2041_v39 = vmul.f32 %v1979_v62, %v5686_v23  ;;  %v2038_v3 = vmul.f32 %v1974_v44, %v5681_v19 }
 0x430   : > { %4722 = vmatprep.subr.bf16.mxu1 %v6268_v11  ;;  %4418 = vmatprep.subr.bf16.mxu0 %v4966_v7  ;;  %v2035_v7 = vmul.f32 %v1971_v50, %v5672_v10 }
 0x433   : > { %4723 = vmatpush3.bf16.msra.mxu1 %v6268_v11  ;;  %4419 = vmatpush3.bf16.msra.mxu0 %v4967_v58  ;;  %v4957_v11 = vld [vmem:[%s5651_s19 + $0x38] sm:$0xff]   ;;  %v2044_v58 = vmul.f32 %v1982_v48, %v5695_v37 }
 0x434   : > { %4724 = vmatprep.subr.bf16.mxu1 %v6286_v0  ;;  %4420 = vmatprep.subr.bf16.mxu0 %v4968_v52 }
 0x437   : > { %4725 = vmatpush3.bf16.msra.mxu1 %v6286_v0  ;;  %4421 = vmatpush3.bf16.msra.mxu0 %v4969_v55  ;;  %v4971_v0 = vld [vmem:[%s7140_s5 + $0x30] sm:$0xff]  }
 0x438   : > { %4726 = vmatprep.subr.bf16.mxu1 %v2107_v12  ;;  %4422 = vmatprep.subr.bf16.mxu0 %v4970_v16 }
 0x43b   : > { %4727 = vmatpush3.bf16.msra.mxu1 %v2107_v12  ;;  %4423 = vmatpush3.bf16.msra.mxu0 %v4971_v0  ;;  %v4972_v12 = vld [vmem:[%s7140_s5 + $0x78] sm:$0xff]   ;;  %v1990_v0 = vadd.f32 %v6245_v6, %v6371_v8 }
 0x43c   : > { %4728 = vmatprep.subr.bf16.mxu1 %v2108_v17  ;;  %4424 = vmatprep.subr.bf16.mxu0 %v4972_v12  ;;  %v2053_v12 = vmul.f32 %v1995_v43, %v5717_v18  ;;  %v2006_v43 = vadd.f32 %v6275_v34, %v6371_v8  ;;  %v2027_v34 = vadd.f32 %v6310_v45, %v6371_v8 }
 0x43d   : > { %v2050_v6 = vmul.f32 %v1990_v0, %v5707_v56 }
 0x43f   : > { %4729 = vmatpush3.bf16.msra.mxu1 %v2108_v17  ;;  %4425 = vmatpush3.bf16.msra.mxu0 %v4973_v27 }
 0x442   : > { %4731 = vmatmul.mubr.bf16.vlgmr.msra.gmra.mrb[56].mxu1 %v4955_v51  ;;  %v1987_v51 = vadd.f32 %v6239_v42, %v6371_v8 }
 0x443   : > { %4734 = vmatprep.mubr.bf16.mxu1 %v4956_v25 }
 0x444   : > { %v2047_v42 = vmul.f32 %v1987_v51, %v5705_v54 }
 0x44a   : > { %4735 = vmatmul.mubr.bf16.gmra.mrb[60].mxu1 %v4957_v11  ;;  %v1998_v11 = vadd.f32 %v6242_v22, %v6371_v8 }
 0x44b   : > { %3020 = vmatprep.mubr.bf16.mxu1 %v7190_v31 }
 0x44c   : > { %v2056_v22 = vmul.f32 %v1998_v11, %v5719_v20 }
 0x4f5   : > { %v4708_v63 = vpop.f32.mrb[88].mxu0 }
 0x4f6   : > { %v6383_v17 = vadd.f32 %v4708_v63, %v2041_v39  ;;  %v2203_v57 = vpop.f32.mrb[89].mxu0 }
 0x4f7   : > { %v6386_v30 = vadd.f32 %v2203_v57, %v2035_v7  ;;  %v4709_v52 = vpop.f32.mrb[90].mxu0 }
 0x4f8   : > { %v6391_v55 = vadd.f32 %v4709_v52, %v2044_v58  ;;  %v2206_v5 = vpop.f32.mrb[91].mxu0  ;;  %v2003_v52 = vadd.f32 %v6266_v53, %v6371_v8 }
 0x4f9   : > { %v6395_v25 = vadd.f32 %v2206_v5, %v2038_v3  ;;  %v2014_v3 = vadd.f32 %v6271_v21, %v6371_v8  ;;  %v2062_v21 = vmul.f32 %v2006_v43, %v5732_v41 }
 0x4fa   : > { %v2340_v16 = vpack.c.bf16 %v6391_v55, %v6383_v17 }
 0x4fb   : > { %v2339_v2 = vpack.c.bf16 %v6395_v25, %v6386_v30 }
 0x4fd   : > { %v4712_v27 = vpop.f32.mrb[92].mxu0  ;;  %2515 = vmatmul.mubr.bf16.vlgmr.msra.gmra.mrb[96].mxu0 %v2339_v2 }
 0x4fe   : > { %v6407_v62 = vadd.f32 %v4712_v27, %v2053_v12  ;;  %v2219_v50 = vpop.f32.mrb[93].mxu0  ;;  %2522 = vmatprep.mubr.bf16.mxu0 %v6082_v33  ;;  %v2011_v33 = vadd.f32 %v6264_v60, %v6371_v8  ;;  %v2068_v60 = vmul.f32 %v2014_v3, %v5747_v29  ;;  %v2019_v12 = vadd.f32 %v6313_v4, %v6371_v8 }
 0x4ff   : > { %v6411_v48 = vadd.f32 %v2219_v50, %v2047_v42  ;;  %v4713_v44 = vpop.f32.mrb[94].mxu0  ;;  %v2022_v50 = vadd.f32 %v6323_v28, %v6371_v8 }
 0x500   : > { %v6414_v39 = vadd.f32 %v4713_v44, %v2056_v22  ;;  %v2222_v63 = vpop.f32.mrb[95].mxu0  ;;  %v2065_v5 = vmul.f32 %v2011_v33, %v5745_v1  ;;  %v2077_v22 = vmul.f32 %v2027_v34, %v5795_v46  ;;  %v2071_v4 = vmul.f32 %v2019_v12, %v5770_v36  ;;  %v4990_v34 = vld [vmem:[%s7138_s3 + $0x64] ss:$12 sps:$4 sm:$0xff]   ;;  %v4988_v12 = vld [vmem:[%s7138_s3 + $0x60] ss:$12 sps:$4 sm:$0xff]  }
 0x501   : > { %v6416_v7 = vadd.f32 %v2222_v63, %v2050_v6  ;;  %v2074_v28 = vmul.f32 %v2022_v50, %v5772_v38  ;;  %v4992_v50 = vld [vmem:[%s7138_s3 + $0x78] ss:$12 sps:$4 sm:$0xff]  }
 0x502   : > { %v2342_v57 = vpack.c.bf16 %v6414_v39, %v6407_v62 }
 0x503   : > { %v2341_v58 = vpack.c.bf16 %v6416_v7, %v6411_v48 }
 0x505   : > { %2523 = vmatmul.mubr.bf16.gmra.mrb[100].mxu0 %v2340_v16 }
 0x506   : > { %2530 = vmatprep.mubr.bf16.mxu0 %v6101_v9  ;;  %v2059_v9 = vmul.f32 %v2003_v52, %v5730_v40 }
 0x50d   : > { %2531 = vmatmul.mubr.bf16.gmra.mrb[104].mxu0 %v2341_v58 }
 0x50e   : > { %2538 = vmatprep.mubr.bf16.mxu0 %v6120_v59 }
 0x515   : > { %v4732_v51 = vpop.f32.mrb[56].mxu1  ;;  %2539 = vmatmul.mubr.bf16.gmra.mrb[108].mxu0 %v2342_v57 }
 0x516   : > { %v6434_v11 = vadd.f32 %v4732_v51, %v2065_v5  ;;  %v2292_v59 = vpop.f32.mrb[57].mxu1  ;;  %2546 = vmatprep.mubr.bf16.mxu0 %v6137_v47  ;;  %v2030_v47 = vadd.f32 %v6317_v24, %v6371_v8  ;;  %v4974_v5 = vld [vmem:[%s7138_s3] ss:$12 sps:$4 sm:$0xff]   ;;  %v4979_v51 = vld [vmem:[%s7138_s3 + $0x1c] ss:$12 sps:$4 sm:$0xff]  }
 0x517   : > { %v6438_v53 = vadd.f32 %v2292_v59, %v2059_v9  ;;  %v4733_v16 = vpop.f32.mrb[58].mxu1  ;;  %v4983_v9 = vld [vmem:[%s7138_s3 + $0x8] ss:$12 sps:$4 sm:$0xff]   ;;  %v4980_v59 = vld [vmem:[%s7138_s3 + $0x30] ss:$12 sps:$4 sm:$0xff]  }
 0x518   : > { %v6443_v0 = vadd.f32 %v4733_v16, %v2068_v60  ;;  %v2295_v2 = vpop.f32.mrb[59].mxu1  ;;  %v2080_v24 = vmul.f32 %v2030_v47, %v5797_v15  ;;  %4738 = vmatprep.subr.bf16.mxu0 %v4983_v9  ;;  %v4986_v60 = vld [vmem:[%s7138_s3 + $0x4c] ss:$12 sps:$4 sm:$0xff]   ;;  %v4994_v47 = vld [vmem:[%s7138_s3 + $0x7c] ss:$12 sps:$4 sm:$0xff]  }
 0x519   : > { %v6447_v27 = vadd.f32 %v2295_v2, %v2062_v21  ;;  %4739 = vmatpush3.bf16.msra.mxu0 %v4983_v9  ;;  %v4987_v16 = vld [vmem:[%s7138_s3 + $0x20] ss:$12 sps:$4 sm:$0xff]   ;;  %v4984_v21 = vld [vmem:[%s7138_s3 + $0x48] ss:$12 sps:$4 sm:$0xff]   ;;  %v4991_v2 = vld [vmem:[%s7138_s3 + $0x38] ss:$12 sps:$4 sm:$0xff]  }
 0x51a   : > { %v2344_v42 = vpack.c.bf16 %v6443_v0, %v6434_v11  ;;  %4740 = vmatprep.subr.bf16.mxu0 %v4987_v16 }
 0x51b   : > { %v2343_v45 = vpack.c.bf16 %v6447_v27, %v6438_v53 }
 0x51d   : > { %v4736_v44 = vpop.f32.mrb[60].mxu1  ;;  %2547 = vmatmul.mubr.bf16.gmra.mrb[112].mxu0 %v2343_v45  ;;  %v4998_v45 = vld [vmem:[%s7138_s3 + $0x94] ss:$12 sps:$4 sm:$0xff]  }
 0x51e   : > { %v6459_v6 = vadd.f32 %v4736_v44, %v2077_v22  ;;  %v2308_v63 = vpop.f32.mrb[61].mxu1  ;;  %2554 = vmatprep.mubr.bf16.mxu0 %v6153_v26  ;;  %v4976_v26 = vld [vmem:[%s7138_s3 + $0x4] ss:$12 sps:$4 sm:$0xff]   ;;  %4741 = vmatpush3.bf16.msra.mxu0 %v4987_v16  ;;  %v4999_v22 = vld [vmem:[%s7138_s3 + $0x68] ss:$12 sps:$4 sm:$0xff]  }
 0x51f   : > { %v6463_v57 = vadd.f32 %v2308_v63, %v2071_v4  ;;  %v4737_v58 = vpop.f32.mrb[62].mxu1  ;;  %2988 = vmatprep.subr.bf16.mxu1 %v4976_v26  ;;  %4742 = vmatprep.subr.bf16.mxu0 %v4991_v2  ;;  %v4996_v44 = vld [vmem:[%s7138_s3 + $0x90] ss:$12 sps:$4 sm:$0xff]   ;;  %v5002_v4 = vld [vmem:[%s7138_s3 + $0xac] ss:$12 sps:$4 sm:$0xff]  }
 0x520   : > { %v6466_v8 = vadd.f32 %v4737_v58, %v2080_v24  ;;  %v2311_v33 = vpop.f32.mrb[63].mxu1  ;;  %2989 = vmatpush1.bf16.msra.mxu1 %v4974_v5  ;;  %v5003_v63 = vld [vmem:[%s7138_s3 + $0x80] ss:$12 sps:$4 sm:$0xff]   ;;  %v5000_v24 = vld [vmem:[%s7138_s3 + $0xa8] ss:$12 sps:$4 sm:$0xff]  }
 0x521   : > { %v6468_v52 = vadd.f32 %v2311_v33, %v2074_v28  ;;  %2990 = vmatprep.subr.bf16.mxu1 %v4979_v51  ;;  %v5004_v58 = vld [vmem:[%s7138_s3 + $0x98] ss:$12 sps:$4 sm:$0xff]   ;;  %v5005_v28 = vld [vmem:[%s7138_s3 + $0xb0] ss:$12 sps:$4 sm:$0xff]  }
 0x522   : > { %v2346_v3 = vpack.c.bf16 %v6466_v8, %v6459_v6  ;;  %4743 = vmatpush3.bf16.msra.mxu0 %v4991_v2 }
 0x523   : > { %v2345_v43 = vpack.c.bf16 %v6468_v52, %v6463_v57 }
 0x525   : > { %2555 = vmatmul.mubr.bf16.gmra.mrb[116].mxu0 %v2344_v42  ;;  %v4995_v42 = vld [vmem:[%s7138_s3 + $0x50] ss:$12 sps:$4 sm:$0xff]  }
 0x526   : > { %2562 = vmatprep.mubr.bf16.mxu0 %v6169_v35  ;;  %v4977_v35 = vld [vmem:[%s7138_s3 + $0x18] ss:$12 sps:$4 sm:$0xff]   ;;  %4744 = vmatprep.subr.bf16.mxu0 %v4995_v42 }
 0x527   : > { %2991 = vmatpush1.bf16.msra.mxu1 %v4977_v35  ;;  %4745 = vmatpush3.bf16.msra.mxu0 %v4995_v42 }
 0x528   : > { %4746 = vmatprep.subr.bf16.mxu0 %v4999_v22 }
 0x52b   : > { %4747 = vmatpush3.bf16.msra.mxu0 %v4999_v22 }
 0x52c   : > { %4748 = vmatprep.subr.bf16.mxu0 %v5003_v63 }
 0x52d   : > { %2563 = vmatmul.mubr.bf16.gmra.mrb[120].mxu0 %v2345_v43 }
 0x52e   : > { %2570 = vmatprep.mubr.bf16.mxu0 %v6182_v61  ;;  %v4982_v61 = vld [vmem:[%s7138_s3 + $0x34] ss:$12 sps:$4 sm:$0xff]  }
 0x52f   : > { %2992 = vmatprep.subr.bf16.mxu1 %v4982_v61  ;;  %4749 = vmatpush3.bf16.msra.mxu0 %v5003_v63 }
 0x530   : > { %2993 = vmatpush1.bf16.msra.mxu1 %v4980_v59  ;;  %4750 = vmatprep.subr.bf16.mxu0 %v5004_v58 }
 0x531   : > { %2994 = vmatprep.subr.bf16.mxu1 %v4986_v60 }
 0x533   : > { %4751 = vmatpush3.bf16.msra.mxu0 %v5004_v58 }
 0x534   : > { %2995 = vmatpush1.bf16.msra.mxu1 %v4984_v21  ;;  %4752 = vmatprep.subr.bf16.mxu0 %v5005_v28 }
 0x535   : > { %2571 = vmatmul.mubr.bf16.gmra.mrb[124].mxu0 %v2346_v3  ;;  %2996 = vmatprep.subr.bf16.mxu1 %v4990_v34  ;;  %v6551_v3 = vld [vmem:[%s7141_s6] ss:$0 sm:$0xff] }
 0x537   : > { %4753 = vmatpush3.bf16.msra.mxu0 %v5005_v28 }
 0x538   : > { %2997 = vmatpush1.bf16.msra.mxu1 %v4988_v12 }
 0x539   : > { %2998 = vmatprep.subr.bf16.mxu1 %v4994_v47 }
 0x53c   : > { %2999 = vmatpush1.bf16.msra.mxu1 %v4992_v50 }
 0x53d   : > { %3000 = vmatprep.subr.bf16.mxu1 %v4998_v45 }
 0x540   : > { %3001 = vmatpush1.bf16.msra.mxu1 %v4996_v44 }
 0x541   : > { %3002 = vmatprep.subr.bf16.mxu1 %v5002_v4 }
 0x544   : > { %3003 = vmatpush1.bf16.msra.mxu1 %v5000_v24 }
 0x5d0   : > { %v4426_v33 = vpop.f32.mrb[96].mxu0 }
 0x5d1   : > { %v4427_v43 = vpop.f32.mrb[97].mxu0 }
 0x5d2   : > { %v4428_v26 = vadd.f32 %v4427_v43, %v4426_v33  ;;  %v4429_v5 = vpop.f32.mrb[98].mxu0 }
 0x5d3   : > { %v4430_v51 = vpop.f32.mrb[99].mxu0 }
 0x5d4   : > { %v2517_v35 = vadd.f32 %v4428_v26, %v6551_v3  ;;  %v4431_v61 = vadd.f32 %v4430_v51, %v4429_v5 }
 0x5d6   : > { %v4178_v9 = vmul.f32 -1.442695, %v2517_v35  ;;  %v2520_v59 = vadd.f32 %v4431_v61, %v6551_v3 }
 0x5d8   : > { %5126 = vpow2.f32 %v4178_v9  ;;  %v4179_v60 = vmul.f32 -1.442695, %v2520_v59  ;;  %v4432_v16 = vpop.f32.mrb[100].mxu0 }
 0x5d9   : > { %v4433_v21 = vpop.f32.mrb[101].mxu0 }
 0x5da   : > { %5128 = vpow2.f32 %v4179_v60  ;;  %v4434_v34 = vadd.f32 %v4433_v21, %v4432_v16  ;;  %v4435_v2 = vpop.f32.mrb[102].mxu0 }
 0x5db   : > { %v4436_v12 = vpop.f32.mrb[103].mxu0 }
 0x5dc   : > { %v2525_v47 = vadd.f32 %v4434_v34, %v6551_v3  ;;  %v4437_v42 = vadd.f32 %v4436_v12, %v4435_v2 }
 0x5de   : > { %v4180_v50 = vmul.f32 -1.442695, %v2525_v47  ;;  %v2528_v45 = vadd.f32 %v4437_v42, %v6551_v3 }
 0x5e0   : > { %5130 = vpow2.f32 %v4180_v50  ;;  %v4181_v22 = vmul.f32 -1.442695, %v2528_v45  ;;  %v4438_v44 = vpop.f32.mrb[104].mxu0 }
 0x5e1   : > { %v4439_v4 = vpop.f32.mrb[105].mxu0 }
 0x5e2   : > { %v5127_v63 = vpop.eup %5126  ;;  %5132 = vpow2.f32 %v4181_v22  ;;  %v4440_v24 = vadd.f32 %v4439_v4, %v4438_v44  ;;  %v4441_v58 = vpop.f32.mrb[106].mxu0 }
 0x5e3   : > { %v2627_v28 = vadd.f32 1.0, %v5127_v63  ;;  %v4442_v33 = vpop.f32.mrb[107].mxu0 }
 0x5e4   : > { %v5129_v43 = vpop.eup %5128  ;;  %v2533_v26 = vadd.f32 %v4440_v24, %v6551_v3  ;;  %v4443_v5 = vadd.f32 %v4442_v33, %v4441_v58 }
 0x5e5   : > { %5134 = vrcp.f32 %v2627_v28  ;;  %v2628_v51 = vadd.f32 1.0, %v5129_v43 }
 0x5e6   : > { %5136 = vtanh.f32 %v6386_v30  ;;  %v4182_v35 = vmul.f32 -1.442695, %v2533_v26  ;;  %v2536_v61 = vadd.f32 %v4443_v5, %v6551_v3 }
 0x5e7   : > { %5138 = vrcp.f32 %v2628_v51 }
 0x5e8   : > { %5140 = vpow2.f32 %v4182_v35  ;;  %v4183_v9 = vmul.f32 -1.442695, %v2536_v61  ;;  %v4444_v59 = vpop.f32.mrb[108].mxu0 }
 0x5e9   : > { %5142 = vtanh.f32 %v6395_v25  ;;  %v4445_v60 = vpop.f32.mrb[109].mxu0 }
 0x5ea   : > { %v5131_v16 = vpop.eup %5130  ;;  %5144 = vpow2.f32 %v4183_v9  ;;  %v4446_v21 = vadd.f32 %v4445_v60, %v4444_v59  ;;  %v4447_v34 = vpop.f32.mrb[110].mxu0 }
 0x5eb   : > { %v2629_v2 = vadd.f32 1.0, %v5131_v16  ;;  %v4448_v12 = vpop.f32.mrb[111].mxu0 }
 0x5ec   : > { %v5133_v47 = vpop.eup %5132  ;;  %v2541_v42 = vadd.f32 %v4446_v21, %v6551_v3  ;;  %v4449_v30 = vadd.f32 %v4448_v12, %v4447_v34 }
 0x5ed   : > { %5146 = vrcp.f32 %v2629_v2  ;;  %v2630_v50 = vadd.f32 1.0, %v5133_v47 }
 0x5ee   : > { %5148 = vtanh.f32 %v6383_v17  ;;  %v4184_v45 = vmul.f32 -1.442695, %v2541_v42  ;;  %v2544_v22 = vadd.f32 %v4449_v30, %v6551_v3 }
 0x5ef   : > { %v5135_v44 = vpop.eup %5134  ;;  %5150 = vrcp.f32 %v2630_v50 }
 0x5f0   : > { %v5137_v25 = vpop.eup %5136  ;;  %v2675_v4 = vmul.f32 %v5135_v44, %v5672_v10  ;;  %5152 = vpow2.f32 %v4184_v45  ;;  %v4185_v63 = vmul.f32 -1.442695, %v2544_v22  ;;  %v4450_v24 = vpop.f32.mrb[112].mxu0 }
 0x5f1   : > { %v5139_v58 = vpop.eup %5138  ;;  %5154 = vtanh.f32 %v6391_v55  ;;  %v4451_v28 = vpop.f32.mrb[113].mxu0 }
 0x5f2   : > { %v5141_v33 = vpop.eup %5140  ;;  %v2707_v43 = vmul.f32 %v5137_v25, %v2675_v4  ;;  %v2723_v26 = vsub.f32 1.0, %v2675_v4  ;;  %v2676_v17 = vmul.f32 %v5139_v58, %v5681_v19  ;;  %5156 = vpow2.f32 %v4185_v63  ;;  %v4453_v5 = vpop.f32.mrb[114].mxu0 }
 0x5f3   : > { %v5143_v51 = vpop.eup %5142  ;;  %v2631_v35 = vadd.f32 1.0, %v5141_v33  ;;  %v4452_v61 = vadd.f32 %v4451_v28, %v4450_v24  ;;  %v4454_v9 = vpop.f32.mrb[115].mxu0 }
 0x5f4   : > { %v5145_v59 = vpop.eup %5144  ;;  %v2739_v60 = vmul.f32 %v2723_v26, %v6052_v49  ;;  %v2708_v16 = vmul.f32 %v5143_v51, %v2676_v17  ;;  %v2724_v21 = vsub.f32 1.0, %v2676_v17  ;;  %v4455_v34 = vadd.f32 %v4454_v9, %v4453_v5 }
 0x5f5   : > { %5158 = vrcp.f32 %v2631_v35  ;;  %v2632_v55 = vadd.f32 1.0, %v5145_v59  ;;  %v2549_v2 = vadd.f32 %v4452_v61, %v6551_v3 }
 0x5f6   : > { %5160 = vtanh.f32 %v6411_v48  ;;  %v6570_v12 = vadd.f32 %v2739_v60, %v2707_v43  ;;  %v2740_v47 = vmul.f32 %v2724_v21, %v6057_v13  ;;  %v2552_v42 = vadd.f32 %v4455_v34, %v6551_v3  ;;  %v7191_v21 = vld [vmem:[#allocation8_spill] sm:$0xff] }
 0x5f7   : > { %v5147_v30 = vpop.eup %5146  ;;  %5162 = vrcp.f32 %v2632_v55  ;;  %v4186_v50 = vmul.f32 -1.442695, %v2549_v2 }
 0x5f8   : > { %v5149_v45 = vpop.eup %5148  ;;  %5164 = vtanh.f32 %v6416_v7  ;;  %v6575_v49 = vadd.f32 %v2740_v47, %v2708_v16  ;;  %v2677_v22 = vmul.f32 %v5147_v30, %v5686_v23  ;;  %v4187_v44 = vmul.f32 -1.442695, %v2552_v42  ;;  %v4456_v25 = vpop.f32.mrb[116].mxu0 }
 0x5f9   : > { %v5151_v4 = vpop.eup %5150  ;;  %5166 = vpow2.f32 %v4186_v50  ;;  %v4457_v48 = vpop.f32.mrb[117].mxu0 }
 0x5fa   : > { %v5153_v63 = vpop.eup %5152  ;;  %v2709_v24 = vmul.f32 %v5149_v45, %v2677_v22  ;;  %v2725_v13 = vsub.f32 1.0, %v2677_v22  ;;  %v2678_v58 = vmul.f32 %v5151_v4, %v5695_v37  ;;  %5168 = vpow2.f32 %v4187_v44  ;;  %v4459_v28 = vpop.f32.mrb[118].mxu0 }
 0x5fb   : > { %v5155_v33 = vpop.eup %5154  ;;  %v2633_v43 = vadd.f32 1.0, %v5153_v63  ;;  %v4458_v26 = vadd.f32 %v4457_v48, %v4456_v25  ;;  %v4460_v7 = vpop.f32.mrb[119].mxu0  ;;  %v6581_v17 = vpack.c.bf16 %v6575_v49, %v6570_v12 }
 0x5fc   : > { %v5157_v5 = vpop.eup %5156  ;;  %v2741_v51 = vmul.f32 %v2725_v13, %v6070_v32  ;;  %v2710_v35 = vmul.f32 %v5155_v33, %v2678_v58  ;;  %v2726_v61 = vsub.f32 1.0, %v2678_v58  ;;  %v4461_v9 = vadd.f32 %v4460_v7, %v4459_v28  ;;  %v7193_v33 = vld [vmem:[#allocation9_spill] sm:$0xff] }
 0x5fd   : > { %5170 = vrcp.f32 %v2633_v43  ;;  %v2634_v59 = vadd.f32 1.0, %v5157_v5  ;;  %v2557_v60 = vadd.f32 %v4458_v26, %v6551_v3  ;;  %3021 = vmatmul.mubr.bf16.vlgmr.msra.gmra.mrb[64].mxu1 %v6581_v17  ;;  %4754 = vmatprep.mubr.bf16.mxu0 %v6581_v17 }
 0x5fe   : > { %5172 = vtanh.f32 %v6407_v62  ;;  %v6588_v16 = vadd.f32 %v2741_v51, %v2709_v24  ;;  %v2742_v34 = vmul.f32 %v2726_v61, %v7191_v21  ;;  %v2560_v55 = vadd.f32 %v4461_v9, %v6551_v3  ;;  %3030 = vmatprep.mubr.bf16.mxu1 %v7190_v31 }
 0x5ff   : > { %v5159_v32 = vpop.eup %5158  ;;  %5174 = vrcp.f32 %v2634_v59  ;;  %v4188_v2 = vmul.f32 -1.442695, %v2557_v60  ;;  %v7195_v59 = vld [vmem:[#allocation10_spill] sm:$0xff] }
 0x600   : > { %v5161_v47 = vpop.eup %5160  ;;  %5176 = vtanh.f32 %v6414_v39  ;;  %v6594_v42 = vadd.f32 %v2742_v34, %v2710_v35  ;;  %v2679_v30 = vmul.f32 %v5159_v32, %v5705_v54  ;;  %v4189_v50 = vmul.f32 -1.442695, %v2560_v55  ;;  %v4462_v62 = vpop.f32.mrb[120].mxu0 }
 0x601   : > { %v5163_v45 = vpop.eup %5162  ;;  %5178 = vpow2.f32 %v4188_v2  ;;  %v4463_v22 = vpop.f32.mrb[121].mxu0 }
 0x602   : > { %7192 = vst [vmem:[#allocation8_spill] sm:$0xff] %v6594_v42  ;;  %v5165_v44 = vpop.eup %5164  ;;  %v2711_v25 = vmul.f32 %v5161_v47, %v2679_v30  ;;  %v2727_v4 = vsub.f32 1.0, %v2679_v30  ;;  %v2680_v48 = vmul.f32 %v5163_v45, %v5707_v56  ;;  %5180 = vpow2.f32 %v4189_v50  ;;  %v4465_v63 = vpop.f32.mrb[122].mxu0 }
 0x603   : > { %v5167_v24 = vpop.eup %5166  ;;  %v4464_v13 = vadd.f32 %v4463_v22, %v4462_v62  ;;  %v4466_v58 = vpop.f32.mrb[123].mxu0  ;;  %v6600_v39 = vpack.c.bf16 %v6594_v42, %v6588_v16  ;;  %5182 = vtanh.f32 %v6438_v53 }
 0x604   : > { %v5169_v28 = vpop.eup %5168  ;;  %v2743_v43 = vmul.f32 %v2727_v4, %v7193_v33  ;;  %v2712_v26 = vmul.f32 %v5165_v44, %v2680_v48  ;;  %v2728_v7 = vsub.f32 1.0, %v2680_v48  ;;  %v2635_v5 = vadd.f32 1.0, %v5167_v24 }
 0x605   : > { %v2636_v51 = vadd.f32 1.0, %v5169_v28  ;;  %v2565_v35 = vadd.f32 %v4464_v13, %v6551_v3  ;;  %v4467_v61 = vadd.f32 %v4466_v58, %v4465_v63  ;;  %3031 = vmatmul.mubr.bf16.gmra.mrb[68].mxu1 %v6600_v39  ;;  %4755 = vmatmul.mubr.bf16.vlgmr.msra.gmra.mrb[128].mxu0 %v6600_v39  ;;  %v7197_v58 = vld [vmem:[#allocation11_spill] sm:$0xff] }
 0x606   : > { %v6607_v9 = vadd.f32 %v2743_v43, %v2711_v25  ;;  %v2744_v60 = vmul.f32 %v2728_v7, %v7195_v59  ;;  %5184 = vrcp.f32 %v2635_v5  ;;  %3040 = vmatprep.mubr.bf16.mxu1 %v7190_v31 }
 0x607   : > { %v5171_v21 = vpop.eup %5170  ;;  %5186 = vrcp.f32 %v2636_v51  ;;  %v4190_v34 = vmul.f32 -1.442695, %v2565_v35  ;;  %v2568_v53 = vadd.f32 %v4467_v61, %v6551_v3  ;;  %v7199_v61 = vld [vmem:[#allocation12_spill] sm:$0xff] }
 0x608   : > { %7194 = vst [vmem:[#allocation9_spill] sm:$0xff] %v6607_v9  ;;  %v5173_v55 = vpop.eup %5172  ;;  %5188 = vtanh.f32 %v6447_v27  ;;  %v6613_v32 = vadd.f32 %v2744_v60, %v2712_v26  ;;  %v2681_v2 = vmul.f32 %v5171_v21, %v5717_v18  ;;  %v4468_v47 = vpop.f32.mrb[124].mxu0 }
 0x609   : > { %v5175_v30 = vpop.eup %5174  ;;  %5190 = vpow2.f32 %v4190_v34  ;;  %v4191_v50 = vmul.f32 -1.442695, %v2568_v53  ;;  %v4469_v62 = vpop.f32.mrb[125].mxu0 }
 0x60a   : > { %7196 = vst [vmem:[#allocation10_spill] sm:$0xff] %v6613_v32  ;;  %v5177_v45 = vpop.eup %5176  ;;  %v2713_v22 = vmul.f32 %v5173_v55, %v2681_v2  ;;  %v2729_v44 = vsub.f32 1.0, %v2681_v2  ;;  %v2682_v25 = vmul.f32 %v5175_v30, %v5719_v20  ;;  %v4470_v4 = vadd.f32 %v4469_v62, %v4468_v47  ;;  %v4471_v48 = vpop.f32.mrb[126].mxu0 }
 0x60b   : > { %v5179_v63 = vpop.eup %5178  ;;  %5192 = vpow2.f32 %v4191_v50  ;;  %v4472_v24 = vpop.f32.mrb[127].mxu0  ;;  %v6619_v27 = vpack.c.bf16 %v6613_v32, %v6607_v9 }
 0x60c   : > { %v5181_v13 = vpop.eup %5180  ;;  %v2745_v28 = vmul.f32 %v2729_v44, %v7197_v58  ;;  %v2714_v33 = vmul.f32 %v5177_v45, %v2682_v25  ;;  %v2730_v43 = vsub.f32 1.0, %v2682_v25  ;;  %v2637_v26 = vadd.f32 1.0, %v5179_v63 }
 0x60d   : > { %5194 = vtanh.f32 %v6434_v11  ;;  %v2638_v7 = vadd.f32 1.0, %v5181_v13  ;;  %v2573_v5 = vadd.f32 %v4470_v4, %v6551_v3  ;;  %v4473_v51 = vadd.f32 %v4472_v24, %v4471_v48  ;;  %3041 = vmatmul.mubr.bf16.gmra.mrb[72].mxu1 %v6619_v27  ;;  %4758 = vmatprep.mubr.bf16.mxu0 %v6619_v27  ;;  %v5183_v60 = vpop.eup %5182  ;;  %v7201_v48 = vld [vmem:[#allocation13_spill] sm:$0xff]  ;;  %v7202_v24 = vld [vmem:[#allocation14_spill] sm:$0xff] }
 0x60e   : > { %v6626_v35 = vadd.f32 %v2745_v28, %v2713_v22  ;;  %v2746_v59 = vmul.f32 %v2730_v43, %v7199_v61  ;;  %5196 = vrcp.f32 %v2637_v26  ;;  %3050 = vmatprep.mubr.bf16.mxu1 %v7190_v31 }
 0x60f   : > { %5198 = vrcp.f32 %v2638_v7  ;;  %v4192_v21 = vmul.f32 -1.442695, %v2573_v5  ;;  %v2576_v11 = vadd.f32 %v4473_v51, %v6551_v3 }
 0x610   : > { %7198 = vst [vmem:[#allocation11_spill] sm:$0xff] %v6626_v35  ;;  %v5185_v34 = vpop.eup %5184  ;;  %5200 = vtanh.f32 %v6443_v0  ;;  %v6632_v53 = vadd.f32 %v2746_v59, %v2714_v33 }
 0x611   : > { %v5187_v55 = vpop.eup %5186  ;;  %v2683_v2 = vmul.f32 %v5185_v34, %v5730_v40  ;;  %5202 = vpow2.f32 %v4192_v21  ;;  %v4193_v47 = vmul.f32 -1.442695, %v2576_v11 }
 0x612   : > { %7200 = vst [vmem:[#allocation12_spill] sm:$0xff] %v6632_v53  ;;  %v5189_v30 = vpop.eup %5188  ;;  %v2684_v50 = vmul.f32 %v5187_v55, %v5732_v41  ;;  %v6638_v62 = vpack.c.bf16 %v6632_v53, %v6626_v35 }
 0x613   : > { %v5191_v45 = vpop.eup %5190  ;;  %v2715_v22 = vmul.f32 %v5183_v60, %v2683_v2  ;;  %v2731_v3 = vsub.f32 1.0, %v2683_v2  ;;  %5204 = vpow2.f32 %v4193_v47  ;;  %v7205_v47 = vld [vmem:[#allocation15_spill] sm:$0xff] }
 0x614   : > { %v2716_v44 = vmul.f32 %v5189_v30, %v2684_v50  ;;  %v2732_v0 = vsub.f32 1.0, %v2684_v50  ;;  %v2639_v25 = vadd.f32 1.0, %v5191_v45  ;;  %4759 = vmatmul.mubr.bf16.gmra.mrb[132].mxu0 %v6638_v62 }
 0x615   : > { %v5193_v4 = vpop.eup %5192  ;;  %v2747_v63 = vmul.f32 %v2731_v3, %v7201_v48  ;;  %3051 = vmatmul.mubr.bf16.gmra.mrb[76].mxu1 %v6638_v62 }
 0x616   : > { %v2748_v13 = vmul.f32 %v2732_v0, %v7202_v24  ;;  %5206 = vrcp.f32 %v2639_v25  ;;  %v2640_v58 = vadd.f32 1.0, %v5193_v4  ;;  %3060 = vmatprep.mubr.bf16.mxu1 %v7190_v31 }
 0x617   : > { %v5195_v28 = vpop.eup %5194  ;;  %5208 = vtanh.f32 %v6463_v57  ;;  %v6646_v33 = vadd.f32 %v2747_v63, %v2715_v22 }
 0x618   : > { %v5197_v43 = vpop.eup %5196  ;;  %v6648_v26 = vadd.f32 %v2748_v13, %v2716_v44  ;;  %5210 = vrcp.f32 %v2640_v58  ;;  %v7209_v58 = vld [vmem:[#allocation17_spill] sm:$0xff] }
 0x619   : > { %7203 = vst [vmem:[#allocation13_spill] sm:$0xff] %v6646_v33  ;;  %v5199_v7 = vpop.eup %5198  ;;  %v2685_v5 = vmul.f32 %v5197_v43, %v5745_v1  ;;  %5212 = vtanh.f32 %v6468_v52  ;;  %v7206_v52 = vld [vmem:[#allocation16_spill] sm:$0xff] }
 0x61a   : > { %7204 = vst [vmem:[#allocation14_spill] sm:$0xff] %v6648_v26  ;;  %v5201_v51 = vpop.eup %5200  ;;  %v2686_v61 = vmul.f32 %v5199_v7, %v5747_v29  ;;  %v6655_v59 = vpack.c.bf16 %v6648_v26, %v6646_v33 }
 0x61b   : > { %v5203_v60 = vpop.eup %5202  ;;  %v2717_v57 = vmul.f32 %v5195_v28, %v2685_v5  ;;  %v2733_v21 = vsub.f32 1.0, %v2685_v5  ;;  %v7211_v5 = vld [vmem:[#allocation18_spill] sm:$0xff] }
 0x61c   : > { %v2718_v11 = vmul.f32 %v5201_v51, %v2686_v61  ;;  %v2734_v34 = vsub.f32 1.0, %v2686_v61  ;;  %v2641_v55 = vadd.f32 1.0, %v5203_v60  ;;  %4762 = vmatprep.mubr.bf16.mxu0 %v6655_v59 }
 0x61d   : > { %v5205_v2 = vpop.eup %5204  ;;  %v2749_v30 = vmul.f32 %v2733_v21, %v7205_v47  ;;  %3061 = vmatmul.mubr.bf16.gmra.mrb[80].mxu1 %v6655_v59 }
 0x61e   : > { %v2750_v50 = vmul.f32 %v2734_v34, %v7206_v52  ;;  %5214 = vrcp.f32 %v2641_v55  ;;  %v2642_v45 = vadd.f32 1.0, %v5205_v2  ;;  %3070 = vmatprep.mubr.bf16.mxu1 %v7190_v31  ;;  %v7213_v52 = vld [vmem:[#allocation19_spill] sm:$0xff] }
 0x61f   : > { %5216 = vtanh.f32 %v6459_v6  ;;  %v6663_v22 = vadd.f32 %v2749_v30, %v2717_v57 }
 0x620   : > { %v5207_v3 = vpop.eup %5206  ;;  %v6665_v44 = vadd.f32 %v2750_v50, %v2718_v11  ;;  %5218 = vrcp.f32 %v2642_v45 }
 0x621   : > { %7207 = vst [vmem:[#allocation15_spill] sm:$0xff] %v6663_v22  ;;  %v5209_v0 = vpop.eup %5208  ;;  %v2687_v25 = vmul.f32 %v5207_v3, %v5770_v36  ;;  %5220 = vtanh.f32 %v6466_v8 }
 0x622   : > { %7208 = vst [vmem:[#allocation16_spill] sm:$0xff] %v6665_v44  ;;  %v5211_v4 = vpop.eup %5210  ;;  %v6671_v48 = vpack.c.bf16 %v6665_v44, %v6663_v22 }
 0x623   : > { %v2719_v63 = vmul.f32 %v5209_v0, %v2687_v25  ;;  %v2735_v24 = vsub.f32 1.0, %v2687_v25  ;;  %v2688_v6 = vmul.f32 %v5211_v4, %v5772_v38  ;;  %v5213_v13 = vpop.eup %5212  ;;  %v7215_v25 = vld [vmem:[#allocation20_spill] sm:$0xff] }
 0x624   : > { %4763 = vmatmul.mubr.bf16.gmra.mrb[136].mxu0 %v6671_v48 }
 0x625   : > { %v2751_v28 = vmul.f32 %v2735_v24, %v7209_v58  ;;  %v2720_v43 = vmul.f32 %v5213_v13, %v2688_v6  ;;  %v2736_v7 = vsub.f32 1.0, %v2688_v6  ;;  %3071 = vmatmul.mubr.bf16.gmra.mrb[84].mxu1 %v6671_v48  ;;  %v5006_v6 = vld [vmem:[%s5651_s19] sm:$0xff]  }
 0x626   : > { %3080 = vmatprep.mubr.bf16.mxu1 %v7190_v31  ;;  %v5010_v13 = vld [vmem:[%s5651_s19 + $0x20] sm:$0xff]  }
 0x627   : > { %v6678_v8 = vadd.f32 %v2751_v28, %v2719_v63  ;;  %v2752_v51 = vmul.f32 %v2736_v7, %v7211_v5  ;;  %v7217_v58 = vld [vmem:[#allocation6_spill] sm:$0xff] }
 0x628   : > { %v5215_v61 = vpop.eup %5214 }
 0x629   : > { %7210 = vst [vmem:[#allocation17_spill] sm:$0xff] %v6678_v8  ;;  %v5217_v60 = vpop.eup %5216  ;;  %v6681_v57 = vadd.f32 %v2752_v51, %v2720_v43  ;;  %v2689_v21 = vmul.f32 %v5215_v61, %v5795_v46  ;;  %v7218_v43 = vld [vmem:[#allocation7_spill] sm:$0xff] }
 0x62a   : > { %v5219_v11 = vpop.eup %5218 }
 0x62b   : > { %7212 = vst [vmem:[#allocation18_spill] sm:$0xff] %v6681_v57  ;;  %v2721_v34 = vmul.f32 %v5217_v60, %v2689_v21  ;;  %v2737_v55 = vsub.f32 1.0, %v2689_v21  ;;  %v2690_v2 = vmul.f32 %v5219_v11, %v5797_v15  ;;  %v6687_v47 = vpack.c.bf16 %v6681_v57, %v6678_v8  ;;  %v5221_v30 = vpop.eup %5220 }
 0x62d   : > { %v2753_v50 = vmul.f32 %v2737_v55, %v7213_v52  ;;  %v2722_v45 = vmul.f32 %v5221_v30, %v2690_v2  ;;  %v2738_v3 = vsub.f32 1.0, %v2690_v2  ;;  %3081 = vmatmul.mubr.bf16.gmra.mrb[88].mxu1 %v6687_v47  ;;  %4766 = vmatprep.mubr.bf16.mxu0 %v6687_v47 }
 0x62e   : > { %3090 = vmatprep.mubr.bf16.mxu1 %v7190_v31  ;;  %v6709_v31 = vld [vmem:[%s7139_s4] sm:$0x7] }
 0x62f   : > { %v6693_v0 = vadd.f32 %v2753_v50, %v2721_v34  ;;  %v2754_v4 = vmul.f32 %v2738_v3, %v7215_v25  ;;  %v6713_v28 = vrot.slane %v6709_v31, %v7217_v58  ;;  %v6717_v7 = vrot.slane %v6709_v31, %v7218_v43 }
 0x631   : > { %7214 = vst [vmem:[#allocation19_spill] sm:$0xff] %v6693_v0  ;;  %v6696_v63 = vadd.f32 %v2754_v4, %v2722_v45 }
 0x633   : > { %7216 = vst [vmem:[#allocation20_spill] sm:$0xff] %v6696_v63  ;;  %v6700_v24 = vpack.c.bf16 %v6696_v63, %v6693_v0 }
 0x635   : > { %3091 = vmatmul.mubr.bf16.gmra.mrb[92].mxu1 %v6700_v24  ;;  %4767 = vmatmul.mubr.bf16.gmra.mrb[140].mxu0 %v6700_v24 }
 0x636   : > { %4786 = vmatprep.mubr.bf16.mxu1 %v5006_v6  ;;  %4810 = vmatprep.mubr.bf16.mxu0 %v5010_v13 }
 0x6d0   : > { %v3022_v5 = vpop.f32.mrb[64].mxu1 }
 0x6d1   : > { %v3023_v51 = vadd.f32 %v3022_v5, %v6713_v28  ;;  %v3024_v61 = vpop.f32.mrb[65].mxu1 }
 0x6d2   : > { %v3025_v60 = vadd.f32 %v3024_v61, %v6717_v7  ;;  %v3026_v21 = vpop.f32.mrb[66].mxu1 }
 0x6d3   : > { %v3027_v11 = vadd.f32 %v3026_v21, %v6713_v28  ;;  %v3028_v34 = vpop.f32.mrb[67].mxu1  ;;  %v3198_v2 = vmul.f32 %v3023_v51, %v5672_v10 }
 0x6d4   : > { %v3029_v55 = vadd.f32 %v3028_v34, %v6717_v7  ;;  %v3199_v52 = vmul.f32 %v3025_v60, %v5672_v10 }
 0x6d5   : > { %v3201_v30 = vmul.f32 %v3027_v11, %v5681_v19 }
 0x6d6   : > { %v3202_v50 = vmul.f32 %v3029_v55, %v5681_v19 }
 0x6d7   : > { %v3246_v45 = vpack.c.bf16 %v3201_v30, %v3198_v2 }
 0x6d8   : > { %v3032_v3 = vpop.f32.mrb[68].mxu1  ;;  %v6727_v25 = vpop.f32.mrb[128].mxu0  ;;  %v6729_v4 = vpack.c.bf16 %v3202_v50, %v3199_v52 }
 0x6d9   : > { %v3033_v6 = vadd.f32 %v3032_v3, %v6713_v28  ;;  %v3034_v13 = vpop.f32.mrb[69].mxu1  ;;  %v6732_v58 = vpop.f32.mrb[129].mxu0  ;;  %4770 = vmatprep.subr.bf16.mxu1 %v3246_v45 }
 0x6da   : > { %v3035_v43 = vadd.f32 %v3034_v13, %v6717_v7  ;;  %v3036_v5 = vpop.f32.mrb[70].mxu1  ;;  %v6735_v51 = vpop.f32.mrb[130].mxu0  ;;  %4771 = vmatpush3.bf16.msra.mxu1 %v3246_v45 }
 0x6db   : > { %v3037_v61 = vadd.f32 %v3036_v5, %v6713_v28  ;;  %v3038_v60 = vpop.f32.mrb[71].mxu1  ;;  %v6738_v21 = vpop.f32.mrb[131].mxu0  ;;  %v3204_v34 = vmul.f32 %v3033_v6, %v5686_v23 }
 0x6dc   : > { %v3039_v11 = vadd.f32 %v3038_v60, %v6717_v7  ;;  %v3205_v2 = vmul.f32 %v3035_v43, %v5686_v23 }
 0x6dd   : > { %v3207_v55 = vmul.f32 %v3037_v61, %v5695_v37 }
 0x6de   : > { %v3208_v30 = vmul.f32 %v3039_v11, %v5695_v37 }
 0x6df   : > { %v3247_v52 = vpack.c.bf16 %v3207_v55, %v3204_v34 }
 0x6e0   : > { %v3042_v50 = vpop.f32.mrb[72].mxu1  ;;  %v6745_v3 = vpack.c.bf16 %v3208_v30, %v3205_v2 }
 0x6e1   : > { %v3043_v45 = vadd.f32 %v3042_v50, %v6713_v28  ;;  %v3044_v13 = vpop.f32.mrb[73].mxu1  ;;  %4772 = vmatprep.subr.bf16.mxu1 %v3247_v52 }
 0x6e2   : > { %v3045_v5 = vadd.f32 %v3044_v13, %v6717_v7  ;;  %v3046_v63 = vpop.f32.mrb[74].mxu1  ;;  %4773 = vmatpush3.bf16.msra.mxu1 %v3247_v52 }
 0x6e3   : > { %v3047_v6 = vadd.f32 %v3046_v63, %v6713_v28  ;;  %v3048_v60 = vpop.f32.mrb[75].mxu1  ;;  %v3210_v43 = vmul.f32 %v3043_v45, %v5705_v54 }
 0x6e4   : > { %v3049_v61 = vadd.f32 %v3048_v60, %v6717_v7  ;;  %v3211_v34 = vmul.f32 %v3045_v5, %v5705_v54 }
 0x6e5   : > { %v3213_v11 = vmul.f32 %v3047_v6, %v5707_v56 }
 0x6e6   : > { %v3214_v55 = vmul.f32 %v3049_v61, %v5707_v56 }
 0x6e7   : > { %v6755_v2 = vpop.f32.mrb[132].mxu0  ;;  %v3248_v30 = vpack.c.bf16 %v3213_v11, %v3210_v43 }
 0x6e8   : > { %v3052_v50 = vpop.f32.mrb[76].mxu1  ;;  %v6757_v13 = vpop.f32.mrb[133].mxu0  ;;  %v3256_v52 = vpack.c.bf16 %v3214_v55, %v3211_v34 }
 0x6e9   : > { %v3053_v63 = vadd.f32 %v3052_v50, %v6713_v28  ;;  %v3054_v0 = vpop.f32.mrb[77].mxu1  ;;  %4774 = vmatprep.subr.bf16.mxu1 %v3248_v30  ;;  %v6760_v60 = vpop.f32.mrb[134].mxu0 }
 0x6ea   : > { %v3055_v45 = vadd.f32 %v3054_v0, %v6717_v7  ;;  %v3056_v6 = vpop.f32.mrb[78].mxu1  ;;  %4775 = vmatpush3.bf16.msra.mxu1 %v3248_v30  ;;  %v6763_v5 = vpop.f32.mrb[135].mxu0 }
 0x6eb   : > { %v3057_v61 = vadd.f32 %v3056_v6, %v6713_v28  ;;  %v3058_v57 = vpop.f32.mrb[79].mxu1  ;;  %v3216_v11 = vmul.f32 %v3053_v63, %v5717_v18 }
 0x6ec   : > { %v3059_v43 = vadd.f32 %v3058_v57, %v6717_v7  ;;  %v3217_v55 = vmul.f32 %v3055_v45, %v5717_v18 }
 0x6ed   : > { %v3219_v34 = vmul.f32 %v3057_v61, %v5719_v20 }
 0x6ee   : > { %v3220_v50 = vmul.f32 %v3059_v43, %v5719_v20 }
 0x6ef   : > { %v3249_v8 = vpack.c.bf16 %v3219_v34, %v3216_v11 }
 0x6f0   : > { %v3062_v44 = vpop.f32.mrb[80].mxu1  ;;  %v3257_v0 = vpack.c.bf16 %v3220_v50, %v3217_v55 }
 0x6f1   : > { %v3063_v30 = vadd.f32 %v3062_v44, %v6713_v28  ;;  %v3064_v22 = vpop.f32.mrb[81].mxu1  ;;  %4776 = vmatprep.subr.bf16.mxu1 %v3249_v8 }
 0x6f2   : > { %v3065_v6 = vadd.f32 %v3064_v22, %v6717_v7  ;;  %v3066_v26 = vpop.f32.mrb[82].mxu1  ;;  %4777 = vmatpush3.bf16.msra.mxu1 %v3249_v8 }
 0x6f3   : > { %v3067_v57 = vadd.f32 %v3066_v26, %v6713_v28  ;;  %v3068_v63 = vpop.f32.mrb[83].mxu1  ;;  %4778 = vmatprep.subr.bf16.mxu1 %v6729_v4  ;;  %v3222_v61 = vmul.f32 %v3063_v30, %v5730_v40 }
 0x6f4   : > { %v3069_v45 = vadd.f32 %v3068_v63, %v6717_v7  ;;  %v3223_v11 = vmul.f32 %v3065_v6, %v5730_v40 }
 0x6f5   : > { %v3225_v43 = vmul.f32 %v3067_v57, %v5732_v41 }
 0x6f6   : > { %v3226_v44 = vmul.f32 %v3069_v45, %v5732_v41  ;;  %4779 = vmatpush3.bf16.msra.mxu1 %v6729_v4 }
 0x6f7   : > { %4780 = vmatprep.subr.bf16.mxu1 %v6745_v3  ;;  %v6782_v22 = vpop.f32.mrb[136].mxu0  ;;  %v3262_v26 = vpack.c.bf16 %v3225_v43, %v3222_v61 }
 0x6f8   : > { %v3072_v8 = vpop.f32.mrb[84].mxu1  ;;  %v6784_v34 = vpop.f32.mrb[137].mxu0  ;;  %v6786_v55 = vpack.c.bf16 %v3226_v44, %v3223_v11 }
 0x6f9   : > { %v3073_v50 = vadd.f32 %v3072_v8, %v6713_v28  ;;  %v3074_v30 = vpop.f32.mrb[85].mxu1  ;;  %4794 = vmatprep.subr.bf16.mxu0 %v3262_v26  ;;  %v6789_v57 = vpop.f32.mrb[138].mxu0 }
 0x6fa   : > { %v3075_v6 = vadd.f32 %v3074_v30, %v6717_v7  ;;  %v3076_v63 = vpop.f32.mrb[86].mxu1  ;;  %4781 = vmatpush3.bf16.msra.mxu1 %v6745_v3  ;;  %4795 = vmatpush3.bf16.msra.mxu0 %v3262_v26  ;;  %v6793_v4 = vpop.f32.mrb[139].mxu0  ;;  %v5014_v26 = vld [vmem:[%s7140_s5 + $0x40] sm:$0xff]  }
 0x6fb   : > { %v3077_v45 = vadd.f32 %v3076_v63, %v6713_v28  ;;  %v3078_v61 = vpop.f32.mrb[87].mxu1  ;;  %4782 = vmatprep.subr.bf16.mxu1 %v3256_v52  ;;  %v3228_v11 = vmul.f32 %v3073_v50, %v5745_v1 }
 0x6fc   : > { %v3079_v43 = vadd.f32 %v3078_v61, %v6717_v7  ;;  %v3229_v8 = vmul.f32 %v3075_v6, %v5745_v1 }
 0x6fd   : > { %v3231_v44 = vmul.f32 %v3077_v45, %v5747_v29  ;;  %v5007_v45 = vld [vmem:[%s5651_s19 + $0x8] sm:$0xff]  }
 0x6fe   : > { %v3232_v30 = vmul.f32 %v3079_v43, %v5747_v29  ;;  %4783 = vmatpush3.bf16.msra.mxu1 %v3256_v52  ;;  %v5008_v52 = vld [vmem:[%s5651_s19 + $0x10] sm:$0xff]   ;;  %v5015_v43 = vld [vmem:[%s7140_s5] sm:$0xff]  }
 0x6ff   : > { %4784 = vmatprep.subr.bf16.mxu1 %v3257_v0  ;;  %v3263_v3 = vpack.c.bf16 %v3231_v44, %v3228_v11 }
 0x700   : > { %v3082_v63 = vpop.f32.mrb[88].mxu1  ;;  %v6804_v33 = vpack.c.bf16 %v3232_v30, %v3229_v8  ;;  %v5016_v8 = vld [vmem:[%s7140_s5 + $0x48] sm:$0xff]  }
 0x701   : > { %v3083_v61 = vadd.f32 %v3082_v63, %v6713_v28  ;;  %v3084_v50 = vpop.f32.mrb[89].mxu1  ;;  %4796 = vmatprep.subr.bf16.mxu0 %v3263_v3 }
 0x702   : > { %v3085_v6 = vadd.f32 %v3084_v50, %v6717_v7  ;;  %v3086_v53 = vpop.f32.mrb[90].mxu1  ;;  %4785 = vmatpush3.bf16.msra.mxu1 %v3257_v0  ;;  %4797 = vmatpush3.bf16.msra.mxu0 %v3263_v3 }
 0x703   : > { %v3087_v11 = vadd.f32 %v3086_v53, %v6713_v28  ;;  %v3088_v44 = vpop.f32.mrb[91].mxu1  ;;  %4514 = vmatprep.subr.bf16.mxu1 %v5014_v26  ;;  %v3234_v63 = vmul.f32 %v3083_v61, %v5770_v36  ;;  %v5017_v53 = vld [vmem:[%s7140_s5 + $0x8] sm:$0xff]   ;;  %v5018_v61 = vld [vmem:[%s7140_s5 + $0x50] sm:$0xff]  }
 0x704   : > { %v3089_v30 = vadd.f32 %v3088_v44, %v6717_v7  ;;  %v3235_v3 = vmul.f32 %v3085_v6, %v5770_v36 }
 0x705   : > { %v3237_v0 = vmul.f32 %v3087_v11, %v5772_v38  ;;  %4787 = vmatmul.mubr.bf16.vlgmr.msra.gmra.mrb[96].mxu1 %v5007_v45 }
 0x706   : > { %v3238_v50 = vmul.f32 %v3089_v30, %v5772_v38  ;;  %4790 = vmatprep.mubr.bf16.mxu1 %v5008_v52  ;;  %4515 = vmatpush3.bf16.msra.mxu1 %v5015_v43  ;;  %v5009_v52 = vld [vmem:[%s5651_s19 + $0x18] sm:$0xff]  }
 0x707   : > { %v3264_v26 = vpack.c.bf16 %v3237_v0, %v3234_v63  ;;  %4516 = vmatprep.subr.bf16.mxu1 %v5016_v8  ;;  %v5019_v8 = vld [vmem:[%s7140_s5 + $0x10] sm:$0xff]  }
 0x708   : > { %v3092_v44 = vpop.f32.mrb[92].mxu1  ;;  %v6828_v11 = vpop.f32.mrb[140].mxu0  ;;  %v3272_v45 = vpack.c.bf16 %v3238_v50, %v3235_v3 }
 0x709   : > { %v3093_v6 = vadd.f32 %v3092_v44, %v6713_v28  ;;  %v3094_v35 = vpop.f32.mrb[93].mxu1  ;;  %v6831_v30 = vpop.f32.mrb[141].mxu0  ;;  %4798 = vmatprep.subr.bf16.mxu0 %v3264_v26  ;;  %v5020_v44 = vld [vmem:[%s7140_s5 + $0x58] sm:$0xff]  }
 0x70a   : > { %v3095_v43 = vadd.f32 %v3094_v35, %v6717_v7  ;;  %v3096_v32 = vpop.f32.mrb[94].mxu1  ;;  %v6835_v63 = vpop.f32.mrb[142].mxu0  ;;  %4799 = vmatpush3.bf16.msra.mxu0 %v3264_v26  ;;  %4517 = vmatpush3.bf16.msra.mxu1 %v5017_v53 }
 0x70b   : > { %v3097_v0 = vadd.f32 %v3096_v32, %v6713_v28  ;;  %v3098_v3 = vpop.f32.mrb[95].mxu1  ;;  %v6841_v50 = vpop.f32.mrb[143].mxu0  ;;  %4518 = vmatprep.subr.bf16.mxu1 %v5018_v61  ;;  %v3240_v9 = vmul.f32 %v3093_v6, %v5795_v46  ;;  %v5021_v32 = vld [vmem:[%s7140_s5 + $0x18] sm:$0xff]   ;;  %v5011_v6 = vld [vmem:[%s5651_s19 + $0x28] sm:$0xff]  }
 0x70c   : > { %v3099_v35 = vadd.f32 %v3098_v3, %v6717_v7  ;;  %v3241_v26 = vmul.f32 %v3095_v43, %v5795_v46  ;;  %v5022_v7 = vld [vmem:[%s7140_s5 + $0x60] sm:$0xff]   ;;  %v5026_v43 = vld [vmem:[%s7140_s5 + $0x70] sm:$0xff]  }
 0x70d   : > { %v3243_v53 = vmul.f32 %v3097_v0, %v5797_v15  ;;  %4791 = vmatmul.mubr.bf16.gmra.mrb[100].mxu1 %v5009_v52  ;;  %v5012_v52 = vld [vmem:[%s5651_s19 + $0x30] sm:$0xff]   ;;  %v6888_v0 = vrot.slane %v6709_v31, %v5857_v14 }
 0x70e   : > { %v3244_v42 = vmul.f32 %v3099_v35, %v5797_v15  ;;  %3679 = vmatprep.mubr.bf16.mxu1 %v6581_v17  ;;  %4519 = vmatpush3.bf16.msra.mxu1 %v5019_v8  ;;  %v5023_v17 = vld [vmem:[%s7140_s5 + $0x20] sm:$0xff]   ;;  %v5027_v8 = vld [vmem:[%s7140_s5 + $0x30] sm:$0xff]  }
 0x70f   : > { %v3265_v28 = vpack.c.bf16 %v3243_v53, %v3240_v9  ;;  %4520 = vmatprep.subr.bf16.mxu1 %v5020_v44  ;;  %v5024_v9 = vld [vmem:[%s7140_s5 + $0x68] sm:$0xff]   ;;  %v3144_v3 = vadd.f32 %v6727_v25, %v6888_v0  ;;  %v3136_v44 = vadd.f32 %v6732_v58, %v6888_v0  ;;  %v3147_v35 = vadd.f32 %v6735_v51, %v6888_v0 }
 0x710   : > { %v3273_v61 = vpack.c.bf16 %v3244_v42, %v3241_v26  ;;  %v5025_v42 = vld [vmem:[%s7140_s5 + $0x28] sm:$0xff]   ;;  %v3139_v53 = vadd.f32 %v6738_v21, %v6888_v0  ;;  %v3160_v51 = vadd.f32 %v6755_v2, %v6888_v0 }
 0x711   : > { %4800 = vmatprep.subr.bf16.mxu0 %v3265_v28  ;;  %v3206_v26 = vmul.f32 %v3144_v3, %v5686_v23  ;;  %v3209_v31 = vmul.f32 %v3147_v35, %v5695_v37 }
 0x712   : > { %4801 = vmatpush3.bf16.msra.mxu0 %v3265_v28  ;;  %4521 = vmatpush3.bf16.msra.mxu1 %v5021_v32  ;;  %v3200_v28 = vmul.f32 %v3136_v44, %v5672_v10  ;;  %v3203_v58 = vmul.f32 %v3139_v53, %v5681_v19 }
 0x713   : > { %4802 = vmatprep.subr.bf16.mxu0 %v6786_v55  ;;  %4522 = vmatprep.subr.bf16.mxu1 %v5022_v7 }
 0x716   : > { %4803 = vmatpush3.bf16.msra.mxu0 %v6786_v55  ;;  %4523 = vmatpush3.bf16.msra.mxu1 %v5023_v17  ;;  %v5013_v55 = vld [vmem:[%s5651_s19 + $0x38] sm:$0xff]  }
 0x717   : > { %4804 = vmatprep.subr.bf16.mxu0 %v6804_v33  ;;  %4524 = vmatprep.subr.bf16.mxu1 %v5024_v9  ;;  %v3152_v9 = vadd.f32 %v6757_v13, %v6888_v0 }
 0x719   : > { %v3212_v13 = vmul.f32 %v3152_v9, %v5705_v54 }
 0x71a   : > { %4805 = vmatpush3.bf16.msra.mxu0 %v6804_v33  ;;  %4525 = vmatpush3.bf16.msra.mxu1 %v5025_v42  ;;  %v5028_v33 = vld [vmem:[%s7140_s5 + $0x78] sm:$0xff]  }
 0x71b   : > { %4806 = vmatprep.subr.bf16.mxu0 %v3272_v45  ;;  %4526 = vmatprep.subr.bf16.mxu1 %v5026_v43  ;;  %v3218_v43 = vmul.f32 %v3160_v51, %v5717_v18 }
 0x71e   : > { %4807 = vmatpush3.bf16.msra.mxu0 %v3272_v45  ;;  %4527 = vmatpush3.bf16.msra.mxu1 %v5027_v8  ;;  %v5029_v45 = vld [vmem:[%s7140_s5 + $0x38] sm:$0xff]  }
 0x71f   : > { %4808 = vmatprep.subr.bf16.mxu0 %v3273_v61  ;;  %4528 = vmatprep.subr.bf16.mxu1 %v5028_v33 }
 0x722   : > { %4809 = vmatpush3.bf16.msra.mxu0 %v3273_v61  ;;  %4529 = vmatpush3.bf16.msra.mxu1 %v5029_v45 }
 0x725   : > { %4811 = vmatmul.mubr.bf16.vlgmr.msra.gmra.mrb[144].mxu0 %v5011_v6  ;;  %v3163_v6 = vadd.f32 %v6760_v60, %v6888_v0 }
 0x726   : > { %4814 = vmatprep.mubr.bf16.mxu0 %v5012_v52 }
 0x727   : > { %v3221_v60 = vmul.f32 %v3163_v6, %v5719_v20 }
 0x72d   : > { %4815 = vmatmul.mubr.bf16.gmra.mrb[148].mxu0 %v5013_v55  ;;  %v3155_v55 = vadd.f32 %v6763_v5, %v6888_v0 }
 0x72f   : > { %v3215_v5 = vmul.f32 %v3155_v55, %v5707_v56  ;;  %v3184_v55 = vadd.f32 %v6831_v30, %v6888_v0 }
 0x731   : > { %v3236_v30 = vmul.f32 %v3184_v55, %v5770_v36 }
 0x7d8   : > { %v4788_v32 = vpop.f32.mrb[96].mxu1 }
 0x7d9   : > { %v6900_v7 = vadd.f32 %v4788_v32, %v3206_v26  ;;  %v3368_v14 = vpop.f32.mrb[97].mxu1 }
 0x7da   : > { %v6903_v25 = vadd.f32 %v3368_v14, %v3200_v28  ;;  %v4789_v61 = vpop.f32.mrb[98].mxu1  ;;  %v3168_v14 = vadd.f32 %v6784_v34, %v6888_v0 }
 0x7db   : > { %v6908_v17 = vadd.f32 %v4789_v61, %v3209_v31  ;;  %v3371_v21 = vpop.f32.mrb[99].mxu1  ;;  %v3179_v31 = vadd.f32 %v6789_v57, %v6888_v0  ;;  %v3171_v61 = vadd.f32 %v6793_v4, %v6888_v0  ;;  %v3192_v4 = vadd.f32 %v6828_v11, %v6888_v0 }
 0x7dc   : > { %v6912_v42 = vadd.f32 %v3371_v21, %v3203_v58 }
 0x7dd   : > { %v3505_v52 = vpack.c.bf16 %v6908_v17, %v6900_v7  ;;  %v3227_v57 = vmul.f32 %v3171_v61, %v5732_v41 }
 0x7de   : > { %v3504_v2 = vpack.c.bf16 %v6912_v42, %v6903_v25 }
 0x7e0   : > { %v4792_v8 = vpop.f32.mrb[100].mxu1  ;;  %3680 = vmatmul.mubr.bf16.vlgmr.msra.gmra.mrb[104].mxu1 %v3504_v2 }
 0x7e1   : > { %v6924_v33 = vadd.f32 %v4792_v8, %v3218_v43  ;;  %v3384_v45 = vpop.f32.mrb[101].mxu1  ;;  %3687 = vmatprep.mubr.bf16.mxu1 %v6600_v39  ;;  %v3176_v39 = vadd.f32 %v6782_v22, %v6888_v0  ;;  %v3233_v22 = vmul.f32 %v3179_v31, %v5747_v29  ;;  %v3187_v8 = vadd.f32 %v6841_v50, %v6888_v0  ;;  %v6996_v31 = vld [vmem:[%s7141_s6] ss:$0 sm:$0xff] }
 0x7e2   : > { %v6928_v3 = vadd.f32 %v3384_v45, %v3212_v13  ;;  %v4793_v44 = vpop.f32.mrb[102].mxu1  ;;  %v3242_v13 = vmul.f32 %v3192_v4, %v5795_v46 }
 0x7e3   : > { %v6931_v35 = vadd.f32 %v4793_v44, %v3221_v60  ;;  %v3387_v53 = vpop.f32.mrb[103].mxu1  ;;  %v3230_v58 = vmul.f32 %v3176_v39, %v5745_v1  ;;  %v3239_v50 = vmul.f32 %v3187_v8, %v5772_v38 }
 0x7e4   : > { %v6933_v26 = vadd.f32 %v3387_v53, %v3215_v5 }
 0x7e5   : > { %v3507_v32 = vpack.c.bf16 %v6931_v35, %v6924_v33 }
 0x7e6   : > { %v3506_v28 = vpack.c.bf16 %v6933_v26, %v6928_v3 }
 0x7e8   : > { %3688 = vmatmul.mubr.bf16.gmra.mrb[108].mxu1 %v3505_v52 }
 0x7e9   : > { %3695 = vmatprep.mubr.bf16.mxu1 %v6619_v27  ;;  %v3224_v27 = vmul.f32 %v3168_v14, %v5730_v40 }
 0x7f0   : > { %3696 = vmatmul.mubr.bf16.gmra.mrb[112].mxu1 %v3506_v28 }
 0x7f1   : > { %3703 = vmatprep.mubr.bf16.mxu1 %v6638_v62 }
 0x7f8   : > { %v4812_v51 = vpop.f32.mrb[144].mxu0  ;;  %3704 = vmatmul.mubr.bf16.gmra.mrb[116].mxu1 %v3507_v32 }
 0x7f9   : > { %v6951_v21 = vadd.f32 %v4812_v51, %v3230_v58  ;;  %v3457_v62 = vpop.f32.mrb[145].mxu0  ;;  %3711 = vmatprep.mubr.bf16.mxu1 %v6655_v59  ;;  %v3195_v59 = vadd.f32 %v6835_v63, %v6888_v0 }
 0x7fa   : > { %v6955_v34 = vadd.f32 %v3457_v62, %v3224_v27  ;;  %v4813_v9 = vpop.f32.mrb[146].mxu0 }
 0x7fb   : > { %v6960_v6 = vadd.f32 %v4813_v9, %v3233_v22  ;;  %v3460_v52 = vpop.f32.mrb[147].mxu0  ;;  %v3245_v63 = vmul.f32 %v3195_v59, %v5797_v15 }
 0x7fc   : > { %v6964_v2 = vadd.f32 %v3460_v52, %v3227_v57 }
 0x7fd   : > { %v3509_v43 = vpack.c.bf16 %v6960_v6, %v6951_v21 }
 0x7fe   : > { %v3508_v11 = vpack.c.bf16 %v6964_v2, %v6955_v34 }
 0x800   : > { %v4816_v45 = vpop.f32.mrb[148].mxu0  ;;  %3712 = vmatmul.mubr.bf16.gmra.mrb[120].mxu1 %v3508_v11 }
 0x801   : > { %v6976_v60 = vadd.f32 %v4816_v45, %v3242_v13  ;;  %v3473_v44 = vpop.f32.mrb[149].mxu0  ;;  %3719 = vmatprep.mubr.bf16.mxu1 %v6671_v48 }
 0x802   : > { %v6980_v5 = vadd.f32 %v3473_v44, %v3236_v30  ;;  %v4817_v53 = vpop.f32.mrb[150].mxu0 }
 0x803   : > { %v6983_v0 = vadd.f32 %v4817_v53, %v3245_v63  ;;  %v3476_v32 = vpop.f32.mrb[151].mxu0 }
 0x804   : > { %v6985_v28 = vadd.f32 %v3476_v32, %v3239_v50 }
 0x805   : > { %v3511_v39 = vpack.c.bf16 %v6983_v0, %v6976_v60 }
 0x806   : > { %v3510_v14 = vpack.c.bf16 %v6985_v28, %v6980_v5 }
 0x808   : > { %3720 = vmatmul.mubr.bf16.gmra.mrb[124].mxu1 %v3509_v43 }
 0x809   : > { %3727 = vmatprep.mubr.bf16.mxu1 %v6687_v47 }
 0x810   : > { %3728 = vmatmul.mubr.bf16.gmra.mrb[128].mxu1 %v3510_v14 }
 0x811   : > { %3735 = vmatprep.mubr.bf16.mxu1 %v6700_v24 }
 0x818   : > { %3736 = vmatmul.mubr.bf16.gmra.mrb[132].mxu1 %v3511_v39 }
 0x8b3   : > { %v4530_v48 = vpop.f32.mrb[104].mxu1 }
 0x8b4   : > { %v4531_v61 = vpop.f32.mrb[105].mxu1 }
 0x8b5   : > { %v4532_v58 = vadd.f32 %v4531_v61, %v4530_v48  ;;  %v4533_v51 = vpop.f32.mrb[106].mxu1 }
 0x8b6   : > { %v4534_v27 = vpop.f32.mrb[107].mxu1 }
 0x8b7   : > { %v3682_v62 = vadd.f32 %v4532_v58, %v6996_v31  ;;  %v4535_v22 = vadd.f32 %v4534_v27, %v4533_v51 }
 0x8b9   : > { %v4243_v9 = vmul.f32 -1.442695, %v3682_v62  ;;  %v3685_v47 = vadd.f32 %v4535_v22, %v6996_v31 }
 0x8bb   : > { %5222 = vpow2.f32 %v4243_v9  ;;  %v4244_v57 = vmul.f32 -1.442695, %v3685_v47  ;;  %v4536_v24 = vpop.f32.mrb[108].mxu1 }
 0x8bc   : > { %v4537_v4 = vpop.f32.mrb[109].mxu1 }
 0x8bd   : > { %5224 = vpow2.f32 %v4244_v57  ;;  %v4538_v52 = vadd.f32 %v4537_v4, %v4536_v24  ;;  %v4539_v55 = vpop.f32.mrb[110].mxu1 }
 0x8be   : > { %v4540_v59 = vpop.f32.mrb[111].mxu1 }
 0x8bf   : > { %v3690_v43 = vadd.f32 %v4538_v52, %v6996_v31  ;;  %v4541_v8 = vadd.f32 %v4540_v59, %v4539_v55 }
 0x8c1   : > { %v4245_v11 = vmul.f32 -1.442695, %v3690_v43  ;;  %v3693_v13 = vadd.f32 %v4541_v8, %v6996_v31 }
 0x8c3   : > { %5226 = vpow2.f32 %v4245_v11  ;;  %v4246_v45 = vmul.f32 -1.442695, %v3693_v13  ;;  %v4542_v30 = vpop.f32.mrb[112].mxu1 }
 0x8c4   : > { %v4543_v44 = vpop.f32.mrb[113].mxu1 }
 0x8c5   : > { %v5223_v63 = vpop.eup %5222  ;;  %5228 = vpow2.f32 %v4246_v45  ;;  %v4544_v53 = vadd.f32 %v4543_v44, %v4542_v30  ;;  %v4545_v50 = vpop.f32.mrb[114].mxu1 }
 0x8c6   : > { %v3792_v32 = vadd.f32 1.0, %v5223_v63  ;;  %v4546_v39 = vpop.f32.mrb[115].mxu1 }
 0x8c7   : > { %v5225_v14 = vpop.eup %5224  ;;  %v3698_v48 = vadd.f32 %v4544_v53, %v6996_v31  ;;  %v4547_v61 = vadd.f32 %v4546_v39, %v4545_v50 }
 0x8c8   : > { %5230 = vrcp.f32 %v3792_v32  ;;  %v3793_v58 = vadd.f32 1.0, %v5225_v14 }
 0x8c9   : > { %5232 = vtanh.f32 %v6903_v25  ;;  %v4247_v51 = vmul.f32 -1.442695, %v3698_v48  ;;  %v3701_v27 = vadd.f32 %v4547_v61, %v6996_v31 }
 0x8ca   : > { %5234 = vrcp.f32 %v3793_v58 }
 0x8cb   : > { %5236 = vpow2.f32 %v4247_v51  ;;  %v4248_v62 = vmul.f32 -1.442695, %v3701_v27  ;;  %v4548_v22 = vpop.f32.mrb[116].mxu1 }
 0x8cc   : > { %5238 = vtanh.f32 %v6912_v42  ;;  %v4549_v9 = vpop.f32.mrb[117].mxu1 }
 0x8cd   : > { %v5227_v47 = vpop.eup %5226  ;;  %5240 = vpow2.f32 %v4248_v62  ;;  %v4550_v57 = vadd.f32 %v4549_v9, %v4548_v22  ;;  %v4551_v24 = vpop.f32.mrb[118].mxu1 }
 0x8ce   : > { %v3794_v4 = vadd.f32 1.0, %v5227_v47  ;;  %v4552_v52 = vpop.f32.mrb[119].mxu1 }
 0x8cf   : > { %v5229_v55 = vpop.eup %5228  ;;  %v3706_v25 = vadd.f32 %v4550_v57, %v6996_v31  ;;  %v4553_v59 = vadd.f32 %v4552_v52, %v4551_v24 }
 0x8d0   : > { %5242 = vrcp.f32 %v3794_v4  ;;  %v3795_v43 = vadd.f32 1.0, %v5229_v55 }
 0x8d1   : > { %5244 = vtanh.f32 %v6900_v7  ;;  %v4249_v8 = vmul.f32 -1.442695, %v3706_v25  ;;  %v3709_v42 = vadd.f32 %v4553_v59, %v6996_v31 }
 0x8d2   : > { %v5231_v11 = vpop.eup %5230  ;;  %5246 = vrcp.f32 %v3795_v43 }
 0x8d3   : > { %v5233_v13 = vpop.eup %5232  ;;  %v3840_v45 = vmul.f32 %v5231_v11, %v5672_v10  ;;  %5248 = vpow2.f32 %v4249_v8  ;;  %v4250_v30 = vmul.f32 -1.442695, %v3709_v42  ;;  %v4554_v44 = vpop.f32.mrb[120].mxu1 }
 0x8d4   : > { %v5235_v63 = vpop.eup %5234  ;;  %5250 = vtanh.f32 %v6908_v17  ;;  %v4555_v53 = vpop.f32.mrb[121].mxu1 }
 0x8d5   : > { %v5237_v50 = vpop.eup %5236  ;;  %v3872_v7 = vmul.f32 %v5233_v13, %v3840_v45  ;;  %v3888_v32 = vsub.f32 1.0, %v3840_v45  ;;  %v3841_v39 = vmul.f32 %v5235_v63, %v5681_v19  ;;  %5252 = vpow2.f32 %v4250_v30  ;;  %v4557_v14 = vpop.f32.mrb[122].mxu1 }
 0x8d6   : > { %v5239_v48 = vpop.eup %5238  ;;  %v3796_v61 = vadd.f32 1.0, %v5237_v50  ;;  %v4556_v58 = vadd.f32 %v4555_v53, %v4554_v44  ;;  %v4558_v10 = vpop.f32.mrb[123].mxu1 }
 0x8d7   : > { %v5241_v51 = vpop.eup %5240  ;;  %v3904_v27 = vmul.f32 %v3888_v32, %v6570_v12  ;;  %v3873_v62 = vmul.f32 %v5239_v48, %v3841_v39  ;;  %v3889_v22 = vsub.f32 1.0, %v3841_v39  ;;  %v4559_v17 = vadd.f32 %v4558_v10, %v4557_v14  ;;  %v7219_v48 = vld [vmem:[#allocation8_spill] sm:$0xff] }
 0x8d8   : > { %5254 = vrcp.f32 %v3796_v61  ;;  %v3797_v9 = vadd.f32 1.0, %v5241_v51  ;;  %v3714_v47 = vadd.f32 %v4556_v58, %v6996_v31 }
 0x8d9   : > { %5256 = vtanh.f32 %v6928_v3  ;;  %v3920_v57 = vadd.f32 %v3904_v27, %v3872_v7  ;;  %v3905_v19 = vmul.f32 %v3889_v22, %v6575_v49  ;;  %v3717_v24 = vadd.f32 %v4559_v17, %v6996_v31 }
 0x8da   : > { %v5243_v4 = vpop.eup %5242  ;;  %5258 = vrcp.f32 %v3797_v9  ;;  %v4251_v52 = vmul.f32 -1.442695, %v3714_v47 }
 0x8db   : > { %v5245_v55 = vpop.eup %5244  ;;  %5260 = vtanh.f32 %v6933_v26  ;;  %3936 = vst [vmem:[%s7021_s9] sm:$0xff] %v3920_v57  ;;  %v3921_v12 = vadd.f32 %v3905_v19, %v3873_v62  ;;  %v3842_v25 = vmul.f32 %v5243_v4, %v5686_v23  ;;  %v4252_v3 = vmul.f32 -1.442695, %v3717_v24  ;;  %v4560_v59 = vpop.f32.mrb[124].mxu1 }
 0x8dc   : > { %v5247_v43 = vpop.eup %5246  ;;  %5262 = vpow2.f32 %v4251_v52  ;;  %v4561_v49 = vpop.f32.mrb[125].mxu1 }
 0x8dd   : > { %v5249_v8 = vpop.eup %5248  ;;  %3937 = vst [vmem:[%s7021_s9 + $0x8] sm:$0xff] %v3921_v12  ;;  %v3874_v42 = vmul.f32 %v5245_v55, %v3842_v25  ;;  %v3890_v11 = vsub.f32 1.0, %v3842_v25  ;;  %v3843_v13 = vmul.f32 %v5247_v43, %v5695_v37  ;;  %5264 = vpow2.f32 %v4252_v3  ;;  %v4563_v26 = vpop.f32.mrb[126].mxu1  ;;  %v7220_v25 = vld [vmem:[#allocation9_spill] sm:$0xff] }
 0x8de   : > { %v5251_v45 = vpop.eup %5250  ;;  %v3798_v30 = vadd.f32 1.0, %v5249_v8  ;;  %v4562_v44 = vadd.f32 %v4561_v49, %v4560_v59  ;;  %v4564_v63 = vpop.f32.mrb[127].mxu1 }
 0x8df   : > { %v5253_v53 = vpop.eup %5252  ;;  %v3906_v23 = vmul.f32 %v3890_v11, %v6588_v16  ;;  %v3875_v50 = vmul.f32 %v5251_v45, %v3843_v13  ;;  %v3891_v7 = vsub.f32 1.0, %v3843_v13  ;;  %v4565_v32 = vadd.f32 %v4564_v63, %v4563_v26 }
 0x8e0   : > { %5266 = vrcp.f32 %v3798_v30  ;;  %v3799_v39 = vadd.f32 1.0, %v5253_v53  ;;  %v3722_v14 = vadd.f32 %v4562_v44, %v6996_v31 }
 0x8e1   : > { %5268 = vtanh.f32 %v6924_v33  ;;  %v3922_v37 = vadd.f32 %v3906_v23, %v3874_v42  ;;  %v3907_v61 = vmul.f32 %v3891_v7, %v7219_v48  ;;  %v3725_v58 = vadd.f32 %v4565_v32, %v6996_v31 }
 0x8e2   : > { %v5255_v10 = vpop.eup %5254  ;;  %5270 = vrcp.f32 %v3799_v39  ;;  %v4253_v51 = vmul.f32 -1.442695, %v3722_v14 }
 0x8e3   : > { %v5257_v16 = vpop.eup %5256  ;;  %5272 = vtanh.f32 %v6931_v35  ;;  %3938 = vst [vmem:[%s7021_s9 + $0x10] sm:$0xff] %v3922_v37  ;;  %v3923_v27 = vadd.f32 %v3907_v61, %v3875_v50  ;;  %v3844_v62 = vmul.f32 %v5255_v10, %v5705_v54  ;;  %v4254_v22 = vmul.f32 -1.442695, %v3725_v58  ;;  %v4566_v17 = vpop.f32.mrb[128].mxu1 }
 0x8e4   : > { %v5259_v9 = vpop.eup %5258  ;;  %5274 = vpow2.f32 %v4253_v51  ;;  %v4567_v33 = vpop.f32.mrb[129].mxu1  ;;  %v7222_v51 = vld [vmem:[#allocation11_spill] sm:$0xff] }
 0x8e5   : > { %v5261_v47 = vpop.eup %5260  ;;  %3939 = vst [vmem:[%s7021_s9 + $0x18] sm:$0xff] %v3923_v27  ;;  %v3876_v57 = vmul.f32 %v5257_v16, %v3844_v62  ;;  %v3892_v19 = vsub.f32 1.0, %v3844_v62  ;;  %v3845_v24 = vmul.f32 %v5259_v9, %v5707_v56  ;;  %5276 = vpow2.f32 %v4254_v22  ;;  %v4569_v4 = vpop.f32.mrb[130].mxu1  ;;  %v7221_v56 = vld [vmem:[#allocation10_spill] sm:$0xff] }
 0x8e6   : > { %v5263_v52 = vpop.eup %5262  ;;  %v4568_v55 = vadd.f32 %v4567_v33, %v4566_v17  ;;  %v4570_v35 = vpop.f32.mrb[131].mxu1  ;;  %5278 = vtanh.f32 %v6955_v34 }
 0x8e7   : > { %v5265_v12 = vpop.eup %5264  ;;  %v3908_v3 = vmul.f32 %v3892_v19, %v7220_v25  ;;  %v3877_v54 = vmul.f32 %v5261_v47, %v3845_v24  ;;  %v3893_v59 = vsub.f32 1.0, %v3845_v24  ;;  %v3800_v43 = vadd.f32 1.0, %v5263_v52 }
 0x8e8   : > { %v3801_v49 = vadd.f32 1.0, %v5265_v12  ;;  %v3730_v8 = vadd.f32 %v4568_v55, %v6996_v31  ;;  %v4571_v42 = vadd.f32 %v4570_v35, %v4569_v4 }
 0x8e9   : > { %v3924_v11 = vadd.f32 %v3908_v3, %v3876_v57  ;;  %v3909_v13 = vmul.f32 %v3893_v59, %v7221_v56  ;;  %5280 = vrcp.f32 %v3800_v43 }
 0x8ea   : > { %v5267_v26 = vpop.eup %5266  ;;  %5282 = vrcp.f32 %v3801_v49  ;;  %v4255_v45 = vmul.f32 -1.442695, %v3730_v8  ;;  %v3733_v30 = vadd.f32 %v4571_v42, %v6996_v31  ;;  %v7224_v8 = vld [vmem:[#allocation13_spill] sm:$0xff] }
 0x8eb   : > { %v5269_v44 = vpop.eup %5268  ;;  %5284 = vtanh.f32 %v6964_v2  ;;  %3940 = vst [vmem:[%s7021_s9 + $0x20] sm:$0xff] %v3924_v11  ;;  %v3925_v63 = vadd.f32 %v3909_v13, %v3877_v54  ;;  %v3846_v34 = vmul.f32 %v5267_v26, %v5717_v18  ;;  %v4572_v53 = vpop.f32.mrb[132].mxu1  ;;  %v7225_v11 = vld [vmem:[#allocation14_spill] sm:$0xff] }
 0x8ec   : > { %v5271_v23 = vpop.eup %5270  ;;  %5286 = vpow2.f32 %v4255_v45  ;;  %v4256_v50 = vmul.f32 -1.442695, %v3733_v30  ;;  %v4573_v7 = vpop.f32.mrb[133].mxu1 }
 0x8ed   : > { %v5273_v32 = vpop.eup %5272  ;;  %3941 = vst [vmem:[%s7021_s9 + $0x28] sm:$0xff] %v3925_v63  ;;  %v3878_v39 = vmul.f32 %v5269_v44, %v3846_v34  ;;  %v3894_v14 = vsub.f32 1.0, %v3846_v34  ;;  %v3847_v37 = vmul.f32 %v5271_v23, %v5719_v20  ;;  %v4574_v48 = vadd.f32 %v4573_v7, %v4572_v53  ;;  %v4575_v61 = vpop.f32.mrb[134].mxu1  ;;  %v7223_v20 = vld [vmem:[#allocation12_spill] sm:$0xff] }
 0x8ee   : > { %v5275_v58 = vpop.eup %5274  ;;  %5288 = vpow2.f32 %v4256_v50  ;;  %v4576_v2 = vpop.f32.mrb[135].mxu1 }
 0x8ef   : > { %v5277_v10 = vpop.eup %5276  ;;  %v3910_v16 = vmul.f32 %v3894_v14, %v7222_v51  ;;  %v3879_v18 = vmul.f32 %v5273_v32, %v3847_v37  ;;  %v3895_v27 = vsub.f32 1.0, %v3847_v37  ;;  %v3802_v62 = vadd.f32 1.0, %v5275_v58  ;;  %v7226_v14 = vld [vmem:[#allocation15_spill] sm:$0xff] }
 0x8f0   : > { %5290 = vtanh.f32 %v6951_v21  ;;  %v3803_v22 = vadd.f32 1.0, %v5277_v10  ;;  %v3738_v17 = vadd.f32 %v4574_v48, %v6996_v31  ;;  %v4577_v9 = vadd.f32 %v4576_v2, %v4575_v61  ;;  %v5279_v57 = vpop.eup %5278  ;;  %v7227_v48 = vld [vmem:[#allocation16_spill] sm:$0xff] }
 0x8f1   : > { %v3926_v33 = vadd.f32 %v3910_v16, %v3878_v39  ;;  %v3911_v47 = vmul.f32 %v3895_v27, %v7223_v20  ;;  %5292 = vrcp.f32 %v3802_v62  ;;  %v7229_v20 = vld [vmem:[#allocation18_spill] sm:$0xff] }
 0x8f2   : > { %5294 = vrcp.f32 %v3803_v22  ;;  %v4257_v19 = vmul.f32 -1.442695, %v3738_v17  ;;  %v3741_v24 = vadd.f32 %v4577_v9, %v6996_v31 }
 0x8f3   : > { %v5281_v4 = vpop.eup %5280  ;;  %5296 = vtanh.f32 %v6960_v6  ;;  %3942 = vst [vmem:[%s7021_s9 + $0x30] sm:$0xff] %v3926_v33  ;;  %v3927_v52 = vadd.f32 %v3911_v47, %v3879_v18 }
 0x8f4   : > { %v5283_v21 = vpop.eup %5282  ;;  %v3848_v55 = vmul.f32 %v5281_v4, %v5730_v40  ;;  %5298 = vpow2.f32 %v4257_v19  ;;  %v4258_v35 = vmul.f32 -1.442695, %v3741_v24 }
 0x8f5   : > { %v5285_v12 = vpop.eup %5284  ;;  %3943 = vst [vmem:[%s7021_s9 + $0x38] sm:$0xff] %v3927_v52  ;;  %v3849_v25 = vmul.f32 %v5283_v21, %v5732_v41 }
 0x8f6   : > { %v5287_v3 = vpop.eup %5286  ;;  %v3880_v54 = vmul.f32 %v5279_v57, %v3848_v55  ;;  %v3896_v59 = vsub.f32 1.0, %v3848_v55  ;;  %5300 = vpow2.f32 %v4258_v35  ;;  %v7230_v55 = vld [vmem:[#allocation19_spill] sm:$0xff] }
 0x8f7   : > { %v3881_v31 = vmul.f32 %v5285_v12, %v3849_v25  ;;  %v3897_v43 = vsub.f32 1.0, %v3849_v25  ;;  %v3804_v49 = vadd.f32 1.0, %v5287_v3 }
 0x8f8   : > { %v5289_v6 = vpop.eup %5288  ;;  %v3912_v42 = vmul.f32 %v3896_v59, %v7224_v8 }
 0x8f9   : > { %v3913_v40 = vmul.f32 %v3897_v43, %v7225_v11  ;;  %5302 = vrcp.f32 %v3804_v49  ;;  %v3805_v56 = vadd.f32 1.0, %v5289_v6 }
 0x8fa   : > { %v5291_v13 = vpop.eup %5290  ;;  %5304 = vtanh.f32 %v6980_v5  ;;  %v3928_v41 = vadd.f32 %v3912_v42, %v3880_v54  ;;  %v7231_v54 = vld [vmem:[#allocation20_spill] sm:$0xff] }
 0x8fb   : > { %v5293_v26 = vpop.eup %5292  ;;  %v3929_v45 = vadd.f32 %v3913_v40, %v3881_v31  ;;  %5306 = vrcp.f32 %v3805_v56 }
 0x8fc   : > { %v5295_v30 = vpop.eup %5294  ;;  %3944 = vst [vmem:[%s7021_s9 + $0x40] sm:$0xff] %v3928_v41  ;;  %v3850_v44 = vmul.f32 %v5293_v26, %v5745_v1  ;;  %5308 = vtanh.f32 %v6985_v28 }
 0x8fd   : > { %v5297_v63 = vpop.eup %5296  ;;  %3945 = vst [vmem:[%s7021_s9 + $0x48] sm:$0xff] %v3929_v45  ;;  %v3851_v34 = vmul.f32 %v5295_v30, %v5747_v29 }
 0x8fe   : > { %v5299_v53 = vpop.eup %5298  ;;  %v3882_v23 = vmul.f32 %v5291_v13, %v3850_v44  ;;  %v3898_v50 = vsub.f32 1.0, %v3850_v44 }
 0x8ff   : > { %v3883_v7 = vmul.f32 %v5297_v63, %v3851_v34  ;;  %v3899_v5 = vsub.f32 1.0, %v3851_v34  ;;  %v3806_v32 = vadd.f32 1.0, %v5299_v53 }
 0x900   : > { %v5301_v39 = vpop.eup %5300  ;;  %v3914_v37 = vmul.f32 %v3898_v50, %v7226_v14 }
 0x901   : > { %v3915_v61 = vmul.f32 %v3899_v5, %v7227_v48  ;;  %5310 = vrcp.f32 %v3806_v32  ;;  %v3807_v1 = vadd.f32 1.0, %v5301_v39 }
 0x902   : > { %5312 = vtanh.f32 %v6976_v60  ;;  %v3930_v28 = vadd.f32 %v3914_v37, %v3882_v23  ;;  %v7228_v60 = vld [vmem:[#allocation17_spill] sm:$0xff] }
 0x903   : > { %v5303_v58 = vpop.eup %5302  ;;  %v3931_v29 = vadd.f32 %v3915_v61, %v3883_v7  ;;  %5314 = vrcp.f32 %v3807_v1 }
 0x904   : > { %v5305_v2 = vpop.eup %5304  ;;  %3946 = vst [vmem:[%s7021_s9 + $0x50] sm:$0xff] %v3930_v28  ;;  %v3852_v10 = vmul.f32 %v5303_v58, %v5770_v36  ;;  %5316 = vtanh.f32 %v6983_v0 }
 0x905   : > { %v5307_v51 = vpop.eup %5306  ;;  %3947 = vst [vmem:[%s7021_s9 + $0x58] sm:$0xff] %v3931_v29 }
 0x906   : > { %v3884_v16 = vmul.f32 %v5305_v2, %v3852_v10  ;;  %v3900_v18 = vsub.f32 1.0, %v3852_v10  ;;  %v3853_v27 = vmul.f32 %v5307_v51, %v5772_v38  ;;  %v5309_v62 = vpop.eup %5308 }
 0x908   : > { %v3916_v22 = vmul.f32 %v3900_v18, %v7228_v60  ;;  %v3885_v17 = vmul.f32 %v5309_v62, %v3853_v27  ;;  %v3901_v9 = vsub.f32 1.0, %v3853_v27 }
 0x90a   : > { %v3932_v33 = vadd.f32 %v3916_v22, %v3884_v16  ;;  %v3917_v47 = vmul.f32 %v3901_v9, %v7229_v20 }
 0x90b   : > { %v5311_v36 = vpop.eup %5310 }
 0x90c   : > { %v5313_v57 = vpop.eup %5312  ;;  %3948 = vst [vmem:[%s7021_s9 + $0x60] sm:$0xff] %v3932_v33  ;;  %v3933_v0 = vadd.f32 %v3917_v47, %v3885_v17  ;;  %v3854_v19 = vmul.f32 %v5311_v36, %v5795_v46 }
 0x90d   : > { %v5315_v24 = vpop.eup %5314 }
 0x90e   : > { %3949 = vst [vmem:[%s7021_s9 + $0x68] sm:$0xff] %v3933_v0  ;;  %v3886_v38 = vmul.f32 %v5313_v57, %v3854_v19  ;;  %v3902_v4 = vsub.f32 1.0, %v3854_v19  ;;  %v3855_v52 = vmul.f32 %v5315_v24, %v5797_v15  ;;  %v5317_v21 = vpop.eup %5316 }
 0x910   : > { %v3918_v35 = vmul.f32 %v3902_v4, %v7230_v55  ;;  %v3887_v12 = vmul.f32 %v5317_v21, %v3855_v52  ;;  %v3903_v25 = vsub.f32 1.0, %v3855_v52 }
 0x912   : > { %v3934_v3 = vadd.f32 %v3918_v35, %v3886_v38  ;;  %v3919_v46 = vmul.f32 %v3903_v25, %v7231_v54 }
 0x914   : > { %3950 = vst [vmem:[%s7021_s9 + $0x70] sm:$0xff] %v3934_v3  ;;  %v3935_v15 = vadd.f32 %v3919_v46, %v3887_v12 }
 0x916   : > { %3951 = vst [vmem:[%s7021_s9 + $0x78] sm:$0xff] %v3935_v15 }
 0x917   : > { %5347 = shalt.err (!%p5344_p4)
}
 0x918   : > { %s5348_s19 = scalar_lea.hbm %s7086_s15, 2048  ;;  %s5352_s23 = scalar_lea.hbm %s7142_s7, 8192 }
 0x919   : > { %p5349_p7 = scmp.ne.s32.totalorder %s7086_s15, %s5348_s19  ;;  %p5353_p10 = scmp.lt.u32.totalorder %s7086_s15, %s7142_s7 }
 0x91a   : > { %p5354_p11 = scmp.lt.u32.totalorder %s5352_s23, %s5348_s19  ;;  %p5356_p13 = scmp.lt.u32.totalorder %s5348_s19, %s7086_s15 }
 0x91b   : > { %p5350_p8 = pnand %p5349_p7, %p5480_p5 }
 0x91c   : > { %p5355_p12 = por %p5354_p11, %p5353_p10 }
 0x91d   : > { %p5351_p9 = pneg %p5350_p8 }
 0x91e   : > { %p5357_p0 = por %p5356_p13, %p5355_p12 }
 0x920   : > { %p5358_p1 = pnand %p5357_p0, %p5351_p9 }
 0x922   : > { %5361 = shalt.err (!%p5358_p1)
}
 0x923   : > { %s5400_s16 = smov 128   ;;  %s5401_s14 = smov 8  }
 0x924   : > { %4818 = dma.vmem_to_hbm [thread:$0]  (%p5480_p5), %s7088_s13, 2048, %s7086_s15, %s7094_s17, %s5400_s16, %s5400_s16, %s5401_s14  }
 0x925 PF: > { %p4824_p2 = scmp.ge.s32.totalorder %s5396_s27, 2  ;;  %s3981_s28 = sand.u32 1, %s5384_s24  }
 0x926   : > { %s3982_s18 = scalar_lea.sflag [#allocation4], %s3981_s28 }
 0x927   : > { %p4821_p3 = pnand %p4824_p2, %p5484_p6 }
 0x929   : > { %5379 = dma.done.wait (!%p4821_p3), %s3982_s18, 2048  }
 0x92a   : > { %5381 = vsyncadd (!%p4821_p3), %s3982_s18, 4294965248  ;;  %p17_p4 = scmp.ge.s32.totalorder %s5467_s30, 6   ;;  %s7232_s24 = smov %s5388_s25 }
 0x92b   : > { %s7233_s25 = smov %s5392_s26  ;;  %s7234_s26 = smov %s5478_s10 }
 0x92c   : > { %s7235_s27 = smov %s5467_s30  ;;  %19 = sbr.rel (!%p17_p4) target bundleno = 3 (0x3), region = 90 }
 0x933   :  { %3987 = vsyncpa [#allocation4], 1 }
 0x934   :  { %3989 = vsyncpa [#allocation4 + $0x1], 1 }

</bundles_post_ra>
